<compile_context>
chip_gen: v7x
topology: tpu7x:2x2x1
jax: 0.10.0
libtpu: 0.0.40
codegen_flags: <defaults>
</compile_context>

<pallas_src>
import jax
import jax.numpy as jnp
from jax.experimental import pallas as pl
from jax.experimental.pallas import tpu as pltpu

_LANE = 128
_SUBLANE = 8


def _round_up(x, m):
    return ((x + m - 1) // m) * m


def _forward_backward_kernel(x_ref, xr_ref, wf_ref, wb_ref, b_ref, o_ref):
    # x_ref:  (tile_t, n_vis)      forward-convolved visible spikes tile
    # xr_ref: (tile_t, n_vis)      reverse-convolved visible spikes tile
    # wf_ref: (n_vis, n_hid_pad)   linear_forward.weight^T  (lane-padded, resident)
    # wb_ref: (n_vis, n_hid_pad)   linear_backward.weight^T (lane-padded, resident)
    # b_ref:  (1, n_hid_pad)       linear_forward.bias      (lane-padded, resident)
    # o_ref:  (tile_t, n_hid_pad)  sigmoid output tile (lane-dense)
    fwd = jnp.dot(x_ref[...], wf_ref[...], preferred_element_type=jnp.float32)
    bwd = jnp.dot(xr_ref[...], wb_ref[...], preferred_element_type=jnp.float32)
    logits = fwd + (bwd + b_ref[...])      # bias broadcasts over rows
    o_ref[...] = jax.nn.sigmoid(logits).astype(o_ref.dtype)


def forward_backward(convolved_vis_spikes, rev_convolved_vis_spikes,
                     w_forward, b_forward, w_backward, *, tile_t=1024):
    """Pallas implementation of ForwardBackward.forward.

    convolved_vis_spikes:     (T, n_vis) float32
    rev_convolved_vis_spikes: (T, n_vis) float32
    w_forward:                (n_hid, n_vis) float32  (PyTorch layout)
    b_forward:                (n_hid,)       float32
    w_backward:               (n_hid, n_vis) float32  (PyTorch layout)
    returns:                  (T, n_hid) float32
    """
    T, n_vis = convolved_vis_spikes.shape
    n_hid = w_forward.shape[0]

    x = jnp.asarray(convolved_vis_spikes, jnp.float32)
    xr = jnp.asarray(rev_convolved_vis_spikes, jnp.float32)

    # ---- lane-dense hidden dim: pad n_hid to a multiple of 128 ----
    n_hid_pad = _round_up(n_hid, _LANE)
    wf_t = jnp.zeros((n_vis, n_hid_pad), jnp.float32).at[:, :n_hid].set(
        jnp.asarray(w_forward, jnp.float32).T)
    wb_t = jnp.zeros((n_vis, n_hid_pad), jnp.float32).at[:, :n_hid].set(
        jnp.asarray(w_backward, jnp.float32).T)
    bias = jnp.zeros((1, n_hid_pad), jnp.float32).at[0, :n_hid].set(
        jnp.asarray(b_forward, jnp.float32))

    # ---- time tile: shrink to the problem for small T, else fixed big tile ----
    tile_t = max(_SUBLANE, _round_up(min(int(tile_t), T), _SUBLANE))
    T_pad = _round_up(T, tile_t)
    if T_pad != T:
        x = jnp.pad(x, ((0, T_pad - T), (0, 0)))
        xr = jnp.pad(xr, ((0, T_pad - T), (0, 0)))

    grid = (T_pad // tile_t,)

    out_padded = pl.pallas_call(
        _forward_backward_kernel,
        out_shape=jax.ShapeDtypeStruct((T_pad, n_hid_pad), jnp.float32),
        grid_spec=pltpu.PrefetchScalarGridSpec(
            num_scalar_prefetch=0,
            grid=grid,
            in_specs=[
                pl.BlockSpec((tile_t, n_vis), lambda i: (i, 0)),      # x (streamed)
                pl.BlockSpec((tile_t, n_vis), lambda i: (i, 0)),      # xr (streamed)
                pl.BlockSpec((n_vis, n_hid_pad), lambda i: (0, 0)),   # Wf^T (resident)
                pl.BlockSpec((n_vis, n_hid_pad), lambda i: (0, 0)),   # Wb^T (resident)
                pl.BlockSpec((1, n_hid_pad), lambda i: (0, 0)),       # bias (resident)
            ],
            out_specs=pl.BlockSpec((tile_t, n_hid_pad), lambda i: (i, 0)),
        ),
        compiler_params=pltpu.CompilerParams(
            dimension_semantics=("parallel",)),
    )(x, xr, wf_t, wb_t, bias)

    # drop the time padding and the lane padding
    return out_padded[:T, :n_hid]


def _reference(x, xr, wf, bf, wb):
    # pure-JAX reference mirroring torch.sigmoid(Lf(x) + Lb(xr))
    return jax.nn.sigmoid(x @ wf.T + bf + xr @ wb.T)


if __name__ == "__main__":
    # Module-consistent shapes:
    #   n_neurons = 8, n_vis_neurons = 4  -> n_hid_neurons = 4
    #   T (time steps) = 1000  (ragged vs the 8-row sublane requirement ->
    #   exercises the padding path)
    n_neurons = 8
    n_vis = 4
    n_hid = n_neurons - n_vis
    T = 1000

    key = jax.random.PRNGKey(0)
    k_x, k_xr, k_wf, k_bf, k_wb = jax.random.split(key, 5)

    # deterministic synthetic inputs (convolved visible spikes are >= 0)
    convolved_vis_spikes = jax.random.uniform(k_x, (T, n_vis), jnp.float32)
    rev_convolved_vis_spikes = jax.random.uniform(k_xr, (T, n_vis), jnp.float32)

    # deterministic parameter init (shapes from nn.Linear(n_vis, n_hid))
    w_forward = 0.1 * jax.random.normal(k_wf, (n_hid, n_vis), jnp.float32)
    b_forward = 0.1 * jax.random.normal(k_bf, (n_hid,), jnp.float32)
    w_backward = 0.1 * jax.random.normal(k_wb, (n_hid, n_vis), jnp.float32)

    out = forward_backward(convolved_vis_spikes, rev_convolved_vis_spikes,
                           w_forward, b_forward, w_backward)
    out = jax.block_until_ready(out)

    ref = _reference(convolved_vis_spikes, rev_convolved_vis_spikes,
                     w_forward, b_forward, w_backward)
    assert out.shape == (T, n_hid)
    assert jnp.allclose(out, ref, atol=1e-5, rtol=1e-5), "mismatch vs reference"

    # TODO(synk): sample_and_log_likelihood (Poisson sampling + spike-basis
    # convolution) is stochastic / framework-level glue and is not part of the
    # forward() hot path implemented here.
    print("KERNEL_OK")
</pallas_src>

<mosaic_0001>
module attributes {stable_mosaic.version = 11 : i64} {
  func.func @_forward_backward_kernel(%arg0: i32, %arg1: memref<1000x4xf32, #tpu.memory_space<vmem>>, %arg2: memref<1000x4xf32, #tpu.memory_space<vmem>>, %arg3: memref<4x128xf32, #tpu.memory_space<vmem>>, %arg4: memref<4x128xf32, #tpu.memory_space<vmem>>, %arg5: memref<1x128xf32, #tpu.memory_space<vmem>>, %arg6: memref<1000x128xf32, #tpu.memory_space<vmem>>) attributes {dimension_semantics = [#tpu.dimension_semantics<parallel>], iteration_bounds = array<i64: 1>, scalar_prefetch = 0 : i64, scratch_operands = 0 : i64, tpu.core_type = #tpu.core_type<tc>, window_params = [{transform_indices = @transform_0, window_bounds = array<i64: 1000, 4>}, {transform_indices = @transform_1, window_bounds = array<i64: 1000, 4>}, {pipeline_mode = #tpu.pipeline_mode<synchronous>, transform_indices = @transform_2, window_bounds = array<i64: 4, 128>}, {pipeline_mode = #tpu.pipeline_mode<synchronous>, transform_indices = @transform_3, window_bounds = array<i64: 4, 128>}, {pipeline_mode = #tpu.pipeline_mode<synchronous>, transform_indices = @transform_4, window_bounds = array<i64: 1, 128>}, {transform_indices = @transform_5, window_bounds = array<i64: 1000, 128>}]} {
    %c0 = arith.constant 0 : index
    %c0_0 = arith.constant 0 : index
    %0 = vector.load %arg1[%c0, %c0_0] : memref<1000x4xf32, #tpu.memory_space<vmem>>, vector<1000x4xf32>
    %c0_1 = arith.constant 0 : index
    %c0_2 = arith.constant 0 : index
    %1 = vector.load %arg3[%c0_1, %c0_2] : memref<4x128xf32, #tpu.memory_space<vmem>>, vector<4x128xf32>
    %cst = arith.constant dense<0.000000e+00> : vector<1000x128xf32>
    %2 = tpu.matmul %0, %1, %cst {dimension_numbers = #tpu.dot_dimension_numbers<[1], [0], [0], [1], [0, 0, 1, 1], [], []>} : vector<1000x4xf32>, vector<4x128xf32>, vector<1000x128xf32> -> vector<1000x128xf32>
    %c0_3 = arith.constant 0 : index
    %c0_4 = arith.constant 0 : index
    %3 = vector.load %arg2[%c0_3, %c0_4] : memref<1000x4xf32, #tpu.memory_space<vmem>>, vector<1000x4xf32>
    %c0_5 = arith.constant 0 : index
    %c0_6 = arith.constant 0 : index
    %4 = vector.load %arg4[%c0_5, %c0_6] : memref<4x128xf32, #tpu.memory_space<vmem>>, vector<4x128xf32>
    %cst_7 = arith.constant dense<0.000000e+00> : vector<1000x128xf32>
    %5 = tpu.matmul %3, %4, %cst_7 {dimension_numbers = #tpu.dot_dimension_numbers<[1], [0], [0], [1], [0, 0, 1, 1], [], []>} : vector<1000x4xf32>, vector<4x128xf32>, vector<1000x128xf32> -> vector<1000x128xf32>
    %c0_8 = arith.constant 0 : index
    %c0_9 = arith.constant 0 : index
    %6 = vector.load %arg5[%c0_8, %c0_9] : memref<1x128xf32, #tpu.memory_space<vmem>>, vector<1x128xf32>
    %7 = vector.broadcast %6 : vector<1x128xf32> to vector<1000x128xf32>
    %8 = arith.addf %5, %7 : vector<1000x128xf32>
    %9 = arith.addf %2, %8 : vector<1000x128xf32>
    %10 = arith.negf %9 : vector<1000x128xf32>
    %11 = math.exp %10 : vector<1000x128xf32>
    %cst_10 = arith.constant 1.000000e+00 : f32
    %12 = vector.broadcast %cst_10 : f32 to vector<1000x128xf32>
    %13 = arith.addf %12, %11 : vector<1000x128xf32>
    %14 = arith.divf %12, %13 : vector<1000x128xf32>
    %c0_11 = arith.constant 0 : index
    %c0_12 = arith.constant 0 : index
    %15 = vector.load %arg6[%c0_11, %c0_12] : memref<1000x128xf32, #tpu.memory_space<vmem>>, vector<1000x128xf32>
    tpu.vector_store %arg6[%c0_11, %c0_12], %14 {strides = array<i32>} : memref<1000x128xf32, #tpu.memory_space<vmem>>, vector<1000x128xf32>,
    return
  }
  func.func @transform_0(%arg0: i32) -> (i32, i32) {
    %c0_i32 = arith.constant 0 : i32
    %c0_i32_0 = arith.constant 0 : i32
    return %arg0, %c0_i32 : i32, i32
  }
  func.func @transform_1(%arg0: i32) -> (i32, i32) {
    %c0_i32 = arith.constant 0 : i32
    %c0_i32_0 = arith.constant 0 : i32
    return %arg0, %c0_i32 : i32, i32
  }
  func.func @transform_2(%arg0: i32) -> (i32, i32) {
    %c0_i32 = arith.constant 0 : i32
    %c0_i32_0 = arith.constant 0 : i32
    %c0_i32_1 = arith.constant 0 : i32
    return %c0_i32, %c0_i32_0 : i32, i32
  }
  func.func @transform_3(%arg0: i32) -> (i32, i32) {
    %c0_i32 = arith.constant 0 : i32
    %c0_i32_0 = arith.constant 0 : i32
    %c0_i32_1 = arith.constant 0 : i32
    return %c0_i32, %c0_i32_0 : i32, i32
  }
  func.func @transform_4(%arg0: i32) -> (i32, i32) {
    %c0_i32 = arith.constant 0 : i32
    %c0_i32_0 = arith.constant 0 : i32
    %c0_i32_1 = arith.constant 0 : i32
    return %c0_i32, %c0_i32_0 : i32, i32
  }
  func.func @transform_5(%arg0: i32) -> (i32, i32) {
    %c0_i32 = arith.constant 0 : i32
    %c0_i32_0 = arith.constant 0 : i32
    return %arg0, %c0_i32 : i32, i32
  }
}

</mosaic_0001>

<bundles_post_ra>
// kernel: tpu_custom_call.1
= control target key start
LH: loop header
LB: loop body
LE: loop exit
PB: predicated region body
PF: predicated region fallthrough
CT: control target
= control target key end

     0   :  { %vm656_vm0 = vcmask 1043456   ;;  %v5475_v2 = vmov 0.0   ;;  %vm5476_vm1 = vmmov 0   ;;  %vm280_vm2 = vcmask 31744   ;;  %s7175_s0 = inlined_call_operand.vmem [shape: f32[1000,4], index: 0, kind: input, shape index: {}]   ;;  %s7176_s1 = inlined_call_operand.vmem [shape: f32[1000,4], index: 1, kind: input, shape index: {}]   ;;  %s7177_s2 = inlined_call_operand.vmem [shape: f32[4,128], index: 2, kind: input, shape index: {}]   ;;  %s7178_s3 = inlined_call_operand.vmem [shape: f32[4,128], index: 3, kind: input, shape index: {}]   ;;  %s7179_s4 = inlined_call_operand.vmem [shape: f32[1,128], index: 4, kind: input, shape index: {}]   ;;  %s7180_s5 = inlined_call_operand.hbm [shape: f32[1000,128], index: 5, kind: output, shape index: {}]  }
   0x1   :  { %v272_v0 = vld [vmem:[%s7178_s3] sm:$0xf]  ;;  %3939 = vmatprep.subr.mxu1 %v5475_v2  ;;  %3941 = vmatprep.mubr.msk.f32.mxu1 %vm5476_vm1, %v5475_v2  ;;  %v148_v5 = vld [vmem:[%s7176_s1 + $0x8] sm:$0xff]  ;;  %v149_v7 = vld [vmem:[%s7176_s1 + $0x10] sm:$0xff] }
   0x2   :  { %v147_v1 = vld [vmem:[%s7176_s1] sm:$0xff]  ;;  %3940 = vmatpush3.msk.msra.mxu1 %vm656_vm0, %v272_v0  ;;  %4316 = vmatprep.subr.mxu0 %v5475_v2  ;;  %v22_v6 = vld [vmem:[%s7175_s0 + $0x8] sm:$0xff]  ;;  %v23_v8 = vld [vmem:[%s7175_s0 + $0x10] sm:$0xff] }
   0x3   :  { %v146_v3 = vld [vmem:[%s7177_s2] sm:$0xf]  ;;  %3942 = vmatmul.mubr.msk.f32.vlgmr.msra.gmra.mrb[0].mxu1 %vm280_vm2, %v147_v1  ;;  %4318 = vmatprep.mubr.msk.f32.mxu0 %vm5476_vm1, %v5475_v2  ;;  %v150_v9 = vld [vmem:[%s7176_s1 + $0x18] sm:$0xff]  ;;  %v152_v13 = vld [vmem:[%s7176_s1 + $0x28] sm:$0xff] }
   0x4   :  { %v21_v4 = vld [vmem:[%s7175_s0] sm:$0xff]  ;;  %4317 = vmatpush3.msk.msra.mxu0 %vm656_vm0, %v146_v3  ;;  %3944 = vmatprep.mubr.msk.f32.mxu1 %vm5476_vm1, %v5475_v2  ;;  %v24_v10 = vld [vmem:[%s7175_s0 + $0x18] sm:$0xff]  ;;  %v26_v14 = vld [vmem:[%s7175_s0 + $0x28] sm:$0xff] }
   0x5   :  { %4319 = vmatmul.mubr.msk.f32.vlgmr.msra.gmra.mrb[0].mxu0 %vm280_vm2, %v21_v4  ;;  %v151_v11 = vld [vmem:[%s7176_s1 + $0x20] sm:$0xff]  ;;  %v153_v15 = vld [vmem:[%s7176_s1 + $0x30] sm:$0xff] }
   0x6   :  { %4321 = vmatprep.mubr.msk.f32.mxu0 %vm5476_vm1, %v5475_v2  ;;  %v25_v12 = vld [vmem:[%s7175_s0 + $0x20] sm:$0xff]  ;;  %v27_v16 = vld [vmem:[%s7175_s0 + $0x30] sm:$0xff] }
   0x7   :  { %3945 = vmatmul.mubr.msk.f32.gmra.mrb[2].mxu1 %vm280_vm2, %v148_v5 }
   0x8   :  { %3947 = vmatprep.mubr.msk.f32.mxu1 %vm5476_vm1, %v5475_v2 }
   0x9   :  { %4322 = vmatmul.mubr.msk.f32.gmra.mrb[2].mxu0 %vm280_vm2, %v22_v6 }
   0xa   :  { %4324 = vmatprep.mubr.msk.f32.mxu0 %vm5476_vm1, %v5475_v2 }
   0xb   :  { %3948 = vmatmul.mubr.msk.f32.gmra.mrb[4].mxu1 %vm280_vm2, %v149_v7 }
   0xc   :  { %3950 = vmatprep.mubr.msk.f32.mxu1 %vm5476_vm1, %v5475_v2 }
   0xd   :  { %4325 = vmatmul.mubr.msk.f32.gmra.mrb[4].mxu0 %vm280_vm2, %v23_v8 }
   0xe   :  { %4327 = vmatprep.mubr.msk.f32.mxu0 %vm5476_vm1, %v5475_v2 }
   0xf   :  { %3951 = vmatmul.mubr.msk.f32.gmra.mrb[6].mxu1 %vm280_vm2, %v150_v9 }
  0x10   :  { %3953 = vmatprep.mubr.msk.f32.mxu1 %vm5476_vm1, %v5475_v2 }
  0x11   :  { %4328 = vmatmul.mubr.msk.f32.gmra.mrb[6].mxu0 %vm280_vm2, %v24_v10 }
  0x12   :  { %4330 = vmatprep.mubr.msk.f32.mxu0 %vm5476_vm1, %v5475_v2 }
  0x13   :  { %3954 = vmatmul.mubr.msk.f32.gmra.mrb[8].mxu1 %vm280_vm2, %v151_v11 }
  0x14   :  { %3956 = vmatprep.mubr.msk.f32.mxu1 %vm5476_vm1, %v5475_v2 }
  0x15   :  { %4331 = vmatmul.mubr.msk.f32.gmra.mrb[8].mxu0 %vm280_vm2, %v25_v12 }
  0x16   :  { %4333 = vmatprep.mubr.msk.f32.mxu0 %vm5476_vm1, %v5475_v2 }
  0x17   :  { %3957 = vmatmul.mubr.msk.f32.gmra.mrb[10].mxu1 %vm280_vm2, %v152_v13 }
  0x18   :  { %3959 = vmatprep.mubr.msk.f32.mxu1 %vm5476_vm1, %v5475_v2 }
  0x19   :  { %4334 = vmatmul.mubr.msk.f32.gmra.mrb[10].mxu0 %vm280_vm2, %v26_v14 }
  0x1a   :  { %4336 = vmatprep.mubr.msk.f32.mxu0 %vm5476_vm1, %v5475_v2 }
  0x1b   :  { %10 = vsyncpa [#allocation3], 0  ;;  %3960 = vmatmul.mubr.msk.f32.gmra.mrb[12].mxu1 %vm280_vm2, %v153_v15  ;;  %v154_v17 = vld [vmem:[%s7176_s1 + $0x38] sm:$0xff]  ;;  %v155_v19 = vld [vmem:[%s7176_s1 + $0x40] sm:$0xff] }
  0x1c   :  { %3962 = vmatprep.mubr.msk.f32.mxu1 %vm5476_vm1, %v5475_v2  ;;  %v28_v18 = vld [vmem:[%s7175_s0 + $0x38] sm:$0xff]  ;;  %v29_v20 = vld [vmem:[%s7175_s0 + $0x40] sm:$0xff]  ;;  %v156_v21 = vld [vmem:[%s7176_s1 + $0x48] sm:$0xff] }
  0x1d   :  { %4337 = vmatmul.mubr.msk.f32.gmra.mrb[12].mxu0 %vm280_vm2, %v27_v16  ;;  %v30_v22 = vld [vmem:[%s7175_s0 + $0x48] sm:$0xff]  ;;  %v157_v23 = vld [vmem:[%s7176_s1 + $0x50] sm:$0xff]  ;;  %v158_v25 = vld [vmem:[%s7176_s1 + $0x58] sm:$0xff] }
  0x1e   :  { %4339 = vmatprep.mubr.msk.f32.mxu0 %vm5476_vm1, %v5475_v2  ;;  %v31_v24 = vld [vmem:[%s7175_s0 + $0x50] sm:$0xff]  ;;  %v32_v26 = vld [vmem:[%s7175_s0 + $0x58] sm:$0xff]  ;;  %v159_v27 = vld [vmem:[%s7176_s1 + $0x60] sm:$0xff] }
  0x1f   :  { %3963 = vmatmul.mubr.msk.f32.gmra.mrb[14].mxu1 %vm280_vm2, %v154_v17  ;;  %v33_v28 = vld [vmem:[%s7175_s0 + $0x60] sm:$0xff]  ;;  %v160_v29 = vld [vmem:[%s7176_s1 + $0x68] sm:$0xff]  ;;  %v161_v31 = vld [vmem:[%s7176_s1 + $0x70] sm:$0xff] }
  0x20   :  { %3965 = vmatprep.mubr.msk.f32.mxu1 %vm5476_vm1, %v5475_v2  ;;  %v34_v30 = vld [vmem:[%s7175_s0 + $0x68] sm:$0xff]  ;;  %v35_v32 = vld [vmem:[%s7175_s0 + $0x70] sm:$0xff]  ;;  %v162_v33 = vld [vmem:[%s7176_s1 + $0x78] sm:$0xff] }
  0x21   :  { %4340 = vmatmul.mubr.msk.f32.gmra.mrb[14].mxu0 %vm280_vm2, %v28_v18  ;;  %v36_v34 = vld [vmem:[%s7175_s0 + $0x78] sm:$0xff]  ;;  %v163_v35 = vld [vmem:[%s7176_s1 + $0x80] sm:$0xff]  ;;  %v164_v37 = vld [vmem:[%s7176_s1 + $0x88] sm:$0xff] }
  0x22   :  { %4342 = vmatprep.mubr.msk.f32.mxu0 %vm5476_vm1, %v5475_v2  ;;  %v37_v36 = vld [vmem:[%s7175_s0 + $0x80] sm:$0xff]  ;;  %v38_v38 = vld [vmem:[%s7175_s0 + $0x88] sm:$0xff]  ;;  %v165_v39 = vld [vmem:[%s7176_s1 + $0x90] sm:$0xff] }
  0x23   :  { %3966 = vmatmul.mubr.msk.f32.gmra.mrb[16].mxu1 %vm280_vm2, %v155_v19  ;;  %v39_v40 = vld [vmem:[%s7175_s0 + $0x90] sm:$0xff]  ;;  %v166_v41 = vld [vmem:[%s7176_s1 + $0x98] sm:$0xff]  ;;  %v167_v43 = vld [vmem:[%s7176_s1 + $0xa0] sm:$0xff] }
  0x24   :  { %3968 = vmatprep.mubr.msk.f32.mxu1 %vm5476_vm1, %v5475_v2  ;;  %v40_v42 = vld [vmem:[%s7175_s0 + $0x98] sm:$0xff]  ;;  %v41_v44 = vld [vmem:[%s7175_s0 + $0xa0] sm:$0xff]  ;;  %v168_v45 = vld [vmem:[%s7176_s1 + $0xa8] sm:$0xff] }
  0x25   :  { %4343 = vmatmul.mubr.msk.f32.gmra.mrb[16].mxu0 %vm280_vm2, %v29_v20  ;;  %v42_v46 = vld [vmem:[%s7175_s0 + $0xa8] sm:$0xff]  ;;  %v169_v47 = vld [vmem:[%s7176_s1 + $0xb0] sm:$0xff]  ;;  %v170_v49 = vld [vmem:[%s7176_s1 + $0xb8] sm:$0xff] }
  0x26   :  { %4345 = vmatprep.mubr.msk.f32.mxu0 %vm5476_vm1, %v5475_v2  ;;  %v43_v48 = vld [vmem:[%s7175_s0 + $0xb0] sm:$0xff]  ;;  %v44_v50 = vld [vmem:[%s7175_s0 + $0xb8] sm:$0xff]  ;;  %v171_v51 = vld [vmem:[%s7176_s1 + $0xc0] sm:$0xff] }
  0x27   :  { %3969 = vmatmul.mubr.msk.f32.gmra.mrb[18].mxu1 %vm280_vm2, %v156_v21  ;;  %v45_v52 = vld [vmem:[%s7175_s0 + $0xc0] sm:$0xff]  ;;  %v172_v53 = vld [vmem:[%s7176_s1 + $0xc8] sm:$0xff]  ;;  %v173_v55 = vld [vmem:[%s7176_s1 + $0xd0] sm:$0xff] }
  0x28   :  { %3971 = vmatprep.mubr.msk.f32.mxu1 %vm5476_vm1, %v5475_v2  ;;  %v46_v54 = vld [vmem:[%s7175_s0 + $0xc8] sm:$0xff]  ;;  %v47_v56 = vld [vmem:[%s7175_s0 + $0xd0] sm:$0xff]  ;;  %v174_v57 = vld [vmem:[%s7176_s1 + $0xd8] sm:$0xff] }
  0x29   :  { %4346 = vmatmul.mubr.msk.f32.gmra.mrb[18].mxu0 %vm280_vm2, %v30_v22  ;;  %v48_v58 = vld [vmem:[%s7175_s0 + $0xd8] sm:$0xff]  ;;  %v175_v59 = vld [vmem:[%s7176_s1 + $0xe0] sm:$0xff]  ;;  %v176_v61 = vld [vmem:[%s7176_s1 + $0xe8] sm:$0xff] }
  0x2a   :  { %4348 = vmatprep.mubr.msk.f32.mxu0 %vm5476_vm1, %v5475_v2  ;;  %v49_v60 = vld [vmem:[%s7175_s0 + $0xe0] sm:$0xff]  ;;  %v50_v62 = vld [vmem:[%s7175_s0 + $0xe8] sm:$0xff]  ;;  %v177_v63 = vld [vmem:[%s7176_s1 + $0xf0] sm:$0xff] }
  0x2b   :  { %3972 = vmatmul.mubr.msk.f32.gmra.mrb[20].mxu1 %vm280_vm2, %v157_v23  ;;  %v51_v0 = vld [vmem:[%s7175_s0 + $0xf0] sm:$0xff]  ;;  %v178_v1 = vld [vmem:[%s7176_s1 + $0xf8] sm:$0xff]  ;;  %v179_v4 = vld [vmem:[%s7176_s1 + $0x100] sm:$0xff] }
  0x2c   :  { %3974 = vmatprep.mubr.msk.f32.mxu1 %vm5476_vm1, %v5475_v2  ;;  %v52_v3 = vld [vmem:[%s7175_s0 + $0xf8] sm:$0xff]  ;;  %v53_v5 = vld [vmem:[%s7175_s0 + $0x100] sm:$0xff]  ;;  %v180_v6 = vld [vmem:[%s7176_s1 + $0x108] sm:$0xff] }
  0x2d   :  { %4349 = vmatmul.mubr.msk.f32.gmra.mrb[20].mxu0 %vm280_vm2, %v31_v24  ;;  %v54_v7 = vld [vmem:[%s7175_s0 + $0x108] sm:$0xff]  ;;  %v181_v8 = vld [vmem:[%s7176_s1 + $0x110] sm:$0xff]  ;;  %v182_v10 = vld [vmem:[%s7176_s1 + $0x118] sm:$0xff] }
  0x2e   :  { %4351 = vmatprep.mubr.msk.f32.mxu0 %vm5476_vm1, %v5475_v2  ;;  %v55_v9 = vld [vmem:[%s7175_s0 + $0x110] sm:$0xff]  ;;  %v56_v11 = vld [vmem:[%s7175_s0 + $0x118] sm:$0xff]  ;;  %v183_v12 = vld [vmem:[%s7176_s1 + $0x120] sm:$0xff] }
  0x2f   :  { %3975 = vmatmul.mubr.msk.f32.gmra.mrb[22].mxu1 %vm280_vm2, %v158_v25  ;;  %v57_v13 = vld [vmem:[%s7175_s0 + $0x120] sm:$0xff]  ;;  %v184_v14 = vld [vmem:[%s7176_s1 + $0x128] sm:$0xff]  ;;  %v185_v16 = vld [vmem:[%s7176_s1 + $0x130] sm:$0xff] }
  0x30   :  { %3977 = vmatprep.mubr.msk.f32.mxu1 %vm5476_vm1, %v5475_v2  ;;  %v58_v15 = vld [vmem:[%s7175_s0 + $0x128] sm:$0xff]  ;;  %v59_v17 = vld [vmem:[%s7175_s0 + $0x130] sm:$0xff]  ;;  %v186_v18 = vld [vmem:[%s7176_s1 + $0x138] sm:$0xff] }
  0x31   :  { %4352 = vmatmul.mubr.msk.f32.gmra.mrb[22].mxu0 %vm280_vm2, %v32_v26  ;;  %v60_v19 = vld [vmem:[%s7175_s0 + $0x138] sm:$0xff]  ;;  %v187_v20 = vld [vmem:[%s7176_s1 + $0x140] sm:$0xff]  ;;  %v188_v22 = vld [vmem:[%s7176_s1 + $0x148] sm:$0xff] }
  0x32   :  { %4354 = vmatprep.mubr.msk.f32.mxu0 %vm5476_vm1, %v5475_v2  ;;  %v61_v21 = vld [vmem:[%s7175_s0 + $0x140] sm:$0xff]  ;;  %v62_v23 = vld [vmem:[%s7175_s0 + $0x148] sm:$0xff]  ;;  %v189_v24 = vld [vmem:[%s7176_s1 + $0x150] sm:$0xff] }
  0x33   :  { %3978 = vmatmul.mubr.msk.f32.gmra.mrb[24].mxu1 %vm280_vm2, %v159_v27  ;;  %v63_v25 = vld [vmem:[%s7175_s0 + $0x150] sm:$0xff]  ;;  %v190_v26 = vld [vmem:[%s7176_s1 + $0x158] sm:$0xff] }
  0x34   :  { %3980 = vmatprep.mubr.msk.f32.mxu1 %vm5476_vm1, %v5475_v2  ;;  %v64_v27 = vld [vmem:[%s7175_s0 + $0x158] sm:$0xff] }
  0x35   :  { %4355 = vmatmul.mubr.msk.f32.gmra.mrb[24].mxu0 %vm280_vm2, %v33_v28  ;;  %v191_v28 = vld [vmem:[%s7176_s1 + $0x160] sm:$0xff] }
  0x36   :  { %4357 = vmatprep.mubr.msk.f32.mxu0 %vm5476_vm1, %v5475_v2 }
  0x37   :  { %3981 = vmatmul.mubr.msk.f32.gmra.mrb[26].mxu1 %vm280_vm2, %v160_v29  ;;  %v65_v29 = vld [vmem:[%s7175_s0 + $0x160] sm:$0xff] }
  0x38   :  { %3983 = vmatprep.mubr.msk.f32.mxu1 %vm5476_vm1, %v5475_v2 }
  0x39   :  { %4358 = vmatmul.mubr.msk.f32.gmra.mrb[26].mxu0 %vm280_vm2, %v34_v30  ;;  %v192_v30 = vld [vmem:[%s7176_s1 + $0x168] sm:$0xff] }
  0x3a   :  { %4360 = vmatprep.mubr.msk.f32.mxu0 %vm5476_vm1, %v5475_v2 }
  0x3b   :  { %3984 = vmatmul.mubr.msk.f32.gmra.mrb[28].mxu1 %vm280_vm2, %v161_v31  ;;  %v66_v31 = vld [vmem:[%s7175_s0 + $0x168] sm:$0xff] }
  0x3c   :  { %3986 = vmatprep.mubr.msk.f32.mxu1 %vm5476_vm1, %v5475_v2 }
  0x3d   :  { %4361 = vmatmul.mubr.msk.f32.gmra.mrb[28].mxu0 %vm280_vm2, %v35_v32  ;;  %v193_v32 = vld [vmem:[%s7176_s1 + $0x170] sm:$0xff] }
  0x3e   :  { %4363 = vmatprep.mubr.msk.f32.mxu0 %vm5476_vm1, %v5475_v2 }
  0x3f   :  { %3987 = vmatmul.mubr.msk.f32.gmra.mrb[30].mxu1 %vm280_vm2, %v162_v33  ;;  %v67_v33 = vld [vmem:[%s7175_s0 + $0x170] sm:$0xff] }
  0x40   :  { %3989 = vmatprep.mubr.msk.f32.mxu1 %vm5476_vm1, %v5475_v2 }
  0x41   :  { %4364 = vmatmul.mubr.msk.f32.gmra.mrb[30].mxu0 %vm280_vm2, %v36_v34  ;;  %v194_v34 = vld [vmem:[%s7176_s1 + $0x178] sm:$0xff] }
  0x42   :  { %4366 = vmatprep.mubr.msk.f32.mxu0 %vm5476_vm1, %v5475_v2 }
  0x43   :  { %3990 = vmatmul.mubr.msk.f32.gmra.mrb[32].mxu1 %vm280_vm2, %v163_v35  ;;  %v68_v35 = vld [vmem:[%s7175_s0 + $0x178] sm:$0xff] }
  0x44   :  { %3992 = vmatprep.mubr.msk.f32.mxu1 %vm5476_vm1, %v5475_v2 }
  0x45   :  { %4367 = vmatmul.mubr.msk.f32.gmra.mrb[32].mxu0 %vm280_vm2, %v37_v36  ;;  %v195_v36 = vld [vmem:[%s7176_s1 + $0x180] sm:$0xff] }
  0x46   :  { %4369 = vmatprep.mubr.msk.f32.mxu0 %vm5476_vm1, %v5475_v2 }
  0x47   :  { %3993 = vmatmul.mubr.msk.f32.gmra.mrb[34].mxu1 %vm280_vm2, %v164_v37  ;;  %v69_v37 = vld [vmem:[%s7175_s0 + $0x180] sm:$0xff] }
  0x48   :  { %3995 = vmatprep.mubr.msk.f32.mxu1 %vm5476_vm1, %v5475_v2 }
  0x49   :  { %4370 = vmatmul.mubr.msk.f32.gmra.mrb[34].mxu0 %vm280_vm2, %v38_v38  ;;  %v196_v38 = vld [vmem:[%s7176_s1 + $0x188] sm:$0xff] }
  0x4a   :  { %4372 = vmatprep.mubr.msk.f32.mxu0 %vm5476_vm1, %v5475_v2 }
  0x4b   :  { %3996 = vmatmul.mubr.msk.f32.gmra.mrb[36].mxu1 %vm280_vm2, %v165_v39  ;;  %v70_v39 = vld [vmem:[%s7175_s0 + $0x188] sm:$0xff] }
  0x4c   :  { %3998 = vmatprep.mubr.msk.f32.mxu1 %vm5476_vm1, %v5475_v2 }
  0x4d   :  { %4373 = vmatmul.mubr.msk.f32.gmra.mrb[36].mxu0 %vm280_vm2, %v39_v40  ;;  %v197_v40 = vld [vmem:[%s7176_s1 + $0x190] sm:$0xff] }
  0x4e   :  { %4375 = vmatprep.mubr.msk.f32.mxu0 %vm5476_vm1, %v5475_v2 }
  0x4f   :  { %3999 = vmatmul.mubr.msk.f32.gmra.mrb[38].mxu1 %vm280_vm2, %v166_v41  ;;  %v71_v41 = vld [vmem:[%s7175_s0 + $0x190] sm:$0xff] }
  0x50   :  { %4001 = vmatprep.mubr.msk.f32.mxu1 %vm5476_vm1, %v5475_v2 }
  0x51   :  { %4376 = vmatmul.mubr.msk.f32.gmra.mrb[38].mxu0 %vm280_vm2, %v40_v42  ;;  %v198_v42 = vld [vmem:[%s7176_s1 + $0x198] sm:$0xff] }
  0x52   :  { %4378 = vmatprep.mubr.msk.f32.mxu0 %vm5476_vm1, %v5475_v2 }
  0x53   :  { %4002 = vmatmul.mubr.msk.f32.gmra.mrb[40].mxu1 %vm280_vm2, %v167_v43  ;;  %v72_v43 = vld [vmem:[%s7175_s0 + $0x198] sm:$0xff] }
  0x54   :  { %4004 = vmatprep.mubr.msk.f32.mxu1 %vm5476_vm1, %v5475_v2 }
  0x55   :  { %4379 = vmatmul.mubr.msk.f32.gmra.mrb[40].mxu0 %vm280_vm2, %v41_v44  ;;  %v199_v44 = vld [vmem:[%s7176_s1 + $0x1a0] sm:$0xff] }
  0x56   :  { %4381 = vmatprep.mubr.msk.f32.mxu0 %vm5476_vm1, %v5475_v2 }
  0x57   :  { %4005 = vmatmul.mubr.msk.f32.gmra.mrb[42].mxu1 %vm280_vm2, %v168_v45  ;;  %v73_v45 = vld [vmem:[%s7175_s0 + $0x1a0] sm:$0xff] }
  0x58   :  { %4007 = vmatprep.mubr.msk.f32.mxu1 %vm5476_vm1, %v5475_v2 }
  0x59   :  { %4382 = vmatmul.mubr.msk.f32.gmra.mrb[42].mxu0 %vm280_vm2, %v42_v46  ;;  %v6156_v46 = vld [vmem:[%s7179_s4] ss:$0 sm:$0xff] }
  0x5a   :  { %4384 = vmatprep.mubr.msk.f32.mxu0 %vm5476_vm1, %v5475_v2 }
  0x5b   :  { %4008 = vmatmul.mubr.msk.f32.gmra.mrb[44].mxu1 %vm280_vm2, %v169_v47  ;;  %v200_v47 = vld [vmem:[%s7176_s1 + $0x1a8] sm:$0xff] }
  0x5c   :  { %4010 = vmatprep.mubr.msk.f32.mxu1 %vm5476_vm1, %v5475_v2 }
  0x5d   :  { %4385 = vmatmul.mubr.msk.f32.gmra.mrb[44].mxu0 %vm280_vm2, %v43_v48 }
  0x5e   :  { %4387 = vmatprep.mubr.msk.f32.mxu0 %vm5476_vm1, %v5475_v2 }
  0x5f   :  { %4011 = vmatmul.mubr.msk.f32.gmra.mrb[46].mxu1 %vm280_vm2, %v170_v49  ;;  %v74_v49 = vld [vmem:[%s7175_s0 + $0x1a8] sm:$0xff] }
  0x60   :  { %4013 = vmatprep.mubr.msk.f32.mxu1 %vm5476_vm1, %v5475_v2 }
  0x61   :  { %4388 = vmatmul.mubr.msk.f32.gmra.mrb[46].mxu0 %vm280_vm2, %v44_v50 }
  0x62   :  { %4390 = vmatprep.mubr.msk.f32.mxu0 %vm5476_vm1, %v5475_v2 }
  0x63   :  { %4014 = vmatmul.mubr.msk.f32.gmra.mrb[48].mxu1 %vm280_vm2, %v171_v51 }
  0x64   :  { %4016 = vmatprep.mubr.msk.f32.mxu1 %vm5476_vm1, %v5475_v2 }
  0x65   :  { %4391 = vmatmul.mubr.msk.f32.gmra.mrb[48].mxu0 %vm280_vm2, %v45_v52 }
  0x66   :  { %4393 = vmatprep.mubr.msk.f32.mxu0 %vm5476_vm1, %v5475_v2 }
  0x67   :  { %4017 = vmatmul.mubr.msk.f32.gmra.mrb[50].mxu1 %vm280_vm2, %v172_v53  ;;  %v201_v53 = vld [vmem:[%s7176_s1 + $0x1b0] sm:$0xff] }
  0x68   :  { %4019 = vmatprep.mubr.msk.f32.mxu1 %vm5476_vm1, %v5475_v2 }
  0x69   :  { %4394 = vmatmul.mubr.msk.f32.gmra.mrb[50].mxu0 %vm280_vm2, %v46_v54 }
  0x6a   :  { %4396 = vmatprep.mubr.msk.f32.mxu0 %vm5476_vm1, %v5475_v2 }
  0x6b   :  { %4020 = vmatmul.mubr.msk.f32.gmra.mrb[52].mxu1 %vm280_vm2, %v173_v55 }
  0x6c   :  { %4022 = vmatprep.mubr.msk.f32.mxu1 %vm5476_vm1, %v5475_v2 }
  0x6d   :  { %4397 = vmatmul.mubr.msk.f32.gmra.mrb[52].mxu0 %vm280_vm2, %v47_v56 }
  0x6e   :  { %4399 = vmatprep.mubr.msk.f32.mxu0 %vm5476_vm1, %v5475_v2 }
  0x6f   :  { %4023 = vmatmul.mubr.msk.f32.gmra.mrb[54].mxu1 %vm280_vm2, %v174_v57  ;;  %v75_v57 = vld [vmem:[%s7175_s0 + $0x1b0] sm:$0xff] }
  0x70   :  { %4025 = vmatprep.mubr.msk.f32.mxu1 %vm5476_vm1, %v5475_v2 }
  0x71   :  { %4400 = vmatmul.mubr.msk.f32.gmra.mrb[54].mxu0 %vm280_vm2, %v48_v58 }
  0x72   :  { %4402 = vmatprep.mubr.msk.f32.mxu0 %vm5476_vm1, %v5475_v2 }
  0x73   :  { %4026 = vmatmul.mubr.msk.f32.gmra.mrb[56].mxu1 %vm280_vm2, %v175_v59 }
  0x74   :  { %4028 = vmatprep.mubr.msk.f32.mxu1 %vm5476_vm1, %v5475_v2 }
  0x75   :  { %4403 = vmatmul.mubr.msk.f32.gmra.mrb[56].mxu0 %vm280_vm2, %v49_v60 }
  0x76   :  { %4405 = vmatprep.mubr.msk.f32.mxu0 %vm5476_vm1, %v5475_v2 }
  0x77   :  { %4029 = vmatmul.mubr.msk.f32.gmra.mrb[58].mxu1 %vm280_vm2, %v176_v61 }
  0x78   :  { %4031 = vmatprep.mubr.msk.f32.mxu1 %vm5476_vm1, %v5475_v2 }
  0x79   :  { %4406 = vmatmul.mubr.msk.f32.gmra.mrb[58].mxu0 %vm280_vm2, %v50_v62  ;;  %v202_v62 = vld [vmem:[%s7176_s1 + $0x1b8] sm:$0xff] }
  0x7a   :  { %4408 = vmatprep.mubr.msk.f32.mxu0 %vm5476_vm1, %v5475_v2 }
  0x7b   :  { %4032 = vmatmul.mubr.msk.f32.gmra.mrb[60].mxu1 %vm280_vm2, %v177_v63 }
  0x7c   :  { %4034 = vmatprep.mubr.msk.f32.mxu1 %vm5476_vm1, %v5475_v2 }
  0x7d   :  { %4409 = vmatmul.mubr.msk.f32.gmra.mrb[60].mxu0 %vm280_vm2, %v51_v0 }
  0x7e   :  { %4411 = vmatprep.mubr.msk.f32.mxu0 %vm5476_vm1, %v5475_v2 }
  0x7f   :  { %4035 = vmatmul.mubr.msk.f32.gmra.mrb[62].mxu1 %vm280_vm2, %v178_v1 }
  0x80   :  { %4037 = vmatprep.mubr.msk.f32.mxu1 %vm5476_vm1, %v5475_v2 }
  0x81   :  { %4412 = vmatmul.mubr.msk.f32.gmra.mrb[62].mxu0 %vm280_vm2, %v52_v3  ;;  %v76_v3 = vld [vmem:[%s7175_s0 + $0x1b8] sm:$0xff] }
  0x82   :  { %4414 = vmatprep.mubr.msk.f32.mxu0 %vm5476_vm1, %v5475_v2 }
  0x83   :  { %4038 = vmatmul.mubr.msk.f32.gmra.mrb[64].mxu1 %vm280_vm2, %v179_v4 }
  0x84   :  { %4040 = vmatprep.mubr.msk.f32.mxu1 %vm5476_vm1, %v5475_v2 }
  0x85   :  { %4415 = vmatmul.mubr.msk.f32.gmra.mrb[64].mxu0 %vm280_vm2, %v53_v5 }
  0x86   :  { %4417 = vmatprep.mubr.msk.f32.mxu0 %vm5476_vm1, %v5475_v2 }
  0x87   :  { %4041 = vmatmul.mubr.msk.f32.gmra.mrb[66].mxu1 %vm280_vm2, %v180_v6 }
  0x88   :  { %4043 = vmatprep.mubr.msk.f32.mxu1 %vm5476_vm1, %v5475_v2 }
  0x89   :  { %4418 = vmatmul.mubr.msk.f32.gmra.mrb[66].mxu0 %vm280_vm2, %v54_v7 }
  0x8a   :  { %4420 = vmatprep.mubr.msk.f32.mxu0 %vm5476_vm1, %v5475_v2 }
  0x8b   :  { %4044 = vmatmul.mubr.msk.f32.gmra.mrb[68].mxu1 %vm280_vm2, %v181_v8  ;;  %v203_v8 = vld [vmem:[%s7176_s1 + $0x1c0] sm:$0xff] }
  0x8c   :  { %4046 = vmatprep.mubr.msk.f32.mxu1 %vm5476_vm1, %v5475_v2 }
  0x8d   :  { %4421 = vmatmul.mubr.msk.f32.gmra.mrb[68].mxu0 %vm280_vm2, %v55_v9 }
  0x8e   :  { %4423 = vmatprep.mubr.msk.f32.mxu0 %vm5476_vm1, %v5475_v2 }
  0x8f   :  { %4047 = vmatmul.mubr.msk.f32.gmra.mrb[70].mxu1 %vm280_vm2, %v182_v10 }
  0x90   :  { %4049 = vmatprep.mubr.msk.f32.mxu1 %vm5476_vm1, %v5475_v2 }
  0x91   :  { %4424 = vmatmul.mubr.msk.f32.gmra.mrb[70].mxu0 %vm280_vm2, %v56_v11 }
  0x92   :  { %4426 = vmatprep.mubr.msk.f32.mxu0 %vm5476_vm1, %v5475_v2 }
  0x93   :  { %4050 = vmatmul.mubr.msk.f32.gmra.mrb[72].mxu1 %vm280_vm2, %v183_v12  ;;  %v77_v12 = vld [vmem:[%s7175_s0 + $0x1c0] sm:$0xff] }
  0x94   :  { %4052 = vmatprep.mubr.msk.f32.mxu1 %vm5476_vm1, %v5475_v2 }
  0x95   :  { %4427 = vmatmul.mubr.msk.f32.gmra.mrb[72].mxu0 %vm280_vm2, %v57_v13 }
  0x96   :  { %4429 = vmatprep.mubr.msk.f32.mxu0 %vm5476_vm1, %v5475_v2 }
  0x97   :  { %4053 = vmatmul.mubr.msk.f32.gmra.mrb[74].mxu1 %vm280_vm2, %v184_v14 }
  0x98   :  { %4055 = vmatprep.mubr.msk.f32.mxu1 %vm5476_vm1, %v5475_v2 }
  0x99   :  { %4430 = vmatmul.mubr.msk.f32.gmra.mrb[74].mxu0 %vm280_vm2, %v58_v15 }
  0x9a   :  { %4432 = vmatprep.mubr.msk.f32.mxu0 %vm5476_vm1, %v5475_v2 }
  0x9b   :  { %4056 = vmatmul.mubr.msk.f32.gmra.mrb[76].mxu1 %vm280_vm2, %v185_v16 }
  0x9c   :  { %4058 = vmatprep.mubr.msk.f32.mxu1 %vm5476_vm1, %v5475_v2 }
  0x9d   :  { %4433 = vmatmul.mubr.msk.f32.gmra.mrb[76].mxu0 %vm280_vm2, %v59_v17  ;;  %v204_v17 = vld [vmem:[%s7176_s1 + $0x1c8] sm:$0xff] }
  0x9e   :  { %4435 = vmatprep.mubr.msk.f32.mxu0 %vm5476_vm1, %v5475_v2 }
  0x9f   :  { %4059 = vmatmul.mubr.msk.f32.gmra.mrb[78].mxu1 %vm280_vm2, %v186_v18 }
  0xa0   :  { %4061 = vmatprep.mubr.msk.f32.mxu1 %vm5476_vm1, %v5475_v2 }
  0xa1   :  { %4436 = vmatmul.mubr.msk.f32.gmra.mrb[78].mxu0 %vm280_vm2, %v60_v19 }
  0xa2   :  { %4438 = vmatprep.mubr.msk.f32.mxu0 %vm5476_vm1, %v5475_v2 }
  0xa3   :  { %4062 = vmatmul.mubr.msk.f32.gmra.mrb[80].mxu1 %vm280_vm2, %v187_v20 }
  0xa4   :  { %4064 = vmatprep.mubr.msk.f32.mxu1 %vm5476_vm1, %v5475_v2 }
  0xa5   :  { %4439 = vmatmul.mubr.msk.f32.gmra.mrb[80].mxu0 %vm280_vm2, %v61_v21  ;;  %v78_v21 = vld [vmem:[%s7175_s0 + $0x1c8] sm:$0xff] }
  0xa6   :  { %4441 = vmatprep.mubr.msk.f32.mxu0 %vm5476_vm1, %v5475_v2 }
  0xa7   :  { %4065 = vmatmul.mubr.msk.f32.gmra.mrb[82].mxu1 %vm280_vm2, %v188_v22 }
  0xa8   :  { %4067 = vmatprep.mubr.msk.f32.mxu1 %vm5476_vm1, %v5475_v2 }
  0xa9   :  { %4442 = vmatmul.mubr.msk.f32.gmra.mrb[82].mxu0 %vm280_vm2, %v62_v23 }
  0xaa   :  { %4444 = vmatprep.mubr.msk.f32.mxu0 %vm5476_vm1, %v5475_v2 }
  0xab   :  { %4068 = vmatmul.mubr.msk.f32.gmra.mrb[84].mxu1 %vm280_vm2, %v189_v24 }
  0xac   :  { %4070 = vmatprep.mubr.msk.f32.mxu1 %vm5476_vm1, %v5475_v2 }
  0xad   :  { %4445 = vmatmul.mubr.msk.f32.gmra.mrb[84].mxu0 %vm280_vm2, %v63_v25 }
  0xae   :  { %4447 = vmatprep.mubr.msk.f32.mxu0 %vm5476_vm1, %v5475_v2 }
  0xaf   :  { %4071 = vmatmul.mubr.msk.f32.gmra.mrb[86].mxu1 %vm280_vm2, %v190_v26 }
  0xb0   :  { %4073 = vmatprep.mubr.msk.f32.mxu1 %vm5476_vm1, %v5475_v2 }
  0xb1   :  { %4448 = vmatmul.mubr.msk.f32.gmra.mrb[86].mxu0 %vm280_vm2, %v64_v27 }
  0xb2   :  { %4450 = vmatprep.mubr.msk.f32.mxu0 %vm5476_vm1, %v5475_v2 }
  0xb3   :  { %4074 = vmatmul.mubr.msk.f32.gmra.mrb[88].mxu1 %vm280_vm2, %v191_v28  ;;  %v205_v28 = vld [vmem:[%s7176_s1 + $0x1d0] sm:$0xff] }
  0xb4   :  { %4076 = vmatprep.mubr.msk.f32.mxu1 %vm5476_vm1, %v5475_v2 }
  0xb5   :  { %4451 = vmatmul.mubr.msk.f32.gmra.mrb[88].mxu0 %vm280_vm2, %v65_v29 }
  0xb6   :  { %4453 = vmatprep.mubr.msk.f32.mxu0 %vm5476_vm1, %v5475_v2 }
  0xb7   :  { %4077 = vmatmul.mubr.msk.f32.gmra.mrb[90].mxu1 %vm280_vm2, %v192_v30 }
  0xb8   :  { %4079 = vmatprep.mubr.msk.f32.mxu1 %vm5476_vm1, %v5475_v2 }
  0xb9   :  { %4454 = vmatmul.mubr.msk.f32.gmra.mrb[90].mxu0 %vm280_vm2, %v66_v31 }
  0xba   :  { %4456 = vmatprep.mubr.msk.f32.mxu0 %vm5476_vm1, %v5475_v2 }
  0xbb   :  { %4080 = vmatmul.mubr.msk.f32.gmra.mrb[92].mxu1 %vm280_vm2, %v193_v32  ;;  %v79_v32 = vld [vmem:[%s7175_s0 + $0x1d0] sm:$0xff] }
  0xbc   :  { %4082 = vmatprep.mubr.msk.f32.mxu1 %vm5476_vm1, %v5475_v2 }
  0xbd   :  { %4457 = vmatmul.mubr.msk.f32.gmra.mrb[92].mxu0 %vm280_vm2, %v67_v33 }
  0xbe   :  { %4459 = vmatprep.mubr.msk.f32.mxu0 %vm5476_vm1, %v5475_v2 }
  0xbf   :  { %4083 = vmatmul.mubr.msk.f32.gmra.mrb[94].mxu1 %vm280_vm2, %v194_v34 }
  0xc0   :  { %4085 = vmatprep.mubr.msk.f32.mxu1 %vm5476_vm1, %v5475_v2 }
  0xc1   :  { %4460 = vmatmul.mubr.msk.f32.gmra.mrb[94].mxu0 %vm280_vm2, %v68_v35 }
  0xc2   :  { %4462 = vmatprep.mubr.msk.f32.mxu0 %vm5476_vm1, %v5475_v2 }
  0xc3   :  { %4086 = vmatmul.mubr.msk.f32.gmra.mrb[96].mxu1 %vm280_vm2, %v195_v36 }
  0xc4   :  { %4088 = vmatprep.mubr.msk.f32.mxu1 %vm5476_vm1, %v5475_v2 }
  0xc5   :  { %4463 = vmatmul.mubr.msk.f32.gmra.mrb[96].mxu0 %vm280_vm2, %v69_v37 }
  0xc6   :  { %4465 = vmatprep.mubr.msk.f32.mxu0 %vm5476_vm1, %v5475_v2 }
  0xc7   :  { %4089 = vmatmul.mubr.msk.f32.gmra.mrb[98].mxu1 %vm280_vm2, %v196_v38 }
  0xc8   :  { %4091 = vmatprep.mubr.msk.f32.mxu1 %vm5476_vm1, %v5475_v2 }
  0xc9   :  { %4466 = vmatmul.mubr.msk.f32.gmra.mrb[98].mxu0 %vm280_vm2, %v70_v39  ;;  %v206_v39 = vld [vmem:[%s7176_s1 + $0x1d8] sm:$0xff] }
  0xca   :  { %4468 = vmatprep.mubr.msk.f32.mxu0 %vm5476_vm1, %v5475_v2 }
  0xcb   :  { %4092 = vmatmul.mubr.msk.f32.gmra.mrb[100].mxu1 %vm280_vm2, %v197_v40 }
  0xcc   :  { %4094 = vmatprep.mubr.msk.f32.mxu1 %vm5476_vm1, %v5475_v2 }
  0xcd   :  { %4469 = vmatmul.mubr.msk.f32.gmra.mrb[100].mxu0 %vm280_vm2, %v71_v41 }
  0xce   :  { %4471 = vmatprep.mubr.msk.f32.mxu0 %vm5476_vm1, %v5475_v2 }
  0xcf   :  { %4095 = vmatmul.mubr.msk.f32.gmra.mrb[102].mxu1 %vm280_vm2, %v198_v42 }
  0xd0   :  { %4097 = vmatprep.mubr.msk.f32.mxu1 %vm5476_vm1, %v5475_v2 }
  0xd1   :  { %4472 = vmatmul.mubr.msk.f32.gmra.mrb[102].mxu0 %vm280_vm2, %v72_v43  ;;  %v80_v43 = vld [vmem:[%s7175_s0 + $0x1d8] sm:$0xff] }
  0xd2   :  { %4474 = vmatprep.mubr.msk.f32.mxu0 %vm5476_vm1, %v5475_v2 }
  0xd3   :  { %4098 = vmatmul.mubr.msk.f32.gmra.mrb[104].mxu1 %vm280_vm2, %v199_v44 }
  0xd4   :  { %4100 = vmatprep.mubr.msk.f32.mxu1 %vm5476_vm1, %v5475_v2 }
  0xd5   :  { %4475 = vmatmul.mubr.msk.f32.gmra.mrb[104].mxu0 %vm280_vm2, %v73_v45 }
  0xd6   :  { %v726_v48 = vpop.f32.mrb[0].mxu1  ;;  %4477 = vmatprep.mubr.msk.f32.mxu0 %vm5476_vm1, %v5475_v2 }
  0xd7   :  { %v727_v50 = vadd.f32 %v6156_v46, %v726_v48  ;;  %v3943_v51 = vpop.f32.mrb[1].mxu1  ;;  %4101 = vmatmul.mubr.msk.f32.gmra.mrb[106].mxu1 %vm280_vm2, %v200_v47 }
  0xd8   :  { %v1794_v52 = vpop.f32.mrb[0].mxu0  ;;  %4103 = vmatprep.mubr.msk.f32.mxu1 %vm5476_vm1, %v5475_v2  ;;  %v207_v51 = vld [vmem:[%s7176_s1 + $0x1e0] sm:$0xff] }
  0xd9   :  { %v1795_v54 = vadd.f32 %v1794_v52, %v727_v50  ;;  %v4320_v55 = vpop.f32.mrb[1].mxu0  ;;  %4478 = vmatmul.mubr.msk.f32.gmra.mrb[106].mxu0 %vm280_vm2, %v74_v49 }
  0xda   :  { %v731_v56 = vpop.f32.mrb[2].mxu1  ;;  %4480 = vmatprep.mubr.msk.f32.mxu0 %vm5476_vm1, %v5475_v2  ;;  %v81_v55 = vld [vmem:[%s7175_s0 + $0x1e0] sm:$0xff] }
  0xdb   :  { %v3562_v58 = vmul.f32 -1.442695, %v1795_v54  ;;  %v732_v59 = vadd.f32 %v6156_v46, %v731_v56  ;;  %v3946_v60 = vpop.f32.mrb[3].mxu1  ;;  %4104 = vmatmul.mubr.msk.f32.gmra.mrb[108].mxu1 %vm280_vm2, %v201_v53 }
  0xdc   :  { %v1799_v61 = vpop.f32.mrb[2].mxu0  ;;  %4106 = vmatprep.mubr.msk.f32.mxu1 %vm5476_vm1, %v5475_v2 }
  0xdd   :  { %4948 = vpow2.f32 %v3562_v58  ;;  %v1800_v63 = vadd.f32 %v1799_v61, %v732_v59  ;;  %v4323_v0 = vpop.f32.mrb[3].mxu0  ;;  %4481 = vmatmul.mubr.msk.f32.gmra.mrb[108].mxu0 %vm280_vm2, %v75_v57 }
  0xde   :  { %v736_v1 = vpop.f32.mrb[4].mxu1  ;;  %4483 = vmatprep.mubr.msk.f32.mxu0 %vm5476_vm1, %v5475_v2 }
  0xdf   :  { %v3563_v4 = vmul.f32 -1.442695, %v1800_v63  ;;  %v737_v5 = vadd.f32 %v6156_v46, %v736_v1  ;;  %v3949_v6 = vpop.f32.mrb[5].mxu1  ;;  %4107 = vmatmul.mubr.msk.f32.gmra.mrb[110].mxu1 %vm280_vm2, %v202_v62  ;;  %v208_v63 = vld [vmem:[%s7176_s1 + $0x1e8] sm:$0xff] }
  0xe0   :  { %v1804_v7 = vpop.f32.mrb[4].mxu0  ;;  %4109 = vmatprep.mubr.msk.f32.mxu1 %vm5476_vm1, %v5475_v2 }
  0xe1   :  { %4950 = vpow2.f32 %v3563_v4  ;;  %v1805_v9 = vadd.f32 %v1804_v7, %v737_v5  ;;  %v4326_v10 = vpop.f32.mrb[5].mxu0  ;;  %4484 = vmatmul.mubr.msk.f32.gmra.mrb[110].mxu0 %vm280_vm2, %v76_v3  ;;  %v82_v4 = vld [vmem:[%s7175_s0 + $0x1e8] sm:$0xff] }
  0xe2   :  { %v741_v11 = vpop.f32.mrb[6].mxu1  ;;  %4486 = vmatprep.mubr.msk.f32.mxu0 %vm5476_vm1, %v5475_v2 }
  0xe3   :  { %v3564_v13 = vmul.f32 -1.442695, %v1805_v9  ;;  %v742_v14 = vadd.f32 %v6156_v46, %v741_v11  ;;  %v3952_v15 = vpop.f32.mrb[7].mxu1  ;;  %4110 = vmatmul.mubr.msk.f32.gmra.mrb[112].mxu1 %vm280_vm2, %v203_v8 }
  0xe4   :  { %v1809_v16 = vpop.f32.mrb[6].mxu0  ;;  %4112 = vmatprep.mubr.msk.f32.mxu1 %vm5476_vm1, %v5475_v2 }
  0xe5   :  { %4952 = vpow2.f32 %v3564_v13  ;;  %v1810_v18 = vadd.f32 %v1809_v16, %v742_v14  ;;  %v4329_v19 = vpop.f32.mrb[7].mxu0  ;;  %4487 = vmatmul.mubr.msk.f32.gmra.mrb[112].mxu0 %vm280_vm2, %v77_v12  ;;  %v209_v12 = vld [vmem:[%s7176_s1 + $0x1f0] sm:$0xff] }
  0xe6   :  { %v746_v20 = vpop.f32.mrb[8].mxu1  ;;  %4489 = vmatprep.mubr.msk.f32.mxu0 %vm5476_vm1, %v5475_v2  ;;  %v83_v16 = vld [vmem:[%s7175_s0 + $0x1f0] sm:$0xff] }
  0xe7   :  { %v4949_v22 = vpop.eup %4948  ;;  %v3565_v23 = vmul.f32 -1.442695, %v1810_v18  ;;  %v747_v24 = vadd.f32 %v6156_v46, %v746_v20  ;;  %v3955_v25 = vpop.f32.mrb[9].mxu1  ;;  %4113 = vmatmul.mubr.msk.f32.gmra.mrb[114].mxu1 %vm280_vm2, %v204_v17 }
  0xe8   :  { %v2793_v26 = vadd.f32 1.0, %v4949_v22  ;;  %v1814_v27 = vpop.f32.mrb[8].mxu0  ;;  %4115 = vmatprep.mubr.msk.f32.mxu1 %vm5476_vm1, %v5475_v2 }
  0xe9   :  { %4954 = vpow2.f32 %v3565_v23  ;;  %v1815_v29 = vadd.f32 %v1814_v27, %v747_v24  ;;  %v4332_v30 = vpop.f32.mrb[9].mxu0  ;;  %4490 = vmatmul.mubr.msk.f32.gmra.mrb[114].mxu0 %vm280_vm2, %v78_v21  ;;  %v210_v24 = vld [vmem:[%s7176_s1 + $0x1f8] sm:$0xff] }
  0xea   :  { %4956 = vrcp.f32 %v2793_v26  ;;  %v751_v31 = vpop.f32.mrb[10].mxu1  ;;  %4492 = vmatprep.mubr.msk.f32.mxu0 %vm5476_vm1, %v5475_v2 }
  0xeb   :  { %v4951_v33 = vpop.eup %4950  ;;  %v3566_v34 = vmul.f32 -1.442695, %v1815_v29  ;;  %v752_v35 = vadd.f32 %v6156_v46, %v751_v31  ;;  %v3958_v36 = vpop.f32.mrb[11].mxu1  ;;  %4116 = vmatmul.mubr.msk.f32.gmra.mrb[116].mxu1 %vm280_vm2, %v205_v28  ;;  %v84_v28 = vld [vmem:[%s7175_s0 + $0x1f8] sm:$0xff] }
  0xec   :  { %v2794_v37 = vadd.f32 1.0, %v4951_v33  ;;  %v1819_v38 = vpop.f32.mrb[10].mxu0  ;;  %4118 = vmatprep.mubr.msk.f32.mxu1 %vm5476_vm1, %v5475_v2  ;;  %v211_v36 = vld [vmem:[%s7176_s1 + $0x200] sm:$0xff] }
  0xed   :  { %4958 = vpow2.f32 %v3566_v34  ;;  %v1820_v40 = vadd.f32 %v1819_v38, %v752_v35  ;;  %v4335_v41 = vpop.f32.mrb[11].mxu0  ;;  %4493 = vmatmul.mubr.msk.f32.gmra.mrb[116].mxu0 %vm280_vm2, %v79_v32 }
  0xee   :  { %4960 = vrcp.f32 %v2794_v37  ;;  %v756_v42 = vpop.f32.mrb[12].mxu1  ;;  %4495 = vmatprep.mubr.msk.f32.mxu0 %vm5476_vm1, %v5475_v2 }
  0xef   :  { %v4953_v44 = vpop.eup %4952  ;;  %v3567_v45 = vmul.f32 -1.442695, %v1820_v40  ;;  %v757_v47 = vadd.f32 %v6156_v46, %v756_v42  ;;  %v3961_v48 = vpop.f32.mrb[13].mxu1  ;;  %4119 = vmatmul.mubr.msk.f32.gmra.mrb[118].mxu1 %vm280_vm2, %v206_v39  ;;  %v85_v40 = vld [vmem:[%s7175_s0 + $0x200] sm:$0xff] }
  0xf0   :  { %v2795_v49 = vadd.f32 1.0, %v4953_v44  ;;  %v1824_v50 = vpop.f32.mrb[12].mxu0  ;;  %4121 = vmatprep.mubr.msk.f32.mxu1 %vm5476_vm1, %v5475_v2 }
  0xf1   :  { %4962 = vpow2.f32 %v3567_v45  ;;  %v1825_v52 = vadd.f32 %v1824_v50, %v757_v47  ;;  %v4338_v53 = vpop.f32.mrb[13].mxu0  ;;  %4496 = vmatmul.mubr.msk.f32.gmra.mrb[118].mxu0 %vm280_vm2, %v80_v43 }
  0xf2   :  { %4964 = vrcp.f32 %v2795_v49  ;;  %v761_v54 = vpop.f32.mrb[14].mxu1  ;;  %4498 = vmatprep.mubr.msk.f32.mxu0 %vm5476_vm1, %v5475_v2  ;;  %v212_v49 = vld [vmem:[%s7176_s1 + $0x208] sm:$0xff] }
  0xf3   :  { %v4955_v56 = vpop.eup %4954  ;;  %v3568_v57 = vmul.f32 -1.442695, %v1825_v52  ;;  %v762_v58 = vadd.f32 %v6156_v46, %v761_v54  ;;  %v3964_v59 = vpop.f32.mrb[15].mxu1  ;;  %4122 = vmatmul.mubr.msk.f32.gmra.mrb[120].mxu1 %vm280_vm2, %v207_v51  ;;  %v86_v53 = vld [vmem:[%s7175_s0 + $0x208] sm:$0xff] }
  0xf4   :  { %v4957_v60 = vpop.eup %4956  ;;  %v2796_v61 = vadd.f32 1.0, %v4955_v56  ;;  %v1829_v62 = vpop.f32.mrb[14].mxu0  ;;  %4124 = vmatprep.mubr.msk.f32.mxu1 %vm5476_vm1, %v5475_v2 }
  0xf5   :  { %3168 = vst [vmem:[#allocation2] sm:$0xff] %v4957_v60  ;;  %4966 = vpow2.f32 %v3568_v57  ;;  %v1830_v0 = vadd.f32 %v1829_v62, %v762_v58  ;;  %v4341_v1 = vpop.f32.mrb[15].mxu0  ;;  %4499 = vmatmul.mubr.msk.f32.gmra.mrb[120].mxu0 %vm280_vm2, %v81_v55 }
  0xf6   :  { %4968 = vrcp.f32 %v2796_v61  ;;  %v766_v3 = vpop.f32.mrb[16].mxu1  ;;  %4501 = vmatprep.mubr.msk.f32.mxu0 %vm5476_vm1, %v5475_v2  ;;  %v213_v61 = vld [vmem:[%s7176_s1 + $0x210] sm:$0xff] }
  0xf7   :  { %v4959_v5 = vpop.eup %4958  ;;  %v3569_v6 = vmul.f32 -1.442695, %v1830_v0  ;;  %v767_v7 = vadd.f32 %v6156_v46, %v766_v3  ;;  %v3967_v8 = vpop.f32.mrb[17].mxu1  ;;  %4125 = vmatmul.mubr.msk.f32.gmra.mrb[122].mxu1 %vm280_vm2, %v208_v63  ;;  %v87_v1 = vld [vmem:[%s7175_s0 + $0x210] sm:$0xff] }
  0xf8   :  { %v4961_v9 = vpop.eup %4960  ;;  %v2797_v10 = vadd.f32 1.0, %v4959_v5  ;;  %v1834_v11 = vpop.f32.mrb[16].mxu0  ;;  %4127 = vmatprep.mubr.msk.f32.mxu1 %vm5476_vm1, %v5475_v2 }
  0xf9   :  { %3169 = vst [vmem:[#allocation2 + $0x8] sm:$0xff] %v4961_v9  ;;  %4970 = vpow2.f32 %v3569_v6  ;;  %v1835_v13 = vadd.f32 %v1834_v11, %v767_v7  ;;  %v4344_v14 = vpop.f32.mrb[17].mxu0  ;;  %4502 = vmatmul.mubr.msk.f32.gmra.mrb[122].mxu0 %vm280_vm2, %v82_v4 }
  0xfa   :  { %4972 = vrcp.f32 %v2797_v10  ;;  %v771_v15 = vpop.f32.mrb[18].mxu1  ;;  %4504 = vmatprep.mubr.msk.f32.mxu0 %vm5476_vm1, %v5475_v2  ;;  %v214_v10 = vld [vmem:[%s7176_s1 + $0x218] sm:$0xff] }
  0xfb   :  { %v4963_v17 = vpop.eup %4962  ;;  %v3570_v18 = vmul.f32 -1.442695, %v1835_v13  ;;  %v772_v19 = vadd.f32 %v6156_v46, %v771_v15  ;;  %v3970_v20 = vpop.f32.mrb[19].mxu1  ;;  %4128 = vmatmul.mubr.msk.f32.gmra.mrb[124].mxu1 %vm280_vm2, %v209_v12  ;;  %v88_v14 = vld [vmem:[%s7175_s0 + $0x218] sm:$0xff] }
  0xfc   :  { %v4965_v21 = vpop.eup %4964  ;;  %v2798_v22 = vadd.f32 1.0, %v4963_v17  ;;  %v1839_v23 = vpop.f32.mrb[18].mxu0  ;;  %4130 = vmatprep.mubr.msk.f32.mxu1 %vm5476_vm1, %v5475_v2 }
  0xfd   :  { %3170 = vst [vmem:[#allocation2 + $0x10] sm:$0xff] %v4965_v21  ;;  %4974 = vpow2.f32 %v3570_v18  ;;  %v1840_v25 = vadd.f32 %v1839_v23, %v772_v19  ;;  %v4347_v26 = vpop.f32.mrb[19].mxu0  ;;  %4505 = vmatmul.mubr.msk.f32.gmra.mrb[124].mxu0 %vm280_vm2, %v83_v16 }
  0xfe   :  { %4976 = vrcp.f32 %v2798_v22  ;;  %v776_v27 = vpop.f32.mrb[20].mxu1  ;;  %4507 = vmatprep.mubr.msk.f32.mxu0 %vm5476_vm1, %v5475_v2  ;;  %v215_v22 = vld [vmem:[%s7176_s1 + $0x220] sm:$0xff] }
  0xff   :  { %v4967_v29 = vpop.eup %4966  ;;  %v3571_v30 = vmul.f32 -1.442695, %v1840_v25  ;;  %v777_v31 = vadd.f32 %v6156_v46, %v776_v27  ;;  %v3973_v32 = vpop.f32.mrb[21].mxu1  ;;  %4131 = vmatmul.mubr.msk.f32.gmra.mrb[126].mxu1 %vm280_vm2, %v210_v24  ;;  %v89_v26 = vld [vmem:[%s7175_s0 + $0x220] sm:$0xff] }
 0x100   :  { %v4969_v33 = vpop.eup %4968  ;;  %v2799_v34 = vadd.f32 1.0, %v4967_v29  ;;  %v1844_v35 = vpop.f32.mrb[20].mxu0  ;;  %4133 = vmatprep.mubr.msk.f32.mxu1 %vm5476_vm1, %v5475_v2 }
 0x101   :  { %3171 = vst [vmem:[#allocation2 + $0x18] sm:$0xff] %v4969_v33  ;;  %4978 = vpow2.f32 %v3571_v30  ;;  %v1845_v37 = vadd.f32 %v1844_v35, %v777_v31  ;;  %v4350_v38 = vpop.f32.mrb[21].mxu0  ;;  %4508 = vmatmul.mubr.msk.f32.gmra.mrb[126].mxu0 %vm280_vm2, %v84_v28 }
 0x102   :  { %4980 = vrcp.f32 %v2799_v34  ;;  %v781_v39 = vpop.f32.mrb[22].mxu1  ;;  %4510 = vmatprep.mubr.msk.f32.mxu0 %vm5476_vm1, %v5475_v2  ;;  %v216_v34 = vld [vmem:[%s7176_s1 + $0x228] sm:$0xff] }
 0x103   :  { %v4971_v41 = vpop.eup %4970  ;;  %v3572_v42 = vmul.f32 -1.442695, %v1845_v37  ;;  %v782_v43 = vadd.f32 %v6156_v46, %v781_v39  ;;  %v3976_v44 = vpop.f32.mrb[23].mxu1  ;;  %4134 = vmatmul.mubr.msk.f32.gmra.mrb[128].mxu1 %vm280_vm2, %v211_v36  ;;  %v90_v38 = vld [vmem:[%s7175_s0 + $0x228] sm:$0xff] }
 0x104   :  { %v4973_v45 = vpop.eup %4972  ;;  %v2800_v47 = vadd.f32 1.0, %v4971_v41  ;;  %v1849_v48 = vpop.f32.mrb[22].mxu0  ;;  %4136 = vmatprep.mubr.msk.f32.mxu1 %vm5476_vm1, %v5475_v2 }
 0x105   :  { %3172 = vst [vmem:[#allocation2 + $0x20] sm:$0xff] %v4973_v45  ;;  %4982 = vpow2.f32 %v3572_v42  ;;  %v1850_v50 = vadd.f32 %v1849_v48, %v782_v43  ;;  %v4353_v51 = vpop.f32.mrb[23].mxu0  ;;  %4511 = vmatmul.mubr.msk.f32.gmra.mrb[128].mxu0 %vm280_vm2, %v85_v40 }
 0x106   :  { %4984 = vrcp.f32 %v2800_v47  ;;  %v786_v52 = vpop.f32.mrb[24].mxu1  ;;  %4513 = vmatprep.mubr.msk.f32.mxu0 %vm5476_vm1, %v5475_v2  ;;  %v217_v47 = vld [vmem:[%s7176_s1 + $0x230] sm:$0xff] }
 0x107   :  { %v4975_v54 = vpop.eup %4974  ;;  %v3573_v55 = vmul.f32 -1.442695, %v1850_v50  ;;  %v787_v56 = vadd.f32 %v6156_v46, %v786_v52  ;;  %v3979_v57 = vpop.f32.mrb[25].mxu1  ;;  %4137 = vmatmul.mubr.msk.f32.gmra.mrb[130].mxu1 %vm280_vm2, %v212_v49  ;;  %v91_v51 = vld [vmem:[%s7175_s0 + $0x230] sm:$0xff] }
 0x108   :  { %v4977_v58 = vpop.eup %4976  ;;  %v2801_v59 = vadd.f32 1.0, %v4975_v54  ;;  %v1854_v60 = vpop.f32.mrb[24].mxu0  ;;  %4139 = vmatprep.mubr.msk.f32.mxu1 %vm5476_vm1, %v5475_v2 }
 0x109   :  { %3173 = vst [vmem:[#allocation2 + $0x28] sm:$0xff] %v4977_v58  ;;  %4986 = vpow2.f32 %v3573_v55  ;;  %v1855_v62 = vadd.f32 %v1854_v60, %v787_v56  ;;  %v4356_v63 = vpop.f32.mrb[25].mxu0  ;;  %4514 = vmatmul.mubr.msk.f32.gmra.mrb[130].mxu0 %vm280_vm2, %v86_v53 }
 0x10a   :  { %4988 = vrcp.f32 %v2801_v59  ;;  %v791_v0 = vpop.f32.mrb[26].mxu1  ;;  %4516 = vmatprep.mubr.msk.f32.mxu0 %vm5476_vm1, %v5475_v2  ;;  %v218_v59 = vld [vmem:[%s7176_s1 + $0x238] sm:$0xff] }
 0x10b   :  { %v4979_v3 = vpop.eup %4978  ;;  %v3574_v4 = vmul.f32 -1.442695, %v1855_v62  ;;  %v792_v5 = vadd.f32 %v6156_v46, %v791_v0  ;;  %v3982_v6 = vpop.f32.mrb[27].mxu1  ;;  %4140 = vmatmul.mubr.msk.f32.gmra.mrb[132].mxu1 %vm280_vm2, %v213_v61  ;;  %v92_v63 = vld [vmem:[%s7175_s0 + $0x238] sm:$0xff] }
 0x10c   :  { %v4981_v7 = vpop.eup %4980  ;;  %v2802_v8 = vadd.f32 1.0, %v4979_v3  ;;  %v1859_v9 = vpop.f32.mrb[26].mxu0  ;;  %4142 = vmatprep.mubr.msk.f32.mxu1 %vm5476_vm1, %v5475_v2 }
 0x10d   :  { %3174 = vst [vmem:[#allocation2 + $0x30] sm:$0xff] %v4981_v7  ;;  %4990 = vpow2.f32 %v3574_v4  ;;  %v1860_v11 = vadd.f32 %v1859_v9, %v792_v5  ;;  %v4359_v12 = vpop.f32.mrb[27].mxu0  ;;  %4517 = vmatmul.mubr.msk.f32.gmra.mrb[132].mxu0 %vm280_vm2, %v87_v1 }
 0x10e   :  { %4992 = vrcp.f32 %v2802_v8  ;;  %v796_v13 = vpop.f32.mrb[28].mxu1  ;;  %4519 = vmatprep.mubr.msk.f32.mxu0 %vm5476_vm1, %v5475_v2  ;;  %v219_v8 = vld [vmem:[%s7176_s1 + $0x240] sm:$0xff] }
 0x10f   :  { %v4983_v15 = vpop.eup %4982  ;;  %v3575_v16 = vmul.f32 -1.442695, %v1860_v11  ;;  %v797_v17 = vadd.f32 %v6156_v46, %v796_v13  ;;  %v3985_v18 = vpop.f32.mrb[29].mxu1  ;;  %4143 = vmatmul.mubr.msk.f32.gmra.mrb[134].mxu1 %vm280_vm2, %v214_v10  ;;  %v93_v12 = vld [vmem:[%s7175_s0 + $0x240] sm:$0xff] }
 0x110   :  { %v4985_v19 = vpop.eup %4984  ;;  %v2803_v20 = vadd.f32 1.0, %v4983_v15  ;;  %v1864_v21 = vpop.f32.mrb[28].mxu0  ;;  %4145 = vmatprep.mubr.msk.f32.mxu1 %vm5476_vm1, %v5475_v2 }
 0x111   :  { %3175 = vst [vmem:[#allocation2 + $0x38] sm:$0xff] %v4985_v19  ;;  %4994 = vpow2.f32 %v3575_v16  ;;  %v1865_v23 = vadd.f32 %v1864_v21, %v797_v17  ;;  %v4362_v24 = vpop.f32.mrb[29].mxu0  ;;  %4520 = vmatmul.mubr.msk.f32.gmra.mrb[134].mxu0 %vm280_vm2, %v88_v14 }
 0x112   :  { %4996 = vrcp.f32 %v2803_v20  ;;  %v801_v25 = vpop.f32.mrb[30].mxu1  ;;  %4522 = vmatprep.mubr.msk.f32.mxu0 %vm5476_vm1, %v5475_v2  ;;  %v220_v20 = vld [vmem:[%s7176_s1 + $0x248] sm:$0xff] }
 0x113   :  { %v4987_v27 = vpop.eup %4986  ;;  %v3576_v28 = vmul.f32 -1.442695, %v1865_v23  ;;  %v802_v29 = vadd.f32 %v6156_v46, %v801_v25  ;;  %v3988_v30 = vpop.f32.mrb[31].mxu1  ;;  %4146 = vmatmul.mubr.msk.f32.gmra.mrb[136].mxu1 %vm280_vm2, %v215_v22  ;;  %v94_v24 = vld [vmem:[%s7175_s0 + $0x248] sm:$0xff] }
 0x114   :  { %v4989_v31 = vpop.eup %4988  ;;  %v2804_v32 = vadd.f32 1.0, %v4987_v27  ;;  %v1869_v33 = vpop.f32.mrb[30].mxu0  ;;  %4148 = vmatprep.mubr.msk.f32.mxu1 %vm5476_vm1, %v5475_v2 }
 0x115   :  { %3176 = vst [vmem:[#allocation2 + $0x40] sm:$0xff] %v4989_v31  ;;  %4998 = vpow2.f32 %v3576_v28  ;;  %v1870_v35 = vadd.f32 %v1869_v33, %v802_v29  ;;  %v4365_v36 = vpop.f32.mrb[31].mxu0  ;;  %4523 = vmatmul.mubr.msk.f32.gmra.mrb[136].mxu0 %vm280_vm2, %v89_v26 }
 0x116   :  { %5000 = vrcp.f32 %v2804_v32  ;;  %v806_v37 = vpop.f32.mrb[32].mxu1  ;;  %4525 = vmatprep.mubr.msk.f32.mxu0 %vm5476_vm1, %v5475_v2  ;;  %v221_v32 = vld [vmem:[%s7176_s1 + $0x250] sm:$0xff] }
 0x117   :  { %v4991_v39 = vpop.eup %4990  ;;  %v3577_v40 = vmul.f32 -1.442695, %v1870_v35  ;;  %v807_v41 = vadd.f32 %v6156_v46, %v806_v37  ;;  %v3991_v42 = vpop.f32.mrb[33].mxu1  ;;  %4149 = vmatmul.mubr.msk.f32.gmra.mrb[138].mxu1 %vm280_vm2, %v216_v34  ;;  %v95_v36 = vld [vmem:[%s7175_s0 + $0x250] sm:$0xff] }
 0x118   :  { %v4993_v43 = vpop.eup %4992  ;;  %v2805_v44 = vadd.f32 1.0, %v4991_v39  ;;  %v1874_v45 = vpop.f32.mrb[32].mxu0  ;;  %4151 = vmatprep.mubr.msk.f32.mxu1 %vm5476_vm1, %v5475_v2 }
 0x119   :  { %3177 = vst [vmem:[#allocation2 + $0x48] sm:$0xff] %v4993_v43  ;;  %5002 = vpow2.f32 %v3577_v40  ;;  %v1875_v48 = vadd.f32 %v1874_v45, %v807_v41  ;;  %v4368_v49 = vpop.f32.mrb[33].mxu0  ;;  %4526 = vmatmul.mubr.msk.f32.gmra.mrb[138].mxu0 %vm280_vm2, %v90_v38 }
 0x11a   :  { %5004 = vrcp.f32 %v2805_v44  ;;  %v811_v50 = vpop.f32.mrb[34].mxu1  ;;  %4528 = vmatprep.mubr.msk.f32.mxu0 %vm5476_vm1, %v5475_v2  ;;  %v222_v44 = vld [vmem:[%s7176_s1 + $0x258] sm:$0xff] }
 0x11b   :  { %v4995_v52 = vpop.eup %4994  ;;  %v3578_v53 = vmul.f32 -1.442695, %v1875_v48  ;;  %v812_v54 = vadd.f32 %v6156_v46, %v811_v50  ;;  %v3994_v55 = vpop.f32.mrb[35].mxu1  ;;  %4152 = vmatmul.mubr.msk.f32.gmra.mrb[140].mxu1 %vm280_vm2, %v217_v47  ;;  %v96_v49 = vld [vmem:[%s7175_s0 + $0x258] sm:$0xff] }
 0x11c   :  { %v4997_v56 = vpop.eup %4996  ;;  %v2806_v57 = vadd.f32 1.0, %v4995_v52  ;;  %v1879_v58 = vpop.f32.mrb[34].mxu0  ;;  %4154 = vmatprep.mubr.msk.f32.mxu1 %vm5476_vm1, %v5475_v2 }
 0x11d   :  { %3178 = vst [vmem:[#allocation2 + $0x50] sm:$0xff] %v4997_v56  ;;  %5006 = vpow2.f32 %v3578_v53  ;;  %v1880_v60 = vadd.f32 %v1879_v58, %v812_v54  ;;  %v4371_v61 = vpop.f32.mrb[35].mxu0  ;;  %4529 = vmatmul.mubr.msk.f32.gmra.mrb[140].mxu0 %vm280_vm2, %v91_v51 }
 0x11e   :  { %5008 = vrcp.f32 %v2806_v57  ;;  %v816_v62 = vpop.f32.mrb[36].mxu1  ;;  %4531 = vmatprep.mubr.msk.f32.mxu0 %vm5476_vm1, %v5475_v2  ;;  %v223_v57 = vld [vmem:[%s7176_s1 + $0x260] sm:$0xff] }
 0x11f   :  { %v4999_v0 = vpop.eup %4998  ;;  %v3579_v1 = vmul.f32 -1.442695, %v1880_v60  ;;  %v817_v3 = vadd.f32 %v6156_v46, %v816_v62  ;;  %v3997_v4 = vpop.f32.mrb[37].mxu1  ;;  %4155 = vmatmul.mubr.msk.f32.gmra.mrb[142].mxu1 %vm280_vm2, %v218_v59  ;;  %v97_v61 = vld [vmem:[%s7175_s0 + $0x260] sm:$0xff] }
 0x120   :  { %v5001_v5 = vpop.eup %5000  ;;  %v2807_v6 = vadd.f32 1.0, %v4999_v0  ;;  %v1884_v7 = vpop.f32.mrb[36].mxu0  ;;  %4157 = vmatprep.mubr.msk.f32.mxu1 %vm5476_vm1, %v5475_v2 }
 0x121   :  { %3179 = vst [vmem:[#allocation2 + $0x58] sm:$0xff] %v5001_v5  ;;  %5010 = vpow2.f32 %v3579_v1  ;;  %v1885_v9 = vadd.f32 %v1884_v7, %v817_v3  ;;  %v4374_v10 = vpop.f32.mrb[37].mxu0  ;;  %4532 = vmatmul.mubr.msk.f32.gmra.mrb[142].mxu0 %vm280_vm2, %v92_v63 }
 0x122   :  { %5012 = vrcp.f32 %v2807_v6  ;;  %v821_v11 = vpop.f32.mrb[38].mxu1  ;;  %4534 = vmatprep.mubr.msk.f32.mxu0 %vm5476_vm1, %v5475_v2  ;;  %v224_v6 = vld [vmem:[%s7176_s1 + $0x268] sm:$0xff] }
 0x123   :  { %v5003_v13 = vpop.eup %5002  ;;  %v3580_v14 = vmul.f32 -1.442695, %v1885_v9  ;;  %v822_v15 = vadd.f32 %v6156_v46, %v821_v11  ;;  %v4000_v16 = vpop.f32.mrb[39].mxu1  ;;  %4158 = vmatmul.mubr.msk.f32.gmra.mrb[144].mxu1 %vm280_vm2, %v219_v8  ;;  %v98_v10 = vld [vmem:[%s7175_s0 + $0x268] sm:$0xff] }
 0x124   :  { %v5005_v17 = vpop.eup %5004  ;;  %v2808_v18 = vadd.f32 1.0, %v5003_v13  ;;  %v1889_v19 = vpop.f32.mrb[38].mxu0  ;;  %4160 = vmatprep.mubr.msk.f32.mxu1 %vm5476_vm1, %v5475_v2 }
 0x125   :  { %3180 = vst [vmem:[#allocation2 + $0x60] sm:$0xff] %v5005_v17  ;;  %5014 = vpow2.f32 %v3580_v14  ;;  %v1890_v21 = vadd.f32 %v1889_v19, %v822_v15  ;;  %v4377_v22 = vpop.f32.mrb[39].mxu0  ;;  %4535 = vmatmul.mubr.msk.f32.gmra.mrb[144].mxu0 %vm280_vm2, %v93_v12 }
 0x126   :  { %5016 = vrcp.f32 %v2808_v18  ;;  %v826_v23 = vpop.f32.mrb[40].mxu1  ;;  %4537 = vmatprep.mubr.msk.f32.mxu0 %vm5476_vm1, %v5475_v2  ;;  %v225_v18 = vld [vmem:[%s7176_s1 + $0x270] sm:$0xff] }
 0x127   :  { %v5007_v25 = vpop.eup %5006  ;;  %v3581_v26 = vmul.f32 -1.442695, %v1890_v21  ;;  %v827_v27 = vadd.f32 %v6156_v46, %v826_v23  ;;  %v4003_v28 = vpop.f32.mrb[41].mxu1  ;;  %4161 = vmatmul.mubr.msk.f32.gmra.mrb[146].mxu1 %vm280_vm2, %v220_v20  ;;  %v99_v22 = vld [vmem:[%s7175_s0 + $0x270] sm:$0xff] }
 0x128   :  { %v5009_v29 = vpop.eup %5008  ;;  %v2809_v30 = vadd.f32 1.0, %v5007_v25  ;;  %v1894_v31 = vpop.f32.mrb[40].mxu0  ;;  %4163 = vmatprep.mubr.msk.f32.mxu1 %vm5476_vm1, %v5475_v2 }
 0x129   :  { %3181 = vst [vmem:[#allocation2 + $0x68] sm:$0xff] %v5009_v29  ;;  %5018 = vpow2.f32 %v3581_v26  ;;  %v1895_v33 = vadd.f32 %v1894_v31, %v827_v27  ;;  %v4380_v34 = vpop.f32.mrb[41].mxu0  ;;  %4538 = vmatmul.mubr.msk.f32.gmra.mrb[146].mxu0 %vm280_vm2, %v94_v24 }
 0x12a   :  { %5020 = vrcp.f32 %v2809_v30  ;;  %v831_v35 = vpop.f32.mrb[42].mxu1  ;;  %4540 = vmatprep.mubr.msk.f32.mxu0 %vm5476_vm1, %v5475_v2  ;;  %v226_v30 = vld [vmem:[%s7176_s1 + $0x278] sm:$0xff] }
 0x12b   :  { %v5011_v37 = vpop.eup %5010  ;;  %v3582_v38 = vmul.f32 -1.442695, %v1895_v33  ;;  %v832_v39 = vadd.f32 %v6156_v46, %v831_v35  ;;  %v4006_v40 = vpop.f32.mrb[43].mxu1  ;;  %4164 = vmatmul.mubr.msk.f32.gmra.mrb[148].mxu1 %vm280_vm2, %v221_v32  ;;  %v100_v34 = vld [vmem:[%s7175_s0 + $0x278] sm:$0xff] }
 0x12c   :  { %v5013_v41 = vpop.eup %5012  ;;  %v2810_v42 = vadd.f32 1.0, %v5011_v37  ;;  %v1899_v43 = vpop.f32.mrb[42].mxu0  ;;  %4166 = vmatprep.mubr.msk.f32.mxu1 %vm5476_vm1, %v5475_v2 }
 0x12d   :  { %3182 = vst [vmem:[#allocation2 + $0x70] sm:$0xff] %v5013_v41  ;;  %5022 = vpow2.f32 %v3582_v38  ;;  %v1900_v45 = vadd.f32 %v1899_v43, %v832_v39  ;;  %v4383_v47 = vpop.f32.mrb[43].mxu0  ;;  %4541 = vmatmul.mubr.msk.f32.gmra.mrb[148].mxu0 %vm280_vm2, %v95_v36 }
 0x12e   :  { %5024 = vrcp.f32 %v2810_v42  ;;  %v836_v48 = vpop.f32.mrb[44].mxu1  ;;  %4543 = vmatprep.mubr.msk.f32.mxu0 %vm5476_vm1, %v5475_v2  ;;  %v227_v42 = vld [vmem:[%s7176_s1 + $0x280] sm:$0xff] }
 0x12f   :  { %v5015_v50 = vpop.eup %5014  ;;  %v3583_v51 = vmul.f32 -1.442695, %v1900_v45  ;;  %v837_v52 = vadd.f32 %v6156_v46, %v836_v48  ;;  %v4009_v53 = vpop.f32.mrb[45].mxu1  ;;  %4167 = vmatmul.mubr.msk.f32.gmra.mrb[150].mxu1 %vm280_vm2, %v222_v44  ;;  %v101_v47 = vld [vmem:[%s7175_s0 + $0x280] sm:$0xff] }
 0x130   :  { %v5017_v54 = vpop.eup %5016  ;;  %v2811_v55 = vadd.f32 1.0, %v5015_v50  ;;  %v1904_v56 = vpop.f32.mrb[44].mxu0  ;;  %4169 = vmatprep.mubr.msk.f32.mxu1 %vm5476_vm1, %v5475_v2 }
 0x131   :  { %3183 = vst [vmem:[#allocation2 + $0x78] sm:$0xff] %v5017_v54  ;;  %5026 = vpow2.f32 %v3583_v51  ;;  %v1905_v58 = vadd.f32 %v1904_v56, %v837_v52  ;;  %v4386_v59 = vpop.f32.mrb[45].mxu0  ;;  %4544 = vmatmul.mubr.msk.f32.gmra.mrb[150].mxu0 %vm280_vm2, %v96_v49 }
 0x132   :  { %5028 = vrcp.f32 %v2811_v55  ;;  %v841_v60 = vpop.f32.mrb[46].mxu1  ;;  %4546 = vmatprep.mubr.msk.f32.mxu0 %vm5476_vm1, %v5475_v2  ;;  %v228_v55 = vld [vmem:[%s7176_s1 + $0x288] sm:$0xff] }
 0x133   :  { %v5019_v62 = vpop.eup %5018  ;;  %v3584_v63 = vmul.f32 -1.442695, %v1905_v58  ;;  %v842_v0 = vadd.f32 %v6156_v46, %v841_v60  ;;  %v4012_v1 = vpop.f32.mrb[47].mxu1  ;;  %4170 = vmatmul.mubr.msk.f32.gmra.mrb[152].mxu1 %vm280_vm2, %v223_v57  ;;  %v102_v58 = vld [vmem:[%s7175_s0 + $0x288] sm:$0xff] }
 0x134   :  { %v5021_v3 = vpop.eup %5020  ;;  %v2812_v4 = vadd.f32 1.0, %v5019_v62  ;;  %v1909_v5 = vpop.f32.mrb[46].mxu0  ;;  %4172 = vmatprep.mubr.msk.f32.mxu1 %vm5476_vm1, %v5475_v2 }
 0x135   :  { %3184 = vst [vmem:[#allocation2 + $0x80] sm:$0xff] %v5021_v3  ;;  %5030 = vpow2.f32 %v3584_v63  ;;  %v1910_v7 = vadd.f32 %v1909_v5, %v842_v0  ;;  %v4389_v8 = vpop.f32.mrb[47].mxu0  ;;  %4547 = vmatmul.mubr.msk.f32.gmra.mrb[152].mxu0 %vm280_vm2, %v97_v61  ;;  %v6536_v61 = vld [vmem:[%s7179_s4] ss:$0 sm:$0xff] }
 0x136   :  { %5032 = vrcp.f32 %v2812_v4  ;;  %v846_v9 = vpop.f32.mrb[48].mxu1  ;;  %4549 = vmatprep.mubr.msk.f32.mxu0 %vm5476_vm1, %v5475_v2  ;;  %v229_v4 = vld [vmem:[%s7176_s1 + $0x290] sm:$0xff] }
 0x137   :  { %v5023_v11 = vpop.eup %5022  ;;  %v3585_v12 = vmul.f32 -1.442695, %v1910_v7  ;;  %v847_v13 = vadd.f32 %v6156_v46, %v846_v9  ;;  %v4015_v14 = vpop.f32.mrb[49].mxu1  ;;  %4173 = vmatmul.mubr.msk.f32.gmra.mrb[154].mxu1 %vm280_vm2, %v224_v6  ;;  %v103_v8 = vld [vmem:[%s7175_s0 + $0x290] sm:$0xff] }
 0x138   :  { %v5025_v15 = vpop.eup %5024  ;;  %v2813_v16 = vadd.f32 1.0, %v5023_v11  ;;  %v1914_v17 = vpop.f32.mrb[48].mxu0  ;;  %4175 = vmatprep.mubr.msk.f32.mxu1 %vm5476_vm1, %v5475_v2 }
 0x139   :  { %3185 = vst [vmem:[#allocation2 + $0x88] sm:$0xff] %v5025_v15  ;;  %5034 = vpow2.f32 %v3585_v12  ;;  %v1915_v19 = vadd.f32 %v1914_v17, %v847_v13  ;;  %v4392_v20 = vpop.f32.mrb[49].mxu0  ;;  %4550 = vmatmul.mubr.msk.f32.gmra.mrb[154].mxu0 %vm280_vm2, %v98_v10 }
 0x13a   :  { %5036 = vrcp.f32 %v2813_v16  ;;  %v851_v21 = vpop.f32.mrb[50].mxu1  ;;  %4552 = vmatprep.mubr.msk.f32.mxu0 %vm5476_vm1, %v5475_v2  ;;  %v230_v16 = vld [vmem:[%s7176_s1 + $0x298] sm:$0xff] }
 0x13b   :  { %v5027_v23 = vpop.eup %5026  ;;  %v3586_v24 = vmul.f32 -1.442695, %v1915_v19  ;;  %v852_v25 = vadd.f32 %v6156_v46, %v851_v21  ;;  %v4018_v26 = vpop.f32.mrb[51].mxu1  ;;  %4176 = vmatmul.mubr.msk.f32.gmra.mrb[156].mxu1 %vm280_vm2, %v225_v18  ;;  %v104_v20 = vld [vmem:[%s7175_s0 + $0x298] sm:$0xff] }
 0x13c   :  { %v5029_v27 = vpop.eup %5028  ;;  %v2814_v28 = vadd.f32 1.0, %v5027_v23  ;;  %v1919_v29 = vpop.f32.mrb[50].mxu0  ;;  %4178 = vmatprep.mubr.msk.f32.mxu1 %vm5476_vm1, %v5475_v2 }
 0x13d   :  { %3186 = vst [vmem:[#allocation2 + $0x90] sm:$0xff] %v5029_v27  ;;  %5038 = vpow2.f32 %v3586_v24  ;;  %v1920_v31 = vadd.f32 %v1919_v29, %v852_v25  ;;  %v4395_v32 = vpop.f32.mrb[51].mxu0  ;;  %4553 = vmatmul.mubr.msk.f32.gmra.mrb[156].mxu0 %vm280_vm2, %v99_v22 }
 0x13e   :  { %5040 = vrcp.f32 %v2814_v28  ;;  %v856_v33 = vpop.f32.mrb[52].mxu1  ;;  %4555 = vmatprep.mubr.msk.f32.mxu0 %vm5476_vm1, %v5475_v2  ;;  %v231_v28 = vld [vmem:[%s7176_s1 + $0x2a0] sm:$0xff] }
 0x13f   :  { %v5031_v35 = vpop.eup %5030  ;;  %v3587_v36 = vmul.f32 -1.442695, %v1920_v31  ;;  %v857_v37 = vadd.f32 %v6156_v46, %v856_v33  ;;  %v4021_v38 = vpop.f32.mrb[53].mxu1  ;;  %4179 = vmatmul.mubr.msk.f32.gmra.mrb[158].mxu1 %vm280_vm2, %v226_v30  ;;  %v105_v32 = vld [vmem:[%s7175_s0 + $0x2a0] sm:$0xff] }
 0x140   :  { %v5033_v39 = vpop.eup %5032  ;;  %v2815_v40 = vadd.f32 1.0, %v5031_v35  ;;  %v1924_v41 = vpop.f32.mrb[52].mxu0  ;;  %4181 = vmatprep.mubr.msk.f32.mxu1 %vm5476_vm1, %v5475_v2 }
 0x141   :  { %3187 = vst [vmem:[#allocation2 + $0x98] sm:$0xff] %v5033_v39  ;;  %5042 = vpow2.f32 %v3587_v36  ;;  %v1925_v43 = vadd.f32 %v1924_v41, %v857_v37  ;;  %v4398_v44 = vpop.f32.mrb[53].mxu0  ;;  %4556 = vmatmul.mubr.msk.f32.gmra.mrb[158].mxu0 %vm280_vm2, %v100_v34 }
 0x142   :  { %5044 = vrcp.f32 %v2815_v40  ;;  %v861_v45 = vpop.f32.mrb[54].mxu1  ;;  %4558 = vmatprep.mubr.msk.f32.mxu0 %vm5476_vm1, %v5475_v2  ;;  %v232_v40 = vld [vmem:[%s7176_s1 + $0x2a8] sm:$0xff] }
 0x143   :  { %v5035_v48 = vpop.eup %5034  ;;  %v3588_v49 = vmul.f32 -1.442695, %v1925_v43  ;;  %v862_v50 = vadd.f32 %v6156_v46, %v861_v45  ;;  %v4024_v51 = vpop.f32.mrb[55].mxu1  ;;  %4182 = vmatmul.mubr.msk.f32.gmra.mrb[160].mxu1 %vm280_vm2, %v227_v42  ;;  %v106_v44 = vld [vmem:[%s7175_s0 + $0x2a8] sm:$0xff] }
 0x144   :  { %v5037_v52 = vpop.eup %5036  ;;  %v2816_v53 = vadd.f32 1.0, %v5035_v48  ;;  %v1929_v54 = vpop.f32.mrb[54].mxu0  ;;  %4184 = vmatprep.mubr.msk.f32.mxu1 %vm5476_vm1, %v5475_v2 }
 0x145   :  { %3188 = vst [vmem:[#allocation2 + $0xa0] sm:$0xff] %v5037_v52  ;;  %5046 = vpow2.f32 %v3588_v49  ;;  %v1930_v56 = vadd.f32 %v1929_v54, %v862_v50  ;;  %v4401_v57 = vpop.f32.mrb[55].mxu0  ;;  %4559 = vmatmul.mubr.msk.f32.gmra.mrb[160].mxu0 %vm280_vm2, %v101_v47 }
 0x146   :  { %5048 = vrcp.f32 %v2816_v53  ;;  %v866_v46 = vpop.f32.mrb[56].mxu1  ;;  %4561 = vmatprep.mubr.msk.f32.mxu0 %vm5476_vm1, %v5475_v2  ;;  %v233_v53 = vld [vmem:[%s7176_s1 + $0x2b0] sm:$0xff] }
 0x147   :  { %v5039_v59 = vpop.eup %5038  ;;  %v3589_v60 = vmul.f32 -1.442695, %v1930_v56  ;;  %v867_v62 = vadd.f32 %v6536_v61, %v866_v46  ;;  %v4027_v63 = vpop.f32.mrb[57].mxu1  ;;  %4185 = vmatmul.mubr.msk.f32.gmra.mrb[162].mxu1 %vm280_vm2, %v228_v55  ;;  %v107_v57 = vld [vmem:[%s7175_s0 + $0x2b0] sm:$0xff] }
 0x148   :  { %v5041_v0 = vpop.eup %5040  ;;  %v2817_v1 = vadd.f32 1.0, %v5039_v59  ;;  %v1934_v3 = vpop.f32.mrb[56].mxu0  ;;  %4187 = vmatprep.mubr.msk.f32.mxu1 %vm5476_vm1, %v5475_v2 }
 0x149   :  { %3189 = vst [vmem:[#allocation2 + $0xa8] sm:$0xff] %v5041_v0  ;;  %5050 = vpow2.f32 %v3589_v60  ;;  %v1935_v5 = vadd.f32 %v1934_v3, %v867_v62  ;;  %v4404_v6 = vpop.f32.mrb[57].mxu0  ;;  %4562 = vmatmul.mubr.msk.f32.gmra.mrb[162].mxu0 %vm280_vm2, %v102_v58 }
 0x14a   :  { %5052 = vrcp.f32 %v2817_v1  ;;  %v871_v7 = vpop.f32.mrb[58].mxu1  ;;  %4564 = vmatprep.mubr.msk.f32.mxu0 %vm5476_vm1, %v5475_v2  ;;  %v234_v1 = vld [vmem:[%s7176_s1 + $0x2b8] sm:$0xff] }
 0x14b   :  { %v5043_v9 = vpop.eup %5042  ;;  %v3590_v10 = vmul.f32 -1.442695, %v1935_v5  ;;  %v872_v11 = vadd.f32 %v6536_v61, %v871_v7  ;;  %v4030_v12 = vpop.f32.mrb[59].mxu1  ;;  %4188 = vmatmul.mubr.msk.f32.gmra.mrb[164].mxu1 %vm280_vm2, %v229_v4  ;;  %v108_v6 = vld [vmem:[%s7175_s0 + $0x2b8] sm:$0xff] }
 0x14c   :  { %v5045_v13 = vpop.eup %5044  ;;  %v2818_v14 = vadd.f32 1.0, %v5043_v9  ;;  %v1939_v15 = vpop.f32.mrb[58].mxu0  ;;  %4190 = vmatprep.mubr.msk.f32.mxu1 %vm5476_vm1, %v5475_v2 }
 0x14d   :  { %3190 = vst [vmem:[#allocation2 + $0xb0] sm:$0xff] %v5045_v13  ;;  %5054 = vpow2.f32 %v3590_v10  ;;  %v1940_v17 = vadd.f32 %v1939_v15, %v872_v11  ;;  %v4407_v18 = vpop.f32.mrb[59].mxu0  ;;  %4565 = vmatmul.mubr.msk.f32.gmra.mrb[164].mxu0 %vm280_vm2, %v103_v8 }
 0x14e   :  { %5056 = vrcp.f32 %v2818_v14  ;;  %v876_v19 = vpop.f32.mrb[60].mxu1  ;;  %4567 = vmatprep.mubr.msk.f32.mxu0 %vm5476_vm1, %v5475_v2  ;;  %v235_v14 = vld [vmem:[%s7176_s1 + $0x2c0] sm:$0xff] }
 0x14f   :  { %v5047_v21 = vpop.eup %5046  ;;  %v3591_v22 = vmul.f32 -1.442695, %v1940_v17  ;;  %v877_v23 = vadd.f32 %v6536_v61, %v876_v19  ;;  %v4033_v24 = vpop.f32.mrb[61].mxu1  ;;  %4191 = vmatmul.mubr.msk.f32.gmra.mrb[166].mxu1 %vm280_vm2, %v230_v16  ;;  %v109_v18 = vld [vmem:[%s7175_s0 + $0x2c0] sm:$0xff] }
 0x150   :  { %v5049_v25 = vpop.eup %5048  ;;  %v2819_v26 = vadd.f32 1.0, %v5047_v21  ;;  %v1944_v27 = vpop.f32.mrb[60].mxu0  ;;  %4193 = vmatprep.mubr.msk.f32.mxu1 %vm5476_vm1, %v5475_v2 }
 0x151   :  { %3191 = vst [vmem:[#allocation2 + $0xb8] sm:$0xff] %v5049_v25  ;;  %5058 = vpow2.f32 %v3591_v22  ;;  %v1945_v29 = vadd.f32 %v1944_v27, %v877_v23  ;;  %v4410_v30 = vpop.f32.mrb[61].mxu0  ;;  %4568 = vmatmul.mubr.msk.f32.gmra.mrb[166].mxu0 %vm280_vm2, %v104_v20 }
 0x152   :  { %5060 = vrcp.f32 %v2819_v26  ;;  %v881_v31 = vpop.f32.mrb[62].mxu1  ;;  %4570 = vmatprep.mubr.msk.f32.mxu0 %vm5476_vm1, %v5475_v2  ;;  %v236_v26 = vld [vmem:[%s7176_s1 + $0x2c8] sm:$0xff] }
 0x153   :  { %v5051_v33 = vpop.eup %5050  ;;  %v3592_v34 = vmul.f32 -1.442695, %v1945_v29  ;;  %v882_v35 = vadd.f32 %v6536_v61, %v881_v31  ;;  %v4036_v36 = vpop.f32.mrb[63].mxu1  ;;  %4194 = vmatmul.mubr.msk.f32.gmra.mrb[168].mxu1 %vm280_vm2, %v231_v28  ;;  %v110_v30 = vld [vmem:[%s7175_s0 + $0x2c8] sm:$0xff] }
 0x154   :  { %v5053_v37 = vpop.eup %5052  ;;  %v2820_v38 = vadd.f32 1.0, %v5051_v33  ;;  %v1949_v39 = vpop.f32.mrb[62].mxu0  ;;  %4196 = vmatprep.mubr.msk.f32.mxu1 %vm5476_vm1, %v5475_v2 }
 0x155   :  { %3192 = vst [vmem:[#allocation2 + $0xc0] sm:$0xff] %v5053_v37  ;;  %5062 = vpow2.f32 %v3592_v34  ;;  %v1950_v41 = vadd.f32 %v1949_v39, %v882_v35  ;;  %v4413_v42 = vpop.f32.mrb[63].mxu0  ;;  %4571 = vmatmul.mubr.msk.f32.gmra.mrb[168].mxu0 %vm280_vm2, %v105_v32 }
 0x156   :  { %5064 = vrcp.f32 %v2820_v38  ;;  %v886_v43 = vpop.f32.mrb[64].mxu1  ;;  %4573 = vmatprep.mubr.msk.f32.mxu0 %vm5476_vm1, %v5475_v2  ;;  %v237_v38 = vld [vmem:[%s7176_s1 + $0x2d0] sm:$0xff] }
 0x157   :  { %v5055_v45 = vpop.eup %5054  ;;  %v3593_v47 = vmul.f32 -1.442695, %v1950_v41  ;;  %v887_v48 = vadd.f32 %v6536_v61, %v886_v43  ;;  %v4039_v49 = vpop.f32.mrb[65].mxu1  ;;  %4197 = vmatmul.mubr.msk.f32.gmra.mrb[170].mxu1 %vm280_vm2, %v232_v40  ;;  %v111_v42 = vld [vmem:[%s7175_s0 + $0x2d0] sm:$0xff] }
 0x158   :  { %v5057_v50 = vpop.eup %5056  ;;  %v2821_v51 = vadd.f32 1.0, %v5055_v45  ;;  %v1954_v52 = vpop.f32.mrb[64].mxu0  ;;  %4199 = vmatprep.mubr.msk.f32.mxu1 %vm5476_vm1, %v5475_v2 }
 0x159   :  { %3193 = vst [vmem:[#allocation2 + $0xc8] sm:$0xff] %v5057_v50  ;;  %5066 = vpow2.f32 %v3593_v47  ;;  %v1955_v54 = vadd.f32 %v1954_v52, %v887_v48  ;;  %v4416_v55 = vpop.f32.mrb[65].mxu0  ;;  %4574 = vmatmul.mubr.msk.f32.gmra.mrb[170].mxu0 %vm280_vm2, %v106_v44 }
 0x15a   :  { %5068 = vrcp.f32 %v2821_v51  ;;  %v891_v56 = vpop.f32.mrb[66].mxu1  ;;  %4576 = vmatprep.mubr.msk.f32.mxu0 %vm5476_vm1, %v5475_v2  ;;  %v238_v51 = vld [vmem:[%s7176_s1 + $0x2d8] sm:$0xff] }
 0x15b   :  { %v5059_v46 = vpop.eup %5058  ;;  %v3594_v58 = vmul.f32 -1.442695, %v1955_v54  ;;  %v892_v59 = vadd.f32 %v6536_v61, %v891_v56  ;;  %v4042_v60 = vpop.f32.mrb[67].mxu1  ;;  %4200 = vmatmul.mubr.msk.f32.gmra.mrb[172].mxu1 %vm280_vm2, %v233_v53  ;;  %v112_v55 = vld [vmem:[%s7175_s0 + $0x2d8] sm:$0xff] }
 0x15c   :  { %v5061_v62 = vpop.eup %5060  ;;  %v2822_v63 = vadd.f32 1.0, %v5059_v46  ;;  %v1959_v0 = vpop.f32.mrb[66].mxu0  ;;  %4202 = vmatprep.mubr.msk.f32.mxu1 %vm5476_vm1, %v5475_v2 }
 0x15d   :  { %3194 = vst [vmem:[#allocation2 + $0xd0] sm:$0xff] %v5061_v62  ;;  %5070 = vpow2.f32 %v3594_v58  ;;  %v1960_v3 = vadd.f32 %v1959_v0, %v892_v59  ;;  %v4419_v4 = vpop.f32.mrb[67].mxu0  ;;  %4577 = vmatmul.mubr.msk.f32.gmra.mrb[172].mxu0 %vm280_vm2, %v107_v57 }
 0x15e   :  { %5072 = vrcp.f32 %v2822_v63  ;;  %v896_v5 = vpop.f32.mrb[68].mxu1  ;;  %4579 = vmatprep.mubr.msk.f32.mxu0 %vm5476_vm1, %v5475_v2  ;;  %v239_v63 = vld [vmem:[%s7176_s1 + $0x2e0] sm:$0xff] }
 0x15f   :  { %v5063_v7 = vpop.eup %5062  ;;  %v3595_v8 = vmul.f32 -1.442695, %v1960_v3  ;;  %v897_v9 = vadd.f32 %v6536_v61, %v896_v5  ;;  %v4045_v10 = vpop.f32.mrb[69].mxu1  ;;  %4203 = vmatmul.mubr.msk.f32.gmra.mrb[174].mxu1 %vm280_vm2, %v234_v1  ;;  %v113_v4 = vld [vmem:[%s7175_s0 + $0x2e0] sm:$0xff] }
 0x160   :  { %v5065_v11 = vpop.eup %5064  ;;  %v2823_v12 = vadd.f32 1.0, %v5063_v7  ;;  %v1964_v13 = vpop.f32.mrb[68].mxu0  ;;  %4205 = vmatprep.mubr.msk.f32.mxu1 %vm5476_vm1, %v5475_v2 }
 0x161   :  { %3195 = vst [vmem:[#allocation2 + $0xd8] sm:$0xff] %v5065_v11  ;;  %5074 = vpow2.f32 %v3595_v8  ;;  %v1965_v15 = vadd.f32 %v1964_v13, %v897_v9  ;;  %v4422_v16 = vpop.f32.mrb[69].mxu0  ;;  %4580 = vmatmul.mubr.msk.f32.gmra.mrb[174].mxu0 %vm280_vm2, %v108_v6 }
 0x162   :  { %5076 = vrcp.f32 %v2823_v12  ;;  %v901_v17 = vpop.f32.mrb[70].mxu1  ;;  %4582 = vmatprep.mubr.msk.f32.mxu0 %vm5476_vm1, %v5475_v2  ;;  %v240_v12 = vld [vmem:[%s7176_s1 + $0x2e8] sm:$0xff] }
 0x163   :  { %v5067_v19 = vpop.eup %5066  ;;  %v3596_v20 = vmul.f32 -1.442695, %v1965_v15  ;;  %v902_v21 = vadd.f32 %v6536_v61, %v901_v17  ;;  %v4048_v22 = vpop.f32.mrb[71].mxu1  ;;  %4206 = vmatmul.mubr.msk.f32.gmra.mrb[176].mxu1 %vm280_vm2, %v235_v14  ;;  %v114_v16 = vld [vmem:[%s7175_s0 + $0x2e8] sm:$0xff] }
 0x164   :  { %v5069_v23 = vpop.eup %5068  ;;  %v2824_v24 = vadd.f32 1.0, %v5067_v19  ;;  %v1969_v25 = vpop.f32.mrb[70].mxu0  ;;  %4208 = vmatprep.mubr.msk.f32.mxu1 %vm5476_vm1, %v5475_v2 }
 0x165   :  { %3196 = vst [vmem:[#allocation2 + $0xe0] sm:$0xff] %v5069_v23  ;;  %5078 = vpow2.f32 %v3596_v20  ;;  %v1970_v27 = vadd.f32 %v1969_v25, %v902_v21  ;;  %v4425_v28 = vpop.f32.mrb[71].mxu0  ;;  %4583 = vmatmul.mubr.msk.f32.gmra.mrb[176].mxu0 %vm280_vm2, %v109_v18 }
 0x166   :  { %5080 = vrcp.f32 %v2824_v24  ;;  %v906_v29 = vpop.f32.mrb[72].mxu1  ;;  %4585 = vmatprep.mubr.msk.f32.mxu0 %vm5476_vm1, %v5475_v2  ;;  %v241_v24 = vld [vmem:[%s7176_s1 + $0x2f0] sm:$0xff] }
 0x167   :  { %v5071_v31 = vpop.eup %5070  ;;  %v3597_v32 = vmul.f32 -1.442695, %v1970_v27  ;;  %v907_v33 = vadd.f32 %v6536_v61, %v906_v29  ;;  %v4051_v34 = vpop.f32.mrb[73].mxu1  ;;  %4209 = vmatmul.mubr.msk.f32.gmra.mrb[178].mxu1 %vm280_vm2, %v236_v26  ;;  %v115_v28 = vld [vmem:[%s7175_s0 + $0x2f0] sm:$0xff] }
 0x168   :  { %v5073_v35 = vpop.eup %5072  ;;  %v2825_v36 = vadd.f32 1.0, %v5071_v31  ;;  %v1974_v37 = vpop.f32.mrb[72].mxu0  ;;  %4211 = vmatprep.mubr.msk.f32.mxu1 %vm5476_vm1, %v5475_v2 }
 0x169   :  { %3197 = vst [vmem:[#allocation2 + $0xe8] sm:$0xff] %v5073_v35  ;;  %5082 = vpow2.f32 %v3597_v32  ;;  %v1975_v39 = vadd.f32 %v1974_v37, %v907_v33  ;;  %v4428_v40 = vpop.f32.mrb[73].mxu0  ;;  %4586 = vmatmul.mubr.msk.f32.gmra.mrb[178].mxu0 %vm280_vm2, %v110_v30 }
 0x16a   :  { %5084 = vrcp.f32 %v2825_v36  ;;  %v911_v41 = vpop.f32.mrb[74].mxu1  ;;  %4588 = vmatprep.mubr.msk.f32.mxu0 %vm5476_vm1, %v5475_v2  ;;  %v242_v36 = vld [vmem:[%s7176_s1 + $0x2f8] sm:$0xff] }
 0x16b   :  { %v5075_v43 = vpop.eup %5074  ;;  %v3598_v44 = vmul.f32 -1.442695, %v1975_v39  ;;  %v912_v45 = vadd.f32 %v6536_v61, %v911_v41  ;;  %v4054_v47 = vpop.f32.mrb[75].mxu1  ;;  %4212 = vmatmul.mubr.msk.f32.gmra.mrb[180].mxu1 %vm280_vm2, %v237_v38  ;;  %v116_v40 = vld [vmem:[%s7175_s0 + $0x2f8] sm:$0xff] }
 0x16c   :  { %v5077_v48 = vpop.eup %5076  ;;  %v2826_v49 = vadd.f32 1.0, %v5075_v43  ;;  %v1979_v50 = vpop.f32.mrb[74].mxu0  ;;  %4214 = vmatprep.mubr.msk.f32.mxu1 %vm5476_vm1, %v5475_v2 }
 0x16d   :  { %3198 = vst [vmem:[#allocation2 + $0xf0] sm:$0xff] %v5077_v48  ;;  %5086 = vpow2.f32 %v3598_v44  ;;  %v1980_v52 = vadd.f32 %v1979_v50, %v912_v45  ;;  %v4431_v53 = vpop.f32.mrb[75].mxu0  ;;  %4589 = vmatmul.mubr.msk.f32.gmra.mrb[180].mxu0 %vm280_vm2, %v111_v42 }
 0x16e   :  { %5088 = vrcp.f32 %v2826_v49  ;;  %v916_v54 = vpop.f32.mrb[76].mxu1  ;;  %4591 = vmatprep.mubr.msk.f32.mxu0 %vm5476_vm1, %v5475_v2  ;;  %v243_v49 = vld [vmem:[%s7176_s1 + $0x300] sm:$0xff] }
 0x16f   :  { %v5079_v56 = vpop.eup %5078  ;;  %v3599_v57 = vmul.f32 -1.442695, %v1980_v52  ;;  %v917_v46 = vadd.f32 %v6536_v61, %v916_v54  ;;  %v4057_v58 = vpop.f32.mrb[77].mxu1  ;;  %4215 = vmatmul.mubr.msk.f32.gmra.mrb[182].mxu1 %vm280_vm2, %v238_v51  ;;  %v117_v53 = vld [vmem:[%s7175_s0 + $0x300] sm:$0xff] }
 0x170   :  { %v5081_v59 = vpop.eup %5080  ;;  %v2827_v60 = vadd.f32 1.0, %v5079_v56  ;;  %v1984_v62 = vpop.f32.mrb[76].mxu0  ;;  %4217 = vmatprep.mubr.msk.f32.mxu1 %vm5476_vm1, %v5475_v2 }
 0x171   :  { %3199 = vst [vmem:[#allocation2 + $0xf8] sm:$0xff] %v5081_v59  ;;  %5090 = vpow2.f32 %v3599_v57  ;;  %v1985_v0 = vadd.f32 %v1984_v62, %v917_v46  ;;  %v4434_v1 = vpop.f32.mrb[77].mxu0  ;;  %4592 = vmatmul.mubr.msk.f32.gmra.mrb[182].mxu0 %vm280_vm2, %v112_v55 }
 0x172   :  { %5092 = vrcp.f32 %v2827_v60  ;;  %v921_v3 = vpop.f32.mrb[78].mxu1  ;;  %4594 = vmatprep.mubr.msk.f32.mxu0 %vm5476_vm1, %v5475_v2  ;;  %v244_v60 = vld [vmem:[%s7176_s1 + $0x308] sm:$0xff] }
 0x173   :  { %v5083_v5 = vpop.eup %5082  ;;  %v3600_v6 = vmul.f32 -1.442695, %v1985_v0  ;;  %v922_v7 = vadd.f32 %v6536_v61, %v921_v3  ;;  %v4060_v8 = vpop.f32.mrb[79].mxu1  ;;  %4218 = vmatmul.mubr.msk.f32.gmra.mrb[184].mxu1 %vm280_vm2, %v239_v63  ;;  %v118_v1 = vld [vmem:[%s7175_s0 + $0x308] sm:$0xff] }
 0x174   :  { %v5085_v9 = vpop.eup %5084  ;;  %v2828_v10 = vadd.f32 1.0, %v5083_v5  ;;  %v1989_v11 = vpop.f32.mrb[78].mxu0  ;;  %4220 = vmatprep.mubr.msk.f32.mxu1 %vm5476_vm1, %v5475_v2 }
 0x175   :  { %3200 = vst [vmem:[#allocation2 + $0x100] sm:$0xff] %v5085_v9  ;;  %5094 = vpow2.f32 %v3600_v6  ;;  %v1990_v13 = vadd.f32 %v1989_v11, %v922_v7  ;;  %v4437_v14 = vpop.f32.mrb[79].mxu0  ;;  %4595 = vmatmul.mubr.msk.f32.gmra.mrb[184].mxu0 %vm280_vm2, %v113_v4 }
 0x176   :  { %5096 = vrcp.f32 %v2828_v10  ;;  %v926_v15 = vpop.f32.mrb[80].mxu1  ;;  %4597 = vmatprep.mubr.msk.f32.mxu0 %vm5476_vm1, %v5475_v2  ;;  %v245_v10 = vld [vmem:[%s7176_s1 + $0x310] sm:$0xff] }
 0x177   :  { %v5087_v17 = vpop.eup %5086  ;;  %v3601_v18 = vmul.f32 -1.442695, %v1990_v13  ;;  %v927_v19 = vadd.f32 %v6536_v61, %v926_v15  ;;  %v4063_v20 = vpop.f32.mrb[81].mxu1  ;;  %4221 = vmatmul.mubr.msk.f32.gmra.mrb[186].mxu1 %vm280_vm2, %v240_v12  ;;  %v119_v14 = vld [vmem:[%s7175_s0 + $0x310] sm:$0xff] }
 0x178   :  { %v5089_v21 = vpop.eup %5088  ;;  %v2829_v22 = vadd.f32 1.0, %v5087_v17  ;;  %v1994_v23 = vpop.f32.mrb[80].mxu0  ;;  %4223 = vmatprep.mubr.msk.f32.mxu1 %vm5476_vm1, %v5475_v2 }
 0x179   :  { %3201 = vst [vmem:[#allocation2 + $0x108] sm:$0xff] %v5089_v21  ;;  %5098 = vpow2.f32 %v3601_v18  ;;  %v1995_v25 = vadd.f32 %v1994_v23, %v927_v19  ;;  %v4440_v26 = vpop.f32.mrb[81].mxu0  ;;  %4598 = vmatmul.mubr.msk.f32.gmra.mrb[186].mxu0 %vm280_vm2, %v114_v16 }
 0x17a   :  { %5100 = vrcp.f32 %v2829_v22  ;;  %v931_v27 = vpop.f32.mrb[82].mxu1  ;;  %4600 = vmatprep.mubr.msk.f32.mxu0 %vm5476_vm1, %v5475_v2  ;;  %v246_v22 = vld [vmem:[%s7176_s1 + $0x318] sm:$0xff] }
 0x17b   :  { %v5091_v29 = vpop.eup %5090  ;;  %v3602_v30 = vmul.f32 -1.442695, %v1995_v25  ;;  %v932_v31 = vadd.f32 %v6536_v61, %v931_v27  ;;  %v4066_v32 = vpop.f32.mrb[83].mxu1  ;;  %4224 = vmatmul.mubr.msk.f32.gmra.mrb[188].mxu1 %vm280_vm2, %v241_v24  ;;  %v120_v26 = vld [vmem:[%s7175_s0 + $0x318] sm:$0xff] }
 0x17c   :  { %v5093_v33 = vpop.eup %5092  ;;  %v2830_v34 = vadd.f32 1.0, %v5091_v29  ;;  %v1999_v35 = vpop.f32.mrb[82].mxu0  ;;  %4226 = vmatprep.mubr.msk.f32.mxu1 %vm5476_vm1, %v5475_v2 }
 0x17d   :  { %3202 = vst [vmem:[#allocation2 + $0x110] sm:$0xff] %v5093_v33  ;;  %5102 = vpow2.f32 %v3602_v30  ;;  %v2000_v37 = vadd.f32 %v1999_v35, %v932_v31  ;;  %v4443_v38 = vpop.f32.mrb[83].mxu0  ;;  %4601 = vmatmul.mubr.msk.f32.gmra.mrb[188].mxu0 %vm280_vm2, %v115_v28 }
 0x17e   :  { %5104 = vrcp.f32 %v2830_v34  ;;  %v936_v39 = vpop.f32.mrb[84].mxu1  ;;  %4603 = vmatprep.mubr.msk.f32.mxu0 %vm5476_vm1, %v5475_v2  ;;  %v247_v34 = vld [vmem:[%s7176_s1 + $0x320] sm:$0xff] }
 0x17f   :  { %v5095_v41 = vpop.eup %5094  ;;  %v3603_v42 = vmul.f32 -1.442695, %v2000_v37  ;;  %v937_v43 = vadd.f32 %v6536_v61, %v936_v39  ;;  %v4069_v44 = vpop.f32.mrb[85].mxu1  ;;  %4227 = vmatmul.mubr.msk.f32.gmra.mrb[190].mxu1 %vm280_vm2, %v242_v36  ;;  %v121_v38 = vld [vmem:[%s7175_s0 + $0x320] sm:$0xff] }
 0x180   :  { %v5097_v45 = vpop.eup %5096  ;;  %v2831_v47 = vadd.f32 1.0, %v5095_v41  ;;  %v2004_v48 = vpop.f32.mrb[84].mxu0  ;;  %4229 = vmatprep.mubr.msk.f32.mxu1 %vm5476_vm1, %v5475_v2 }
 0x181   :  { %3203 = vst [vmem:[#allocation2 + $0x118] sm:$0xff] %v5097_v45  ;;  %5106 = vpow2.f32 %v3603_v42  ;;  %v2005_v50 = vadd.f32 %v2004_v48, %v937_v43  ;;  %v4446_v51 = vpop.f32.mrb[85].mxu0  ;;  %4604 = vmatmul.mubr.msk.f32.gmra.mrb[190].mxu0 %vm280_vm2, %v116_v40 }
 0x182   :  { %5108 = vrcp.f32 %v2831_v47  ;;  %v941_v52 = vpop.f32.mrb[86].mxu1  ;;  %4606 = vmatprep.mubr.msk.f32.mxu0 %vm5476_vm1, %v5475_v2  ;;  %v248_v47 = vld [vmem:[%s7176_s1 + $0x328] sm:$0xff] }
 0x183   :  { %v5099_v54 = vpop.eup %5098  ;;  %v3604_v55 = vmul.f32 -1.442695, %v2005_v50  ;;  %v942_v56 = vadd.f32 %v6536_v61, %v941_v52  ;;  %v4072_v57 = vpop.f32.mrb[87].mxu1  ;;  %4230 = vmatmul.mubr.msk.f32.gmra.mrb[192].mxu1 %vm280_vm2, %v243_v49  ;;  %v122_v51 = vld [vmem:[%s7175_s0 + $0x328] sm:$0xff] }
 0x184   :  { %v5101_v46 = vpop.eup %5100  ;;  %v2832_v58 = vadd.f32 1.0, %v5099_v54  ;;  %v2009_v59 = vpop.f32.mrb[86].mxu0  ;;  %4232 = vmatprep.mubr.msk.f32.mxu1 %vm5476_vm1, %v5475_v2 }
 0x185   :  { %3204 = vst [vmem:[#allocation2 + $0x120] sm:$0xff] %v5101_v46  ;;  %5110 = vpow2.f32 %v3604_v55  ;;  %v2010_v62 = vadd.f32 %v2009_v59, %v942_v56  ;;  %v4449_v63 = vpop.f32.mrb[87].mxu0  ;;  %4607 = vmatmul.mubr.msk.f32.gmra.mrb[192].mxu0 %vm280_vm2, %v117_v53 }
 0x186   :  { %5112 = vrcp.f32 %v2832_v58  ;;  %v946_v0 = vpop.f32.mrb[88].mxu1  ;;  %4609 = vmatprep.mubr.msk.f32.mxu0 %vm5476_vm1, %v5475_v2  ;;  %v249_v58 = vld [vmem:[%s7176_s1 + $0x330] sm:$0xff] }
 0x187   :  { %v5103_v3 = vpop.eup %5102  ;;  %v3605_v4 = vmul.f32 -1.442695, %v2010_v62  ;;  %v947_v5 = vadd.f32 %v6536_v61, %v946_v0  ;;  %v4075_v6 = vpop.f32.mrb[89].mxu1  ;;  %4233 = vmatmul.mubr.msk.f32.gmra.mrb[194].mxu1 %vm280_vm2, %v244_v60  ;;  %v123_v63 = vld [vmem:[%s7175_s0 + $0x330] sm:$0xff] }
 0x188   :  { %v5105_v7 = vpop.eup %5104  ;;  %v2833_v8 = vadd.f32 1.0, %v5103_v3  ;;  %v2014_v9 = vpop.f32.mrb[88].mxu0  ;;  %4235 = vmatprep.mubr.msk.f32.mxu1 %vm5476_vm1, %v5475_v2 }
 0x189   :  { %3205 = vst [vmem:[#allocation2 + $0x128] sm:$0xff] %v5105_v7  ;;  %5114 = vpow2.f32 %v3605_v4  ;;  %v2015_v11 = vadd.f32 %v2014_v9, %v947_v5  ;;  %v4452_v12 = vpop.f32.mrb[89].mxu0  ;;  %4610 = vmatmul.mubr.msk.f32.gmra.mrb[194].mxu0 %vm280_vm2, %v118_v1 }
 0x18a   :  { %5116 = vrcp.f32 %v2833_v8  ;;  %v951_v13 = vpop.f32.mrb[90].mxu1  ;;  %4612 = vmatprep.mubr.msk.f32.mxu0 %vm5476_vm1, %v5475_v2  ;;  %v250_v8 = vld [vmem:[%s7176_s1 + $0x338] sm:$0xff] }
 0x18b   :  { %v5107_v15 = vpop.eup %5106  ;;  %v3606_v16 = vmul.f32 -1.442695, %v2015_v11  ;;  %v952_v17 = vadd.f32 %v6536_v61, %v951_v13  ;;  %v4078_v18 = vpop.f32.mrb[91].mxu1  ;;  %4236 = vmatmul.mubr.msk.f32.gmra.mrb[196].mxu1 %vm280_vm2, %v245_v10  ;;  %v124_v12 = vld [vmem:[%s7175_s0 + $0x338] sm:$0xff] }
 0x18c   :  { %v5109_v19 = vpop.eup %5108  ;;  %v2834_v20 = vadd.f32 1.0, %v5107_v15  ;;  %v2019_v21 = vpop.f32.mrb[90].mxu0  ;;  %4238 = vmatprep.mubr.msk.f32.mxu1 %vm5476_vm1, %v5475_v2 }
 0x18d   :  { %3206 = vst [vmem:[#allocation2 + $0x130] sm:$0xff] %v5109_v19  ;;  %5118 = vpow2.f32 %v3606_v16  ;;  %v2020_v23 = vadd.f32 %v2019_v21, %v952_v17  ;;  %v4455_v24 = vpop.f32.mrb[91].mxu0  ;;  %4613 = vmatmul.mubr.msk.f32.gmra.mrb[196].mxu0 %vm280_vm2, %v119_v14 }
 0x18e   :  { %5120 = vrcp.f32 %v2834_v20  ;;  %v956_v25 = vpop.f32.mrb[92].mxu1  ;;  %4615 = vmatprep.mubr.msk.f32.mxu0 %vm5476_vm1, %v5475_v2  ;;  %v251_v20 = vld [vmem:[%s7176_s1 + $0x340] sm:$0xff] }
 0x18f   :  { %v5111_v27 = vpop.eup %5110  ;;  %v3607_v28 = vmul.f32 -1.442695, %v2020_v23  ;;  %v957_v29 = vadd.f32 %v6536_v61, %v956_v25  ;;  %v4081_v30 = vpop.f32.mrb[93].mxu1  ;;  %4239 = vmatmul.mubr.msk.f32.gmra.mrb[198].mxu1 %vm280_vm2, %v246_v22  ;;  %v125_v24 = vld [vmem:[%s7175_s0 + $0x340] sm:$0xff] }
 0x190   :  { %v5113_v31 = vpop.eup %5112  ;;  %v2835_v32 = vadd.f32 1.0, %v5111_v27  ;;  %v2024_v33 = vpop.f32.mrb[92].mxu0  ;;  %4241 = vmatprep.mubr.msk.f32.mxu1 %vm5476_vm1, %v5475_v2 }
 0x191   :  { %3207 = vst [vmem:[#allocation2 + $0x138] sm:$0xff] %v5113_v31  ;;  %5122 = vpow2.f32 %v3607_v28  ;;  %v2025_v35 = vadd.f32 %v2024_v33, %v957_v29  ;;  %v4458_v36 = vpop.f32.mrb[93].mxu0  ;;  %4616 = vmatmul.mubr.msk.f32.gmra.mrb[198].mxu0 %vm280_vm2, %v120_v26 }
 0x192   :  { %5124 = vrcp.f32 %v2835_v32  ;;  %v961_v37 = vpop.f32.mrb[94].mxu1  ;;  %4618 = vmatprep.mubr.msk.f32.mxu0 %vm5476_vm1, %v5475_v2  ;;  %v252_v32 = vld [vmem:[%s7176_s1 + $0x348] sm:$0xff] }
 0x193   :  { %v5115_v39 = vpop.eup %5114  ;;  %v3608_v40 = vmul.f32 -1.442695, %v2025_v35  ;;  %v962_v41 = vadd.f32 %v6536_v61, %v961_v37  ;;  %v4084_v42 = vpop.f32.mrb[95].mxu1  ;;  %4242 = vmatmul.mubr.msk.f32.gmra.mrb[200].mxu1 %vm280_vm2, %v247_v34  ;;  %v126_v36 = vld [vmem:[%s7175_s0 + $0x348] sm:$0xff] }
 0x194   :  { %v5117_v43 = vpop.eup %5116  ;;  %v2836_v44 = vadd.f32 1.0, %v5115_v39  ;;  %v2029_v45 = vpop.f32.mrb[94].mxu0  ;;  %4244 = vmatprep.mubr.msk.f32.mxu1 %vm5476_vm1, %v5475_v2 }
 0x195   :  { %3208 = vst [vmem:[#allocation2 + $0x140] sm:$0xff] %v5117_v43  ;;  %5126 = vpow2.f32 %v3608_v40  ;;  %v2030_v48 = vadd.f32 %v2029_v45, %v962_v41  ;;  %v4461_v49 = vpop.f32.mrb[95].mxu0  ;;  %4619 = vmatmul.mubr.msk.f32.gmra.mrb[200].mxu0 %vm280_vm2, %v121_v38 }
 0x196   :  { %5128 = vrcp.f32 %v2836_v44  ;;  %v966_v50 = vpop.f32.mrb[96].mxu1  ;;  %4621 = vmatprep.mubr.msk.f32.mxu0 %vm5476_vm1, %v5475_v2  ;;  %v253_v44 = vld [vmem:[%s7176_s1 + $0x350] sm:$0xff] }
 0x197   :  { %v5119_v52 = vpop.eup %5118  ;;  %v3609_v53 = vmul.f32 -1.442695, %v2030_v48  ;;  %v967_v54 = vadd.f32 %v6536_v61, %v966_v50  ;;  %v4087_v55 = vpop.f32.mrb[97].mxu1  ;;  %4245 = vmatmul.mubr.msk.f32.gmra.mrb[202].mxu1 %vm280_vm2, %v248_v47  ;;  %v127_v49 = vld [vmem:[%s7175_s0 + $0x350] sm:$0xff] }
 0x198   :  { %v5121_v56 = vpop.eup %5120  ;;  %v2837_v57 = vadd.f32 1.0, %v5119_v52  ;;  %v2034_v46 = vpop.f32.mrb[96].mxu0  ;;  %4247 = vmatprep.mubr.msk.f32.mxu1 %vm5476_vm1, %v5475_v2 }
 0x199   :  { %3209 = vst [vmem:[#allocation2 + $0x148] sm:$0xff] %v5121_v56  ;;  %5130 = vpow2.f32 %v3609_v53  ;;  %v2035_v59 = vadd.f32 %v2034_v46, %v967_v54  ;;  %v4464_v60 = vpop.f32.mrb[97].mxu0  ;;  %4622 = vmatmul.mubr.msk.f32.gmra.mrb[202].mxu0 %vm280_vm2, %v122_v51 }
 0x19a   :  { %5132 = vrcp.f32 %v2837_v57  ;;  %v971_v62 = vpop.f32.mrb[98].mxu1  ;;  %4624 = vmatprep.mubr.msk.f32.mxu0 %vm5476_vm1, %v5475_v2  ;;  %v254_v57 = vld [vmem:[%s7176_s1 + $0x358] sm:$0xff] }
 0x19b   :  { %v5123_v0 = vpop.eup %5122  ;;  %v3610_v1 = vmul.f32 -1.442695, %v2035_v59  ;;  %v972_v3 = vadd.f32 %v6536_v61, %v971_v62  ;;  %v4090_v4 = vpop.f32.mrb[99].mxu1  ;;  %4248 = vmatmul.mubr.msk.f32.gmra.mrb[204].mxu1 %vm280_vm2, %v249_v58  ;;  %v128_v60 = vld [vmem:[%s7175_s0 + $0x358] sm:$0xff] }
 0x19c   :  { %v5125_v5 = vpop.eup %5124  ;;  %v2838_v6 = vadd.f32 1.0, %v5123_v0  ;;  %v2039_v7 = vpop.f32.mrb[98].mxu0  ;;  %4250 = vmatprep.mubr.msk.f32.mxu1 %vm5476_vm1, %v5475_v2 }
 0x19d   :  { %3210 = vst [vmem:[#allocation2 + $0x150] sm:$0xff] %v5125_v5  ;;  %5134 = vpow2.f32 %v3610_v1  ;;  %v2040_v9 = vadd.f32 %v2039_v7, %v972_v3  ;;  %v4467_v10 = vpop.f32.mrb[99].mxu0  ;;  %4625 = vmatmul.mubr.msk.f32.gmra.mrb[204].mxu0 %vm280_vm2, %v123_v63 }
 0x19e   :  { %5136 = vrcp.f32 %v2838_v6  ;;  %v976_v11 = vpop.f32.mrb[100].mxu1  ;;  %4627 = vmatprep.mubr.msk.f32.mxu0 %vm5476_vm1, %v5475_v2  ;;  %v255_v6 = vld [vmem:[%s7176_s1 + $0x360] sm:$0xff] }
 0x19f   :  { %v5127_v13 = vpop.eup %5126  ;;  %v3611_v14 = vmul.f32 -1.442695, %v2040_v9  ;;  %v977_v15 = vadd.f32 %v6536_v61, %v976_v11  ;;  %v4093_v16 = vpop.f32.mrb[101].mxu1  ;;  %4251 = vmatmul.mubr.msk.f32.gmra.mrb[206].mxu1 %vm280_vm2, %v250_v8  ;;  %v129_v9 = vld [vmem:[%s7175_s0 + $0x360] sm:$0xff] }
 0x1a0   :  { %v5129_v17 = vpop.eup %5128  ;;  %v2839_v18 = vadd.f32 1.0, %v5127_v13  ;;  %v2044_v19 = vpop.f32.mrb[100].mxu0  ;;  %4253 = vmatprep.mubr.msk.f32.mxu1 %vm5476_vm1, %v5475_v2 }
 0x1a1   :  { %3211 = vst [vmem:[#allocation2 + $0x158] sm:$0xff] %v5129_v17  ;;  %5138 = vpow2.f32 %v3611_v14  ;;  %v2045_v21 = vadd.f32 %v2044_v19, %v977_v15  ;;  %v4470_v22 = vpop.f32.mrb[101].mxu0  ;;  %4628 = vmatmul.mubr.msk.f32.gmra.mrb[206].mxu0 %vm280_vm2, %v124_v12  ;;  %v6892_v12 = vld [vmem:[%s7179_s4] ss:$0 sm:$0xff] }
 0x1a2   :  { %5140 = vrcp.f32 %v2839_v18  ;;  %v981_v23 = vpop.f32.mrb[102].mxu1  ;;  %4630 = vmatprep.mubr.msk.f32.mxu0 %vm5476_vm1, %v5475_v2  ;;  %v256_v18 = vld [vmem:[%s7176_s1 + $0x368] sm:$0xff] }
 0x1a3   :  { %v5131_v25 = vpop.eup %5130  ;;  %v3612_v26 = vmul.f32 -1.442695, %v2045_v21  ;;  %v982_v27 = vadd.f32 %v6536_v61, %v981_v23  ;;  %v4096_v28 = vpop.f32.mrb[103].mxu1  ;;  %4254 = vmatmul.mubr.msk.f32.gmra.mrb[208].mxu1 %vm280_vm2, %v251_v20  ;;  %v130_v22 = vld [vmem:[%s7175_s0 + $0x368] sm:$0xff] }
 0x1a4   :  { %v5133_v29 = vpop.eup %5132  ;;  %v2840_v30 = vadd.f32 1.0, %v5131_v25  ;;  %v2049_v31 = vpop.f32.mrb[102].mxu0  ;;  %4256 = vmatprep.mubr.msk.f32.mxu1 %vm5476_vm1, %v5475_v2 }
 0x1a5   :  { %3212 = vst [vmem:[#allocation2 + $0x160] sm:$0xff] %v5133_v29  ;;  %5142 = vpow2.f32 %v3612_v26  ;;  %v2050_v33 = vadd.f32 %v2049_v31, %v982_v27  ;;  %v4473_v34 = vpop.f32.mrb[103].mxu0  ;;  %4631 = vmatmul.mubr.msk.f32.gmra.mrb[208].mxu0 %vm280_vm2, %v125_v24 }
 0x1a6   :  { %5144 = vrcp.f32 %v2840_v30  ;;  %v986_v35 = vpop.f32.mrb[104].mxu1  ;;  %4633 = vmatprep.mubr.msk.f32.mxu0 %vm5476_vm1, %v5475_v2  ;;  %v257_v30 = vld [vmem:[%s7176_s1 + $0x370] sm:$0xff] }
 0x1a7   :  { %v5135_v37 = vpop.eup %5134  ;;  %v3613_v38 = vmul.f32 -1.442695, %v2050_v33  ;;  %v987_v39 = vadd.f32 %v6536_v61, %v986_v35  ;;  %v4099_v40 = vpop.f32.mrb[105].mxu1  ;;  %4257 = vmatmul.mubr.msk.f32.gmra.mrb[210].mxu1 %vm280_vm2, %v252_v32  ;;  %v131_v34 = vld [vmem:[%s7175_s0 + $0x370] sm:$0xff] }
 0x1a8   :  { %v5137_v41 = vpop.eup %5136  ;;  %v2841_v42 = vadd.f32 1.0, %v5135_v37  ;;  %v2054_v43 = vpop.f32.mrb[104].mxu0  ;;  %4259 = vmatprep.mubr.msk.f32.mxu1 %vm5476_vm1, %v5475_v2 }
 0x1a9   :  { %3213 = vst [vmem:[#allocation2 + $0x168] sm:$0xff] %v5137_v41  ;;  %5146 = vpow2.f32 %v3613_v38  ;;  %v2055_v45 = vadd.f32 %v2054_v43, %v987_v39  ;;  %v4476_v47 = vpop.f32.mrb[105].mxu0  ;;  %4634 = vmatmul.mubr.msk.f32.gmra.mrb[210].mxu0 %vm280_vm2, %v126_v36 }
 0x1aa   :  { %5148 = vrcp.f32 %v2841_v42  ;;  %v991_v48 = vpop.f32.mrb[106].mxu1  ;;  %4636 = vmatprep.mubr.msk.f32.mxu0 %vm5476_vm1, %v5475_v2  ;;  %v258_v42 = vld [vmem:[%s7176_s1 + $0x378] sm:$0xff] }
 0x1ab   :  { %v5139_v50 = vpop.eup %5138  ;;  %v3614_v51 = vmul.f32 -1.442695, %v2055_v45  ;;  %v992_v52 = vadd.f32 %v6536_v61, %v991_v48  ;;  %v4102_v53 = vpop.f32.mrb[107].mxu1  ;;  %4260 = vmatmul.mubr.msk.f32.gmra.mrb[212].mxu1 %vm280_vm2, %v253_v44  ;;  %v132_v47 = vld [vmem:[%s7175_s0 + $0x378] sm:$0xff] }
 0x1ac   :  { %v5141_v54 = vpop.eup %5140  ;;  %v2842_v55 = vadd.f32 1.0, %v5139_v50  ;;  %v2059_v56 = vpop.f32.mrb[106].mxu0  ;;  %4262 = vmatprep.mubr.msk.f32.mxu1 %vm5476_vm1, %v5475_v2 }
 0x1ad   :  { %3214 = vst [vmem:[#allocation2 + $0x170] sm:$0xff] %v5141_v54  ;;  %5150 = vpow2.f32 %v3614_v51  ;;  %v2060_v46 = vadd.f32 %v2059_v56, %v992_v52  ;;  %v4479_v58 = vpop.f32.mrb[107].mxu0  ;;  %4637 = vmatmul.mubr.msk.f32.gmra.mrb[212].mxu0 %vm280_vm2, %v127_v49 }
 0x1ae   :  { %5152 = vrcp.f32 %v2842_v55  ;;  %v996_v59 = vpop.f32.mrb[108].mxu1  ;;  %4639 = vmatprep.mubr.msk.f32.mxu0 %vm5476_vm1, %v5475_v2  ;;  %v259_v55 = vld [vmem:[%s7176_s1 + $0x380] sm:$0xff] }
 0x1af   :  { %v5143_v62 = vpop.eup %5142  ;;  %v3615_v63 = vmul.f32 -1.442695, %v2060_v46  ;;  %v997_v0 = vadd.f32 %v6536_v61, %v996_v59  ;;  %v4105_v1 = vpop.f32.mrb[109].mxu1  ;;  %4263 = vmatmul.mubr.msk.f32.gmra.mrb[214].mxu1 %vm280_vm2, %v254_v57  ;;  %v133_v58 = vld [vmem:[%s7175_s0 + $0x380] sm:$0xff] }
 0x1b0   :  { %v5145_v3 = vpop.eup %5144  ;;  %v2843_v4 = vadd.f32 1.0, %v5143_v62  ;;  %v2064_v5 = vpop.f32.mrb[108].mxu0  ;;  %4265 = vmatprep.mubr.msk.f32.mxu1 %vm5476_vm1, %v5475_v2 }
 0x1b1   :  { %3215 = vst [vmem:[#allocation2 + $0x178] sm:$0xff] %v5145_v3  ;;  %5154 = vpow2.f32 %v3615_v63  ;;  %v2065_v7 = vadd.f32 %v2064_v5, %v997_v0  ;;  %v4482_v8 = vpop.f32.mrb[109].mxu0  ;;  %4640 = vmatmul.mubr.msk.f32.gmra.mrb[214].mxu0 %vm280_vm2, %v128_v60 }
 0x1b2   :  { %5156 = vrcp.f32 %v2843_v4  ;;  %v1001_v61 = vpop.f32.mrb[110].mxu1  ;;  %4642 = vmatprep.mubr.msk.f32.mxu0 %vm5476_vm1, %v5475_v2  ;;  %v260_v4 = vld [vmem:[%s7176_s1 + $0x388] sm:$0xff] }
 0x1b3   :  { %v5147_v10 = vpop.eup %5146  ;;  %v3616_v11 = vmul.f32 -1.442695, %v2065_v7  ;;  %v1002_v13 = vadd.f32 %v6892_v12, %v1001_v61  ;;  %v4108_v14 = vpop.f32.mrb[111].mxu1  ;;  %4266 = vmatmul.mubr.msk.f32.gmra.mrb[216].mxu1 %vm280_vm2, %v255_v6  ;;  %v134_v8 = vld [vmem:[%s7175_s0 + $0x388] sm:$0xff] }
 0x1b4   :  { %v5149_v15 = vpop.eup %5148  ;;  %v2844_v16 = vadd.f32 1.0, %v5147_v10  ;;  %v2069_v17 = vpop.f32.mrb[110].mxu0  ;;  %4268 = vmatprep.mubr.msk.f32.mxu1 %vm5476_vm1, %v5475_v2 }
 0x1b5   :  { %3216 = vst [vmem:[#allocation2 + $0x180] sm:$0xff] %v5149_v15  ;;  %5158 = vpow2.f32 %v3616_v11  ;;  %v2070_v19 = vadd.f32 %v2069_v17, %v1002_v13  ;;  %v4485_v20 = vpop.f32.mrb[111].mxu0  ;;  %4643 = vmatmul.mubr.msk.f32.gmra.mrb[216].mxu0 %vm280_vm2, %v129_v9 }
 0x1b6   :  { %5160 = vrcp.f32 %v2844_v16  ;;  %v1006_v21 = vpop.f32.mrb[112].mxu1  ;;  %4645 = vmatprep.mubr.msk.f32.mxu0 %vm5476_vm1, %v5475_v2  ;;  %v261_v16 = vld [vmem:[%s7176_s1 + $0x390] sm:$0xff] }
 0x1b7   :  { %v5151_v23 = vpop.eup %5150  ;;  %v3617_v24 = vmul.f32 -1.442695, %v2070_v19  ;;  %v1007_v25 = vadd.f32 %v6892_v12, %v1006_v21  ;;  %v4111_v26 = vpop.f32.mrb[113].mxu1  ;;  %4269 = vmatmul.mubr.msk.f32.gmra.mrb[218].mxu1 %vm280_vm2, %v256_v18  ;;  %v135_v20 = vld [vmem:[%s7175_s0 + $0x390] sm:$0xff] }
 0x1b8   :  { %v5153_v27 = vpop.eup %5152  ;;  %v2845_v28 = vadd.f32 1.0, %v5151_v23  ;;  %v2074_v29 = vpop.f32.mrb[112].mxu0  ;;  %4271 = vmatprep.mubr.msk.f32.mxu1 %vm5476_vm1, %v5475_v2 }
 0x1b9   :  { %3217 = vst [vmem:[#allocation2 + $0x188] sm:$0xff] %v5153_v27  ;;  %5162 = vpow2.f32 %v3617_v24  ;;  %v2075_v31 = vadd.f32 %v2074_v29, %v1007_v25  ;;  %v4488_v32 = vpop.f32.mrb[113].mxu0  ;;  %4646 = vmatmul.mubr.msk.f32.gmra.mrb[218].mxu0 %vm280_vm2, %v130_v22 }
 0x1ba   :  { %5164 = vrcp.f32 %v2845_v28  ;;  %v1011_v33 = vpop.f32.mrb[114].mxu1  ;;  %4648 = vmatprep.mubr.msk.f32.mxu0 %vm5476_vm1, %v5475_v2  ;;  %v262_v28 = vld [vmem:[%s7176_s1 + $0x398] sm:$0xff] }
 0x1bb   :  { %v5155_v35 = vpop.eup %5154  ;;  %v3618_v36 = vmul.f32 -1.442695, %v2075_v31  ;;  %v1012_v37 = vadd.f32 %v6892_v12, %v1011_v33  ;;  %v4114_v38 = vpop.f32.mrb[115].mxu1  ;;  %4272 = vmatmul.mubr.msk.f32.gmra.mrb[220].mxu1 %vm280_vm2, %v257_v30  ;;  %v136_v32 = vld [vmem:[%s7175_s0 + $0x398] sm:$0xff] }
 0x1bc   :  { %v5157_v39 = vpop.eup %5156  ;;  %v2846_v40 = vadd.f32 1.0, %v5155_v35  ;;  %v2079_v41 = vpop.f32.mrb[114].mxu0  ;;  %4274 = vmatprep.mubr.msk.f32.mxu1 %vm5476_vm1, %v5475_v2 }
 0x1bd   :  { %3218 = vst [vmem:[#allocation2 + $0x190] sm:$0xff] %v5157_v39  ;;  %5166 = vpow2.f32 %v3618_v36  ;;  %v2080_v43 = vadd.f32 %v2079_v41, %v1012_v37  ;;  %v4491_v44 = vpop.f32.mrb[115].mxu0  ;;  %4649 = vmatmul.mubr.msk.f32.gmra.mrb[220].mxu0 %vm280_vm2, %v131_v34 }
 0x1be   :  { %5168 = vrcp.f32 %v2846_v40  ;;  %v1016_v45 = vpop.f32.mrb[116].mxu1  ;;  %4651 = vmatprep.mubr.msk.f32.mxu0 %vm5476_vm1, %v5475_v2  ;;  %v263_v40 = vld [vmem:[%s7176_s1 + $0x3a0] sm:$0xff] }
 0x1bf   :  { %v5159_v48 = vpop.eup %5158  ;;  %v3619_v49 = vmul.f32 -1.442695, %v2080_v43  ;;  %v1017_v50 = vadd.f32 %v6892_v12, %v1016_v45  ;;  %v4117_v51 = vpop.f32.mrb[117].mxu1  ;;  %4275 = vmatmul.mubr.msk.f32.gmra.mrb[222].mxu1 %vm280_vm2, %v258_v42  ;;  %v137_v44 = vld [vmem:[%s7175_s0 + $0x3a0] sm:$0xff] }
 0x1c0   :  { %v5161_v52 = vpop.eup %5160  ;;  %v2847_v53 = vadd.f32 1.0, %v5159_v48  ;;  %v2084_v54 = vpop.f32.mrb[116].mxu0  ;;  %4277 = vmatprep.mubr.msk.f32.mxu1 %vm5476_vm1, %v5475_v2 }
 0x1c1   :  { %3219 = vst [vmem:[#allocation2 + $0x198] sm:$0xff] %v5161_v52  ;;  %5170 = vpow2.f32 %v3619_v49  ;;  %v2085_v56 = vadd.f32 %v2084_v54, %v1017_v50  ;;  %v4494_v57 = vpop.f32.mrb[117].mxu0  ;;  %4652 = vmatmul.mubr.msk.f32.gmra.mrb[222].mxu0 %vm280_vm2, %v132_v47 }
 0x1c2   :  { %5172 = vrcp.f32 %v2847_v53  ;;  %v1021_v46 = vpop.f32.mrb[118].mxu1  ;;  %4654 = vmatprep.mubr.msk.f32.mxu0 %vm5476_vm1, %v5475_v2  ;;  %v264_v53 = vld [vmem:[%s7176_s1 + $0x3a8] sm:$0xff] }
 0x1c3   :  { %v5163_v59 = vpop.eup %5162  ;;  %v3620_v60 = vmul.f32 -1.442695, %v2085_v56  ;;  %v1022_v62 = vadd.f32 %v6892_v12, %v1021_v46  ;;  %v4120_v63 = vpop.f32.mrb[119].mxu1  ;;  %4278 = vmatmul.mubr.msk.f32.gmra.mrb[224].mxu1 %vm280_vm2, %v259_v55  ;;  %v138_v57 = vld [vmem:[%s7175_s0 + $0x3a8] sm:$0xff] }
 0x1c4   :  { %v5165_v0 = vpop.eup %5164  ;;  %v2848_v1 = vadd.f32 1.0, %v5163_v59  ;;  %v2089_v3 = vpop.f32.mrb[118].mxu0  ;;  %4280 = vmatprep.mubr.msk.f32.mxu1 %vm5476_vm1, %v5475_v2 }
 0x1c5   :  { %3220 = vst [vmem:[#allocation2 + $0x1a0] sm:$0xff] %v5165_v0  ;;  %5174 = vpow2.f32 %v3620_v60  ;;  %v2090_v5 = vadd.f32 %v2089_v3, %v1022_v62  ;;  %v4497_v6 = vpop.f32.mrb[119].mxu0  ;;  %4655 = vmatmul.mubr.msk.f32.gmra.mrb[224].mxu0 %vm280_vm2, %v133_v58 }
 0x1c6   :  { %5176 = vrcp.f32 %v2848_v1  ;;  %v1026_v7 = vpop.f32.mrb[120].mxu1  ;;  %4657 = vmatprep.mubr.msk.f32.mxu0 %vm5476_vm1, %v5475_v2  ;;  %v265_v1 = vld [vmem:[%s7176_s1 + $0x3b0] sm:$0xff] }
 0x1c7   :  { %v5167_v61 = vpop.eup %5166  ;;  %v3621_v9 = vmul.f32 -1.442695, %v2090_v5  ;;  %v1027_v10 = vadd.f32 %v6892_v12, %v1026_v7  ;;  %v4123_v11 = vpop.f32.mrb[121].mxu1  ;;  %4281 = vmatmul.mubr.msk.f32.gmra.mrb[226].mxu1 %vm280_vm2, %v260_v4  ;;  %v139_v6 = vld [vmem:[%s7175_s0 + $0x3b0] sm:$0xff] }
 0x1c8   :  { %v5169_v13 = vpop.eup %5168  ;;  %v2849_v14 = vadd.f32 1.0, %v5167_v61  ;;  %v2094_v15 = vpop.f32.mrb[120].mxu0  ;;  %4283 = vmatprep.mubr.msk.f32.mxu1 %vm5476_vm1, %v5475_v2 }
 0x1c9   :  { %3221 = vst [vmem:[#allocation2 + $0x1a8] sm:$0xff] %v5169_v13  ;;  %5178 = vpow2.f32 %v3621_v9  ;;  %v2095_v17 = vadd.f32 %v2094_v15, %v1027_v10  ;;  %v4500_v18 = vpop.f32.mrb[121].mxu0  ;;  %4658 = vmatmul.mubr.msk.f32.gmra.mrb[226].mxu0 %vm280_vm2, %v134_v8 }
 0x1ca   :  { %5180 = vrcp.f32 %v2849_v14  ;;  %v1031_v19 = vpop.f32.mrb[122].mxu1  ;;  %4660 = vmatprep.mubr.msk.f32.mxu0 %vm5476_vm1, %v5475_v2  ;;  %v266_v14 = vld [vmem:[%s7176_s1 + $0x3b8] sm:$0xff] }
 0x1cb   :  { %v5171_v21 = vpop.eup %5170  ;;  %v3622_v22 = vmul.f32 -1.442695, %v2095_v17  ;;  %v1032_v23 = vadd.f32 %v6892_v12, %v1031_v19  ;;  %v4126_v24 = vpop.f32.mrb[123].mxu1  ;;  %4284 = vmatmul.mubr.msk.f32.gmra.mrb[228].mxu1 %vm280_vm2, %v261_v16  ;;  %v140_v18 = vld [vmem:[%s7175_s0 + $0x3b8] sm:$0xff] }
 0x1cc   :  { %v5173_v25 = vpop.eup %5172  ;;  %v2850_v26 = vadd.f32 1.0, %v5171_v21  ;;  %v2099_v27 = vpop.f32.mrb[122].mxu0  ;;  %4286 = vmatprep.mubr.msk.f32.mxu1 %vm5476_vm1, %v5475_v2 }
 0x1cd   :  { %3222 = vst [vmem:[#allocation2 + $0x1b0] sm:$0xff] %v5173_v25  ;;  %5182 = vpow2.f32 %v3622_v22  ;;  %v2100_v29 = vadd.f32 %v2099_v27, %v1032_v23  ;;  %v4503_v30 = vpop.f32.mrb[123].mxu0  ;;  %4661 = vmatmul.mubr.msk.f32.gmra.mrb[228].mxu0 %vm280_vm2, %v135_v20 }
 0x1ce   :  { %5184 = vrcp.f32 %v2850_v26  ;;  %v1036_v31 = vpop.f32.mrb[124].mxu1  ;;  %4663 = vmatprep.mubr.msk.f32.mxu0 %vm5476_vm1, %v5475_v2  ;;  %v267_v26 = vld [vmem:[%s7176_s1 + $0x3c0] sm:$0xff] }
 0x1cf   :  { %v5175_v33 = vpop.eup %5174  ;;  %v3623_v34 = vmul.f32 -1.442695, %v2100_v29  ;;  %v1037_v35 = vadd.f32 %v6892_v12, %v1036_v31  ;;  %v4129_v36 = vpop.f32.mrb[125].mxu1  ;;  %4287 = vmatmul.mubr.msk.f32.gmra.mrb[230].mxu1 %vm280_vm2, %v262_v28  ;;  %v141_v30 = vld [vmem:[%s7175_s0 + $0x3c0] sm:$0xff] }
 0x1d0   :  { %v5177_v37 = vpop.eup %5176  ;;  %v2851_v38 = vadd.f32 1.0, %v5175_v33  ;;  %v2104_v39 = vpop.f32.mrb[124].mxu0  ;;  %4289 = vmatprep.mubr.msk.f32.mxu1 %vm5476_vm1, %v5475_v2 }
 0x1d1   :  { %3223 = vst [vmem:[#allocation2 + $0x1b8] sm:$0xff] %v5177_v37  ;;  %5186 = vpow2.f32 %v3623_v34  ;;  %v2105_v41 = vadd.f32 %v2104_v39, %v1037_v35  ;;  %v4506_v42 = vpop.f32.mrb[125].mxu0  ;;  %4664 = vmatmul.mubr.msk.f32.gmra.mrb[230].mxu0 %vm280_vm2, %v136_v32 }
 0x1d2   :  { %5188 = vrcp.f32 %v2851_v38  ;;  %v1041_v43 = vpop.f32.mrb[126].mxu1  ;;  %4666 = vmatprep.mubr.msk.f32.mxu0 %vm5476_vm1, %v5475_v2  ;;  %v268_v38 = vld [vmem:[%s7176_s1 + $0x3c8] sm:$0xff] }
 0x1d3   :  { %v5179_v45 = vpop.eup %5178  ;;  %v3624_v47 = vmul.f32 -1.442695, %v2105_v41  ;;  %v1042_v48 = vadd.f32 %v6892_v12, %v1041_v43  ;;  %v4132_v49 = vpop.f32.mrb[127].mxu1  ;;  %4290 = vmatmul.mubr.msk.f32.gmra.mrb[232].mxu1 %vm280_vm2, %v263_v40  ;;  %v142_v42 = vld [vmem:[%s7175_s0 + $0x3c8] sm:$0xff] }
 0x1d4   :  { %v5181_v50 = vpop.eup %5180  ;;  %v2852_v51 = vadd.f32 1.0, %v5179_v45  ;;  %v2109_v52 = vpop.f32.mrb[126].mxu0  ;;  %4292 = vmatprep.mubr.msk.f32.mxu1 %vm5476_vm1, %v5475_v2 }
 0x1d5   :  { %3224 = vst [vmem:[#allocation2 + $0x1c0] sm:$0xff] %v5181_v50  ;;  %5190 = vpow2.f32 %v3624_v47  ;;  %v2110_v54 = vadd.f32 %v2109_v52, %v1042_v48  ;;  %v4509_v55 = vpop.f32.mrb[127].mxu0  ;;  %4667 = vmatmul.mubr.msk.f32.gmra.mrb[232].mxu0 %vm280_vm2, %v137_v44 }
 0x1d6   :  { %5192 = vrcp.f32 %v2852_v51  ;;  %v1046_v56 = vpop.f32.mrb[128].mxu1  ;;  %4669 = vmatprep.mubr.msk.f32.mxu0 %vm5476_vm1, %v5475_v2  ;;  %v269_v51 = vld [vmem:[%s7176_s1 + $0x3d0] sm:$0xff] }
 0x1d7   :  { %v5183_v46 = vpop.eup %5182  ;;  %v3625_v58 = vmul.f32 -1.442695, %v2110_v54  ;;  %v1047_v59 = vadd.f32 %v6892_v12, %v1046_v56  ;;  %v4135_v60 = vpop.f32.mrb[129].mxu1  ;;  %4293 = vmatmul.mubr.msk.f32.gmra.mrb[234].mxu1 %vm280_vm2, %v264_v53  ;;  %v143_v55 = vld [vmem:[%s7175_s0 + $0x3d0] sm:$0xff] }
 0x1d8   :  { %v5185_v62 = vpop.eup %5184  ;;  %v2853_v63 = vadd.f32 1.0, %v5183_v46  ;;  %v2114_v0 = vpop.f32.mrb[128].mxu0  ;;  %4295 = vmatprep.mubr.msk.f32.mxu1 %vm5476_vm1, %v5475_v2 }
 0x1d9   :  { %3225 = vst [vmem:[#allocation2 + $0x1c8] sm:$0xff] %v5185_v62  ;;  %5194 = vpow2.f32 %v3625_v58  ;;  %v2115_v3 = vadd.f32 %v2114_v0, %v1047_v59  ;;  %v4512_v4 = vpop.f32.mrb[129].mxu0  ;;  %4670 = vmatmul.mubr.msk.f32.gmra.mrb[234].mxu0 %vm280_vm2, %v138_v57 }
 0x1da   :  { %5196 = vrcp.f32 %v2853_v63  ;;  %v1051_v5 = vpop.f32.mrb[130].mxu1  ;;  %4672 = vmatprep.mubr.msk.f32.mxu0 %vm5476_vm1, %v5475_v2  ;;  %v270_v63 = vld [vmem:[%s7176_s1 + $0x3d8] sm:$0xff] }
 0x1db   :  { %v5187_v7 = vpop.eup %5186  ;;  %v3626_v8 = vmul.f32 -1.442695, %v2115_v3  ;;  %v1052_v61 = vadd.f32 %v6892_v12, %v1051_v5  ;;  %v4138_v9 = vpop.f32.mrb[131].mxu1  ;;  %4296 = vmatmul.mubr.msk.f32.gmra.mrb[236].mxu1 %vm280_vm2, %v265_v1  ;;  %v144_v4 = vld [vmem:[%s7175_s0 + $0x3d8] sm:$0xff] }
 0x1dc   :  { %v5189_v10 = vpop.eup %5188  ;;  %v2854_v11 = vadd.f32 1.0, %v5187_v7  ;;  %v2119_v13 = vpop.f32.mrb[130].mxu0  ;;  %4298 = vmatprep.mubr.msk.f32.mxu1 %vm5476_vm1, %v5475_v2 }
 0x1dd   :  { %3226 = vst [vmem:[#allocation2 + $0x1d0] sm:$0xff] %v5189_v10  ;;  %5198 = vpow2.f32 %v3626_v8  ;;  %v2120_v15 = vadd.f32 %v2119_v13, %v1052_v61  ;;  %v4515_v16 = vpop.f32.mrb[131].mxu0  ;;  %4673 = vmatmul.mubr.msk.f32.gmra.mrb[236].mxu0 %vm280_vm2, %v139_v6 }
 0x1de   :  { %5200 = vrcp.f32 %v2854_v11  ;;  %v1056_v17 = vpop.f32.mrb[132].mxu1  ;;  %4675 = vmatprep.mubr.msk.f32.mxu0 %vm5476_vm1, %v5475_v2  ;;  %v271_v11 = vld [vmem:[%s7176_s1 + $0x3e0] sm:$0xff] }
 0x1df   :  { %v5191_v19 = vpop.eup %5190  ;;  %v3627_v20 = vmul.f32 -1.442695, %v2120_v15  ;;  %v1057_v21 = vadd.f32 %v6892_v12, %v1056_v17  ;;  %v4141_v22 = vpop.f32.mrb[133].mxu1  ;;  %4299 = vmatmul.mubr.msk.f32.gmra.mrb[238].mxu1 %vm280_vm2, %v266_v14  ;;  %v145_v16 = vld [vmem:[%s7175_s0 + $0x3e0] sm:$0xff] }
 0x1e0   :  { %v5193_v23 = vpop.eup %5192  ;;  %v2855_v24 = vadd.f32 1.0, %v5191_v19  ;;  %v2124_v25 = vpop.f32.mrb[132].mxu0  ;;  %4301 = vmatprep.mubr.msk.f32.mxu1 %vm5476_vm1, %v5475_v2 }
 0x1e1   :  { %3227 = vst [vmem:[#allocation2 + $0x1d8] sm:$0xff] %v5193_v23  ;;  %5202 = vpow2.f32 %v3627_v20  ;;  %v2125_v27 = vadd.f32 %v2124_v25, %v1057_v21  ;;  %v4518_v28 = vpop.f32.mrb[133].mxu0  ;;  %4676 = vmatmul.mubr.msk.f32.gmra.mrb[238].mxu0 %vm280_vm2, %v140_v18 }
 0x1e2   :  { %5204 = vrcp.f32 %v2855_v24  ;;  %v1061_v29 = vpop.f32.mrb[134].mxu1  ;;  %4678 = vmatprep.mubr.msk.f32.mxu0 %vm5476_vm1, %v5475_v2 }
 0x1e3   :  { %v5195_v31 = vpop.eup %5194  ;;  %v3628_v32 = vmul.f32 -1.442695, %v2125_v27  ;;  %v1062_v33 = vadd.f32 %v6892_v12, %v1061_v29  ;;  %v4144_v34 = vpop.f32.mrb[135].mxu1  ;;  %4302 = vmatmul.mubr.msk.f32.gmra.mrb[240].mxu1 %vm280_vm2, %v267_v26 }
 0x1e4   :  { %v5197_v35 = vpop.eup %5196  ;;  %v2856_v36 = vadd.f32 1.0, %v5195_v31  ;;  %v2129_v37 = vpop.f32.mrb[134].mxu0  ;;  %4304 = vmatprep.mubr.msk.f32.mxu1 %vm5476_vm1, %v5475_v2 }
 0x1e5   :  { %3228 = vst [vmem:[#allocation2 + $0x1e0] sm:$0xff] %v5197_v35  ;;  %5206 = vpow2.f32 %v3628_v32  ;;  %v2130_v39 = vadd.f32 %v2129_v37, %v1062_v33  ;;  %v4521_v40 = vpop.f32.mrb[135].mxu0  ;;  %4679 = vmatmul.mubr.msk.f32.gmra.mrb[240].mxu0 %vm280_vm2, %v141_v30 }
 0x1e6   :  { %5208 = vrcp.f32 %v2856_v36  ;;  %v1066_v41 = vpop.f32.mrb[136].mxu1  ;;  %4681 = vmatprep.mubr.msk.f32.mxu0 %vm5476_vm1, %v5475_v2 }
 0x1e7   :  { %v5199_v43 = vpop.eup %5198  ;;  %v3629_v44 = vmul.f32 -1.442695, %v2130_v39  ;;  %v1067_v45 = vadd.f32 %v6892_v12, %v1066_v41  ;;  %v4147_v47 = vpop.f32.mrb[137].mxu1  ;;  %4305 = vmatmul.mubr.msk.f32.gmra.mrb[242].mxu1 %vm280_vm2, %v268_v38 }
 0x1e8   :  { %v5201_v48 = vpop.eup %5200  ;;  %v2857_v49 = vadd.f32 1.0, %v5199_v43  ;;  %v2134_v50 = vpop.f32.mrb[136].mxu0  ;;  %4307 = vmatprep.mubr.msk.f32.mxu1 %vm5476_vm1, %v5475_v2 }
 0x1e9   :  { %3229 = vst [vmem:[#allocation2 + $0x1e8] sm:$0xff] %v5201_v48  ;;  %5210 = vpow2.f32 %v3629_v44  ;;  %v2135_v52 = vadd.f32 %v2134_v50, %v1067_v45  ;;  %v4524_v53 = vpop.f32.mrb[137].mxu0  ;;  %4682 = vmatmul.mubr.msk.f32.gmra.mrb[242].mxu0 %vm280_vm2, %v142_v42 }
 0x1ea   :  { %5212 = vrcp.f32 %v2857_v49  ;;  %v1071_v54 = vpop.f32.mrb[138].mxu1  ;;  %4684 = vmatprep.mubr.msk.f32.mxu0 %vm5476_vm1, %v5475_v2 }
 0x1eb   :  { %v5203_v56 = vpop.eup %5202  ;;  %v3630_v57 = vmul.f32 -1.442695, %v2135_v52  ;;  %v1072_v46 = vadd.f32 %v6892_v12, %v1071_v54  ;;  %v4150_v58 = vpop.f32.mrb[139].mxu1  ;;  %4308 = vmatmul.mubr.msk.f32.gmra.mrb[244].mxu1 %vm280_vm2, %v269_v51 }
 0x1ec   :  { %v5205_v59 = vpop.eup %5204  ;;  %v2858_v60 = vadd.f32 1.0, %v5203_v56  ;;  %v2139_v62 = vpop.f32.mrb[138].mxu0  ;;  %4310 = vmatprep.mubr.msk.f32.mxu1 %vm5476_vm1, %v5475_v2 }
 0x1ed   :  { %3230 = vst [vmem:[#allocation2 + $0x1f0] sm:$0xff] %v5205_v59  ;;  %5214 = vpow2.f32 %v3630_v57  ;;  %v2140_v0 = vadd.f32 %v2139_v62, %v1072_v46  ;;  %v4527_v1 = vpop.f32.mrb[139].mxu0  ;;  %4685 = vmatmul.mubr.msk.f32.gmra.mrb[244].mxu0 %vm280_vm2, %v143_v55 }
 0x1ee   :  { %5216 = vrcp.f32 %v2858_v60  ;;  %v1076_v3 = vpop.f32.mrb[140].mxu1  ;;  %4687 = vmatprep.mubr.msk.f32.mxu0 %vm5476_vm1, %v5475_v2 }
 0x1ef   :  { %v5207_v5 = vpop.eup %5206  ;;  %v3631_v6 = vmul.f32 -1.442695, %v2140_v0  ;;  %v1077_v7 = vadd.f32 %v6892_v12, %v1076_v3  ;;  %v4153_v8 = vpop.f32.mrb[141].mxu1  ;;  %4311 = vmatmul.mubr.msk.f32.gmra.mrb[246].mxu1 %vm280_vm2, %v270_v63 }
 0x1f0   :  { %v5209_v61 = vpop.eup %5208  ;;  %v2859_v9 = vadd.f32 1.0, %v5207_v5  ;;  %v2144_v10 = vpop.f32.mrb[140].mxu0  ;;  %4313 = vmatprep.mubr.msk.f32.mxu1 %vm5476_vm1, %v5475_v2 }
 0x1f1   :  { %3231 = vst [vmem:[#allocation2 + $0x1f8] sm:$0xff] %v5209_v61  ;;  %5218 = vpow2.f32 %v3631_v6  ;;  %v2145_v13 = vadd.f32 %v2144_v10, %v1077_v7  ;;  %v4530_v14 = vpop.f32.mrb[141].mxu0  ;;  %4688 = vmatmul.mubr.msk.f32.gmra.mrb[246].mxu0 %vm280_vm2, %v144_v4 }
 0x1f2   :  { %5220 = vrcp.f32 %v2859_v9  ;;  %v1081_v15 = vpop.f32.mrb[142].mxu1  ;;  %4690 = vmatprep.mubr.msk.f32.mxu0 %vm5476_vm1, %v5475_v2 }
 0x1f3   :  { %v5211_v17 = vpop.eup %5210  ;;  %v3632_v18 = vmul.f32 -1.442695, %v2145_v13  ;;  %v1082_v19 = vadd.f32 %v6892_v12, %v1081_v15  ;;  %v4156_v20 = vpop.f32.mrb[143].mxu1  ;;  %4314 = vmatmul.mubr.msk.f32.gmra.mrb[248].mxu1 %vm280_vm2, %v271_v11 }
 0x1f4   :  { %v5213_v21 = vpop.eup %5212  ;;  %v2860_v22 = vadd.f32 1.0, %v5211_v17  ;;  %v2149_v23 = vpop.f32.mrb[142].mxu0 }
 0x1f5   :  { %3232 = vst [vmem:[#allocation2 + $0x200] sm:$0xff] %v5213_v21  ;;  %5222 = vpow2.f32 %v3632_v18  ;;  %v2150_v24 = vadd.f32 %v2149_v23, %v1082_v19  ;;  %v4533_v25 = vpop.f32.mrb[143].mxu0  ;;  %4691 = vmatmul.mubr.msk.f32.gmra.mrb[248].mxu0 %vm280_vm2, %v145_v16 }
 0x1f6   :  { %5224 = vrcp.f32 %v2860_v22  ;;  %v1086_v2 = vpop.f32.mrb[144].mxu1 }
 0x1f7   :  { %v5215_v26 = vpop.eup %5214  ;;  %v3633_v27 = vmul.f32 -1.442695, %v2150_v24  ;;  %v1087_v28 = vadd.f32 %v6892_v12, %v1086_v2  ;;  %v4159_v29 = vpop.f32.mrb[145].mxu1 }
 0x1f8   :  { %v5217_v30 = vpop.eup %5216  ;;  %v2861_v31 = vadd.f32 1.0, %v5215_v26  ;;  %v2154_v32 = vpop.f32.mrb[144].mxu0 }
 0x1f9   :  { %3233 = vst [vmem:[#allocation2 + $0x208] sm:$0xff] %v5217_v30  ;;  %5226 = vpow2.f32 %v3633_v27  ;;  %v2155_v33 = vadd.f32 %v2154_v32, %v1087_v28  ;;  %v4536_v34 = vpop.f32.mrb[145].mxu0 }
 0x1fa   :  { %5228 = vrcp.f32 %v2861_v31  ;;  %v1091_v35 = vpop.f32.mrb[146].mxu1 }
 0x1fb   :  { %v5219_v36 = vpop.eup %5218  ;;  %v3634_v37 = vmul.f32 -1.442695, %v2155_v33  ;;  %v1092_v38 = vadd.f32 %v6892_v12, %v1091_v35  ;;  %v4162_v39 = vpop.f32.mrb[147].mxu1 }
 0x1fc   :  { %v5221_v40 = vpop.eup %5220  ;;  %v2862_v41 = vadd.f32 1.0, %v5219_v36  ;;  %v2159_v42 = vpop.f32.mrb[146].mxu0 }
 0x1fd   :  { %3234 = vst [vmem:[#allocation2 + $0x210] sm:$0xff] %v5221_v40  ;;  %5230 = vpow2.f32 %v3634_v37  ;;  %v2160_v43 = vadd.f32 %v2159_v42, %v1092_v38  ;;  %v4539_v44 = vpop.f32.mrb[147].mxu0 }
 0x1fe   :  { %5232 = vrcp.f32 %v2862_v41  ;;  %v1096_v45 = vpop.f32.mrb[148].mxu1 }
 0x1ff   :  { %v5223_v47 = vpop.eup %5222  ;;  %v3635_v48 = vmul.f32 -1.442695, %v2160_v43  ;;  %v1097_v49 = vadd.f32 %v6892_v12, %v1096_v45  ;;  %v4165_v50 = vpop.f32.mrb[149].mxu1 }
 0x200   :  { %v5225_v51 = vpop.eup %5224  ;;  %v2863_v52 = vadd.f32 1.0, %v5223_v47  ;;  %v2164_v53 = vpop.f32.mrb[148].mxu0 }
 0x201   :  { %3235 = vst [vmem:[#allocation2 + $0x218] sm:$0xff] %v5225_v51  ;;  %5234 = vpow2.f32 %v3635_v48  ;;  %v2165_v54 = vadd.f32 %v2164_v53, %v1097_v49  ;;  %v4542_v55 = vpop.f32.mrb[149].mxu0 }
 0x202   :  { %5236 = vrcp.f32 %v2863_v52  ;;  %v1101_v56 = vpop.f32.mrb[150].mxu1 }
 0x203   :  { %v5227_v57 = vpop.eup %5226  ;;  %v3636_v46 = vmul.f32 -1.442695, %v2165_v54  ;;  %v1102_v58 = vadd.f32 %v6892_v12, %v1101_v56  ;;  %v4168_v59 = vpop.f32.mrb[151].mxu1 }
 0x204   :  { %v5229_v60 = vpop.eup %5228  ;;  %v2864_v62 = vadd.f32 1.0, %v5227_v57  ;;  %v2169_v63 = vpop.f32.mrb[150].mxu0 }
 0x205   :  { %3236 = vst [vmem:[#allocation2 + $0x220] sm:$0xff] %v5229_v60  ;;  %5238 = vpow2.f32 %v3636_v46  ;;  %v2170_v0 = vadd.f32 %v2169_v63, %v1102_v58  ;;  %v4545_v1 = vpop.f32.mrb[151].mxu0 }
 0x206   :  { %5240 = vrcp.f32 %v2864_v62  ;;  %v1106_v3 = vpop.f32.mrb[152].mxu1 }
 0x207   :  { %v5231_v4 = vpop.eup %5230  ;;  %v3637_v5 = vmul.f32 -1.442695, %v2170_v0  ;;  %v1107_v6 = vadd.f32 %v6892_v12, %v1106_v3  ;;  %v4171_v7 = vpop.f32.mrb[153].mxu1 }
 0x208   :  { %v5233_v8 = vpop.eup %5232  ;;  %v2865_v61 = vadd.f32 1.0, %v5231_v4  ;;  %v2174_v9 = vpop.f32.mrb[152].mxu0 }
 0x209   :  { %3237 = vst [vmem:[#allocation2 + $0x228] sm:$0xff] %v5233_v8  ;;  %5242 = vpow2.f32 %v3637_v5  ;;  %v2175_v10 = vadd.f32 %v2174_v9, %v1107_v6  ;;  %v4548_v11 = vpop.f32.mrb[153].mxu0 }
 0x20a   :  { %5244 = vrcp.f32 %v2865_v61  ;;  %v1111_v13 = vpop.f32.mrb[154].mxu1 }
 0x20b   :  { %v5235_v14 = vpop.eup %5234  ;;  %v3638_v15 = vmul.f32 -1.442695, %v2175_v10  ;;  %v1112_v16 = vadd.f32 %v6892_v12, %v1111_v13  ;;  %v4174_v17 = vpop.f32.mrb[155].mxu1 }
 0x20c   :  { %v5237_v18 = vpop.eup %5236  ;;  %v2866_v19 = vadd.f32 1.0, %v5235_v14  ;;  %v2179_v20 = vpop.f32.mrb[154].mxu0 }
 0x20d   :  { %3238 = vst [vmem:[#allocation2 + $0x230] sm:$0xff] %v5237_v18  ;;  %5246 = vpow2.f32 %v3638_v15  ;;  %v2180_v21 = vadd.f32 %v2179_v20, %v1112_v16  ;;  %v4551_v22 = vpop.f32.mrb[155].mxu0 }
 0x20e   :  { %5248 = vrcp.f32 %v2866_v19  ;;  %v1116_v23 = vpop.f32.mrb[156].mxu1 }
 0x20f   :  { %v5239_v24 = vpop.eup %5238  ;;  %v3639_v25 = vmul.f32 -1.442695, %v2180_v21  ;;  %v1117_v2 = vadd.f32 %v6892_v12, %v1116_v23  ;;  %v4177_v26 = vpop.f32.mrb[157].mxu1 }
 0x210   :  { %v5241_v27 = vpop.eup %5240  ;;  %v2867_v28 = vadd.f32 1.0, %v5239_v24  ;;  %v2184_v29 = vpop.f32.mrb[156].mxu0 }
 0x211   :  { %3239 = vst [vmem:[#allocation2 + $0x238] sm:$0xff] %v5241_v27  ;;  %5250 = vpow2.f32 %v3639_v25  ;;  %v2185_v30 = vadd.f32 %v2184_v29, %v1117_v2  ;;  %v4554_v31 = vpop.f32.mrb[157].mxu0 }
 0x212   :  { %5252 = vrcp.f32 %v2867_v28  ;;  %v1121_v32 = vpop.f32.mrb[158].mxu1 }
 0x213   :  { %v5243_v33 = vpop.eup %5242  ;;  %v3640_v34 = vmul.f32 -1.442695, %v2185_v30  ;;  %v1122_v35 = vadd.f32 %v6892_v12, %v1121_v32  ;;  %v4180_v36 = vpop.f32.mrb[159].mxu1 }
 0x214   :  { %v5245_v37 = vpop.eup %5244  ;;  %v2868_v38 = vadd.f32 1.0, %v5243_v33  ;;  %v2189_v39 = vpop.f32.mrb[158].mxu0 }
 0x215   :  { %3240 = vst [vmem:[#allocation2 + $0x240] sm:$0xff] %v5245_v37  ;;  %5254 = vpow2.f32 %v3640_v34  ;;  %v2190_v40 = vadd.f32 %v2189_v39, %v1122_v35  ;;  %v4557_v41 = vpop.f32.mrb[159].mxu0 }
 0x216   :  { %5256 = vrcp.f32 %v2868_v38  ;;  %v1126_v42 = vpop.f32.mrb[160].mxu1 }
 0x217   :  { %v5247_v43 = vpop.eup %5246  ;;  %v3641_v44 = vmul.f32 -1.442695, %v2190_v40  ;;  %v1127_v45 = vadd.f32 %v6892_v12, %v1126_v42  ;;  %v4183_v47 = vpop.f32.mrb[161].mxu1 }
 0x218   :  { %v5249_v48 = vpop.eup %5248  ;;  %v2869_v49 = vadd.f32 1.0, %v5247_v43  ;;  %v2194_v50 = vpop.f32.mrb[160].mxu0 }
 0x219   :  { %3241 = vst [vmem:[#allocation2 + $0x248] sm:$0xff] %v5249_v48  ;;  %5258 = vpow2.f32 %v3641_v44  ;;  %v2195_v51 = vadd.f32 %v2194_v50, %v1127_v45  ;;  %v4560_v52 = vpop.f32.mrb[161].mxu0 }
 0x21a   :  { %5260 = vrcp.f32 %v2869_v49  ;;  %v1131_v53 = vpop.f32.mrb[162].mxu1 }
 0x21b   :  { %v5251_v54 = vpop.eup %5250  ;;  %v3642_v55 = vmul.f32 -1.442695, %v2195_v51  ;;  %v1132_v56 = vadd.f32 %v6892_v12, %v1131_v53  ;;  %v4186_v57 = vpop.f32.mrb[163].mxu1  ;;  %v7123_v53 = vld [vmem:[%s7179_s4] ss:$0 sm:$0xff]  ;;  %s5477_s4 = smov [#allocation2]  }
 0x21c   :  { %v5253_v46 = vpop.eup %5252  ;;  %v2870_v58 = vadd.f32 1.0, %v5251_v54  ;;  %v2199_v59 = vpop.f32.mrb[162].mxu0  ;;  %s3298_s15 = sshll.u32 %s5477_s4, 4  ;;  %s3299_s15 = int_to_ptr.vmem [resolvable:$true] %s3298_s15 }
 0x21d   :  { %3242 = vst [vmem:[#allocation2 + $0x250] sm:$0xff] %v5253_v46  ;;  %5262 = vpow2.f32 %v3642_v55  ;;  %v2200_v60 = vadd.f32 %v2199_v59, %v1132_v56  ;;  %v4563_v62 = vpop.f32.mrb[163].mxu0  ;;  %s5451_s16 = scalar_lea.vmem %s3299_s15, 16000  ;;  %p5456_p1 = scmp.lt.s32.totalorder %s3299_s15, %s3299_s15 }
 0x21e   :  { %5264 = vrcp.f32 %v2870_v58  ;;  %v1136_v63 = vpop.f32.mrb[164].mxu1  ;;  %p5452_p0 = scmp.ne.s32.totalorder %s3299_s15, %s5451_s16  ;;  %p5457_p2 = scmp.lt.s32.totalorder %s5451_s16, %s5451_s16 }
 0x21f   :  { %v5255_v0 = vpop.eup %5254  ;;  %v3643_v1 = vmul.f32 -1.442695, %v2200_v60  ;;  %v1137_v3 = vadd.f32 %v6892_v12, %v1136_v63  ;;  %v4189_v4 = vpop.f32.mrb[165].mxu1 }
 0x220   :  { %v5257_v5 = vpop.eup %5256  ;;  %v2871_v6 = vadd.f32 1.0, %v5255_v0  ;;  %v2204_v7 = vpop.f32.mrb[164].mxu0  ;;  %p5458_p3 = por %p5457_p2, %p5456_p1 }
 0x221   :  { %3243 = vst [vmem:[#allocation2 + $0x258] sm:$0xff] %v5257_v5  ;;  %5266 = vpow2.f32 %v3643_v1  ;;  %v2205_v8 = vadd.f32 %v2204_v7, %v1137_v3  ;;  %v4566_v61 = vpop.f32.mrb[165].mxu0 }
 0x222   :  { %5268 = vrcp.f32 %v2871_v6  ;;  %v1141_v9 = vpop.f32.mrb[166].mxu1  ;;  %p5459_p4 = pnand %p5458_p3, %p5452_p0 }
 0x223   :  { %v5259_v10 = vpop.eup %5258  ;;  %v3644_v11 = vmul.f32 -1.442695, %v2205_v8  ;;  %v1142_v13 = vadd.f32 %v6892_v12, %v1141_v9  ;;  %v4192_v14 = vpop.f32.mrb[167].mxu1 }
 0x224   :  { %v5261_v15 = vpop.eup %5260  ;;  %v2872_v16 = vadd.f32 1.0, %v5259_v10  ;;  %v2209_v17 = vpop.f32.mrb[166].mxu0 }
 0x225   :  { %3244 = vst [vmem:[#allocation2 + $0x260] sm:$0xff] %v5261_v15  ;;  %5270 = vpow2.f32 %v3644_v11  ;;  %v2210_v18 = vadd.f32 %v2209_v17, %v1142_v13  ;;  %v4569_v19 = vpop.f32.mrb[167].mxu0 }
 0x226   :  { %5272 = vrcp.f32 %v2872_v16  ;;  %v1146_v20 = vpop.f32.mrb[168].mxu1 }
 0x227   :  { %v5263_v21 = vpop.eup %5262  ;;  %v3645_v22 = vmul.f32 -1.442695, %v2210_v18  ;;  %v1147_v23 = vadd.f32 %v6892_v12, %v1146_v20  ;;  %v4195_v24 = vpop.f32.mrb[169].mxu1 }
 0x228   :  { %v5265_v25 = vpop.eup %5264  ;;  %v2873_v2 = vadd.f32 1.0, %v5263_v21  ;;  %v2214_v26 = vpop.f32.mrb[168].mxu0 }
 0x229   :  { %3245 = vst [vmem:[#allocation2 + $0x268] sm:$0xff] %v5265_v25  ;;  %5274 = vpow2.f32 %v3645_v22  ;;  %v2215_v27 = vadd.f32 %v2214_v26, %v1147_v23  ;;  %v4572_v28 = vpop.f32.mrb[169].mxu0 }
 0x22a   :  { %5276 = vrcp.f32 %v2873_v2  ;;  %v1151_v29 = vpop.f32.mrb[170].mxu1 }
 0x22b   :  { %v5267_v30 = vpop.eup %5266  ;;  %v3646_v31 = vmul.f32 -1.442695, %v2215_v27  ;;  %v1152_v32 = vadd.f32 %v6892_v12, %v1151_v29  ;;  %v4198_v33 = vpop.f32.mrb[171].mxu1 }
 0x22c   :  { %v5269_v34 = vpop.eup %5268  ;;  %v2874_v35 = vadd.f32 1.0, %v5267_v30  ;;  %v2219_v36 = vpop.f32.mrb[170].mxu0 }
 0x22d   :  { %3246 = vst [vmem:[#allocation2 + $0x270] sm:$0xff] %v5269_v34  ;;  %5278 = vpow2.f32 %v3646_v31  ;;  %v2220_v37 = vadd.f32 %v2219_v36, %v1152_v32  ;;  %v4575_v38 = vpop.f32.mrb[171].mxu0 }
 0x22e   :  { %5280 = vrcp.f32 %v2874_v35  ;;  %v1156_v39 = vpop.f32.mrb[172].mxu1 }
 0x22f   :  { %v5271_v40 = vpop.eup %5270  ;;  %v3647_v41 = vmul.f32 -1.442695, %v2220_v37  ;;  %v1157_v42 = vadd.f32 %v6892_v12, %v1156_v39  ;;  %v4201_v43 = vpop.f32.mrb[173].mxu1 }
 0x230   :  { %v5273_v44 = vpop.eup %5272  ;;  %v2875_v45 = vadd.f32 1.0, %v5271_v40  ;;  %v2224_v47 = vpop.f32.mrb[172].mxu0 }
 0x231   :  { %3247 = vst [vmem:[#allocation2 + $0x278] sm:$0xff] %v5273_v44  ;;  %5282 = vpow2.f32 %v3647_v41  ;;  %v2225_v48 = vadd.f32 %v2224_v47, %v1157_v42  ;;  %v4578_v49 = vpop.f32.mrb[173].mxu0 }
 0x232   :  { %5284 = vrcp.f32 %v2875_v45  ;;  %v1161_v50 = vpop.f32.mrb[174].mxu1 }
 0x233   :  { %v5275_v51 = vpop.eup %5274  ;;  %v3648_v52 = vmul.f32 -1.442695, %v2225_v48  ;;  %v1162_v54 = vadd.f32 %v7123_v53, %v1161_v50  ;;  %v4204_v12 = vpop.f32.mrb[175].mxu1 }
 0x234   :  { %v5277_v55 = vpop.eup %5276  ;;  %v2876_v56 = vadd.f32 1.0, %v5275_v51  ;;  %v2229_v57 = vpop.f32.mrb[174].mxu0 }
 0x235   :  { %3248 = vst [vmem:[#allocation2 + $0x280] sm:$0xff] %v5277_v55  ;;  %5286 = vpow2.f32 %v3648_v52  ;;  %v2230_v46 = vadd.f32 %v2229_v57, %v1162_v54  ;;  %v4581_v58 = vpop.f32.mrb[175].mxu0 }
 0x236   :  { %5288 = vrcp.f32 %v2876_v56  ;;  %v1166_v59 = vpop.f32.mrb[176].mxu1 }
 0x237   :  { %v5279_v60 = vpop.eup %5278  ;;  %v3649_v62 = vmul.f32 -1.442695, %v2230_v46  ;;  %v1167_v63 = vadd.f32 %v7123_v53, %v1166_v59  ;;  %v4207_v0 = vpop.f32.mrb[177].mxu1 }
 0x238   :  { %v5281_v1 = vpop.eup %5280  ;;  %v2877_v3 = vadd.f32 1.0, %v5279_v60  ;;  %v2234_v4 = vpop.f32.mrb[176].mxu0 }
 0x239   :  { %3249 = vst [vmem:[#allocation2 + $0x288] sm:$0xff] %v5281_v1  ;;  %5290 = vpow2.f32 %v3649_v62  ;;  %v2235_v5 = vadd.f32 %v2234_v4, %v1167_v63  ;;  %v4584_v6 = vpop.f32.mrb[177].mxu0 }
 0x23a   :  { %5292 = vrcp.f32 %v2877_v3  ;;  %v1171_v7 = vpop.f32.mrb[178].mxu1 }
 0x23b   :  { %v5283_v8 = vpop.eup %5282  ;;  %v3650_v61 = vmul.f32 -1.442695, %v2235_v5  ;;  %v1172_v9 = vadd.f32 %v7123_v53, %v1171_v7  ;;  %v4210_v10 = vpop.f32.mrb[179].mxu1 }
 0x23c   :  { %v5285_v11 = vpop.eup %5284  ;;  %v2878_v13 = vadd.f32 1.0, %v5283_v8  ;;  %v2239_v14 = vpop.f32.mrb[178].mxu0 }
 0x23d   :  { %3250 = vst [vmem:[#allocation2 + $0x290] sm:$0xff] %v5285_v11  ;;  %5294 = vpow2.f32 %v3650_v61  ;;  %v2240_v15 = vadd.f32 %v2239_v14, %v1172_v9  ;;  %v4587_v16 = vpop.f32.mrb[179].mxu0 }
 0x23e   :  { %5296 = vrcp.f32 %v2878_v13  ;;  %v1176_v17 = vpop.f32.mrb[180].mxu1 }
 0x23f   :  { %v5287_v18 = vpop.eup %5286  ;;  %v3651_v19 = vmul.f32 -1.442695, %v2240_v15  ;;  %v1177_v20 = vadd.f32 %v7123_v53, %v1176_v17  ;;  %v4213_v21 = vpop.f32.mrb[181].mxu1 }
 0x240   :  { %v5289_v22 = vpop.eup %5288  ;;  %v2879_v23 = vadd.f32 1.0, %v5287_v18  ;;  %v2244_v24 = vpop.f32.mrb[180].mxu0 }
 0x241   :  { %3251 = vst [vmem:[#allocation2 + $0x298] sm:$0xff] %v5289_v22  ;;  %5298 = vpow2.f32 %v3651_v19  ;;  %v2245_v25 = vadd.f32 %v2244_v24, %v1177_v20  ;;  %v4590_v2 = vpop.f32.mrb[181].mxu0 }
 0x242   :  { %5300 = vrcp.f32 %v2879_v23  ;;  %v1181_v26 = vpop.f32.mrb[182].mxu1 }
 0x243   :  { %v5291_v27 = vpop.eup %5290  ;;  %v3652_v28 = vmul.f32 -1.442695, %v2245_v25  ;;  %v1182_v29 = vadd.f32 %v7123_v53, %v1181_v26  ;;  %v4216_v30 = vpop.f32.mrb[183].mxu1 }
 0x244   :  { %v5293_v31 = vpop.eup %5292  ;;  %v2880_v32 = vadd.f32 1.0, %v5291_v27  ;;  %v2249_v33 = vpop.f32.mrb[182].mxu0 }
 0x245   :  { %3252 = vst [vmem:[#allocation2 + $0x2a0] sm:$0xff] %v5293_v31  ;;  %5302 = vpow2.f32 %v3652_v28  ;;  %v2250_v34 = vadd.f32 %v2249_v33, %v1182_v29  ;;  %v4593_v35 = vpop.f32.mrb[183].mxu0 }
 0x246   :  { %5304 = vrcp.f32 %v2880_v32  ;;  %v1186_v36 = vpop.f32.mrb[184].mxu1 }
 0x247   :  { %v5295_v37 = vpop.eup %5294  ;;  %v3653_v38 = vmul.f32 -1.442695, %v2250_v34  ;;  %v1187_v39 = vadd.f32 %v7123_v53, %v1186_v36  ;;  %v4219_v40 = vpop.f32.mrb[185].mxu1 }
 0x248   :  { %v5297_v41 = vpop.eup %5296  ;;  %v2881_v42 = vadd.f32 1.0, %v5295_v37  ;;  %v2254_v43 = vpop.f32.mrb[184].mxu0 }
 0x249   :  { %3253 = vst [vmem:[#allocation2 + $0x2a8] sm:$0xff] %v5297_v41  ;;  %5306 = vpow2.f32 %v3653_v38  ;;  %v2255_v44 = vadd.f32 %v2254_v43, %v1187_v39  ;;  %v4596_v45 = vpop.f32.mrb[185].mxu0 }
 0x24a   :  { %5308 = vrcp.f32 %v2881_v42  ;;  %v1191_v47 = vpop.f32.mrb[186].mxu1 }
 0x24b   :  { %v5299_v48 = vpop.eup %5298  ;;  %v3654_v49 = vmul.f32 -1.442695, %v2255_v44  ;;  %v1192_v50 = vadd.f32 %v7123_v53, %v1191_v47  ;;  %v4222_v51 = vpop.f32.mrb[187].mxu1 }
 0x24c   :  { %v5301_v52 = vpop.eup %5300  ;;  %v2882_v54 = vadd.f32 1.0, %v5299_v48  ;;  %v2259_v12 = vpop.f32.mrb[186].mxu0 }
 0x24d   :  { %3254 = vst [vmem:[#allocation2 + $0x2b0] sm:$0xff] %v5301_v52  ;;  %5310 = vpow2.f32 %v3654_v49  ;;  %v2260_v55 = vadd.f32 %v2259_v12, %v1192_v50  ;;  %v4599_v56 = vpop.f32.mrb[187].mxu0 }
 0x24e   :  { %5312 = vrcp.f32 %v2882_v54  ;;  %v1196_v57 = vpop.f32.mrb[188].mxu1 }
 0x24f   :  { %v5303_v46 = vpop.eup %5302  ;;  %v3655_v58 = vmul.f32 -1.442695, %v2260_v55  ;;  %v1197_v59 = vadd.f32 %v7123_v53, %v1196_v57  ;;  %v4225_v60 = vpop.f32.mrb[189].mxu1 }
 0x250   :  { %v5305_v62 = vpop.eup %5304  ;;  %v2883_v63 = vadd.f32 1.0, %v5303_v46  ;;  %v2264_v0 = vpop.f32.mrb[188].mxu0 }
 0x251   :  { %3255 = vst [vmem:[#allocation2 + $0x2b8] sm:$0xff] %v5305_v62  ;;  %5314 = vpow2.f32 %v3655_v58  ;;  %v2265_v1 = vadd.f32 %v2264_v0, %v1197_v59  ;;  %v4602_v3 = vpop.f32.mrb[189].mxu0 }
 0x252   :  { %5316 = vrcp.f32 %v2883_v63  ;;  %v1201_v4 = vpop.f32.mrb[190].mxu1 }
 0x253   :  { %v5307_v5 = vpop.eup %5306  ;;  %v3656_v6 = vmul.f32 -1.442695, %v2265_v1  ;;  %v1202_v7 = vadd.f32 %v7123_v53, %v1201_v4  ;;  %v4228_v8 = vpop.f32.mrb[191].mxu1 }
 0x254   :  { %v5309_v61 = vpop.eup %5308  ;;  %v2884_v9 = vadd.f32 1.0, %v5307_v5  ;;  %v2269_v10 = vpop.f32.mrb[190].mxu0 }
 0x255   :  { %3256 = vst [vmem:[#allocation2 + $0x2c0] sm:$0xff] %v5309_v61  ;;  %5318 = vpow2.f32 %v3656_v6  ;;  %v2270_v11 = vadd.f32 %v2269_v10, %v1202_v7  ;;  %v4605_v13 = vpop.f32.mrb[191].mxu0 }
 0x256   :  { %5320 = vrcp.f32 %v2884_v9  ;;  %v1206_v14 = vpop.f32.mrb[192].mxu1 }
 0x257   :  { %v5311_v15 = vpop.eup %5310  ;;  %v3657_v16 = vmul.f32 -1.442695, %v2270_v11  ;;  %v1207_v17 = vadd.f32 %v7123_v53, %v1206_v14  ;;  %v4231_v18 = vpop.f32.mrb[193].mxu1 }
 0x258   :  { %v5313_v19 = vpop.eup %5312  ;;  %v2885_v20 = vadd.f32 1.0, %v5311_v15  ;;  %v2274_v21 = vpop.f32.mrb[192].mxu0 }
 0x259   :  { %3257 = vst [vmem:[#allocation2 + $0x2c8] sm:$0xff] %v5313_v19  ;;  %5322 = vpow2.f32 %v3657_v16  ;;  %v2275_v22 = vadd.f32 %v2274_v21, %v1207_v17  ;;  %v4608_v23 = vpop.f32.mrb[193].mxu0 }
 0x25a   :  { %5324 = vrcp.f32 %v2885_v20  ;;  %v1211_v24 = vpop.f32.mrb[194].mxu1 }
 0x25b   :  { %v5315_v25 = vpop.eup %5314  ;;  %v3658_v2 = vmul.f32 -1.442695, %v2275_v22  ;;  %v1212_v26 = vadd.f32 %v7123_v53, %v1211_v24  ;;  %v4234_v27 = vpop.f32.mrb[195].mxu1 }
 0x25c   :  { %v5317_v28 = vpop.eup %5316  ;;  %v2886_v29 = vadd.f32 1.0, %v5315_v25  ;;  %v2279_v30 = vpop.f32.mrb[194].mxu0 }
 0x25d   :  { %3258 = vst [vmem:[#allocation2 + $0x2d0] sm:$0xff] %v5317_v28  ;;  %5326 = vpow2.f32 %v3658_v2  ;;  %v2280_v31 = vadd.f32 %v2279_v30, %v1212_v26  ;;  %v4611_v32 = vpop.f32.mrb[195].mxu0 }
 0x25e   :  { %5328 = vrcp.f32 %v2886_v29  ;;  %v1216_v33 = vpop.f32.mrb[196].mxu1 }
 0x25f   :  { %v5319_v34 = vpop.eup %5318  ;;  %v3659_v35 = vmul.f32 -1.442695, %v2280_v31  ;;  %v1217_v36 = vadd.f32 %v7123_v53, %v1216_v33  ;;  %v4237_v37 = vpop.f32.mrb[197].mxu1 }
 0x260   :  { %v5321_v38 = vpop.eup %5320  ;;  %v2887_v39 = vadd.f32 1.0, %v5319_v34  ;;  %v2284_v40 = vpop.f32.mrb[196].mxu0 }
 0x261   :  { %3259 = vst [vmem:[#allocation2 + $0x2d8] sm:$0xff] %v5321_v38  ;;  %5330 = vpow2.f32 %v3659_v35  ;;  %v2285_v41 = vadd.f32 %v2284_v40, %v1217_v36  ;;  %v4614_v42 = vpop.f32.mrb[197].mxu0 }
 0x262   :  { %5332 = vrcp.f32 %v2887_v39  ;;  %v1221_v43 = vpop.f32.mrb[198].mxu1 }
 0x263   :  { %v5323_v44 = vpop.eup %5322  ;;  %v3660_v45 = vmul.f32 -1.442695, %v2285_v41  ;;  %v1222_v47 = vadd.f32 %v7123_v53, %v1221_v43  ;;  %v4240_v48 = vpop.f32.mrb[199].mxu1 }
 0x264   :  { %v5325_v49 = vpop.eup %5324  ;;  %v2888_v50 = vadd.f32 1.0, %v5323_v44  ;;  %v2289_v51 = vpop.f32.mrb[198].mxu0 }
 0x265   :  { %3260 = vst [vmem:[#allocation2 + $0x2e0] sm:$0xff] %v5325_v49  ;;  %5334 = vpow2.f32 %v3660_v45  ;;  %v2290_v52 = vadd.f32 %v2289_v51, %v1222_v47  ;;  %v4617_v54 = vpop.f32.mrb[199].mxu0 }
 0x266   :  { %5336 = vrcp.f32 %v2888_v50  ;;  %v1226_v12 = vpop.f32.mrb[200].mxu1 }
 0x267   :  { %v5327_v55 = vpop.eup %5326  ;;  %v3661_v56 = vmul.f32 -1.442695, %v2290_v52  ;;  %v1227_v57 = vadd.f32 %v7123_v53, %v1226_v12  ;;  %v4243_v46 = vpop.f32.mrb[201].mxu1 }
 0x268   :  { %v5329_v58 = vpop.eup %5328  ;;  %v2889_v59 = vadd.f32 1.0, %v5327_v55  ;;  %v2294_v60 = vpop.f32.mrb[200].mxu0 }
 0x269   :  { %3261 = vst [vmem:[#allocation2 + $0x2e8] sm:$0xff] %v5329_v58  ;;  %5338 = vpow2.f32 %v3661_v56  ;;  %v2295_v62 = vadd.f32 %v2294_v60, %v1227_v57  ;;  %v4620_v63 = vpop.f32.mrb[201].mxu0 }
 0x26a   :  { %5340 = vrcp.f32 %v2889_v59  ;;  %v1231_v0 = vpop.f32.mrb[202].mxu1 }
 0x26b   :  { %v5331_v1 = vpop.eup %5330  ;;  %v3662_v3 = vmul.f32 -1.442695, %v2295_v62  ;;  %v1232_v4 = vadd.f32 %v7123_v53, %v1231_v0  ;;  %v4246_v5 = vpop.f32.mrb[203].mxu1 }
 0x26c   :  { %v5333_v6 = vpop.eup %5332  ;;  %v2890_v7 = vadd.f32 1.0, %v5331_v1  ;;  %v2299_v8 = vpop.f32.mrb[202].mxu0 }
 0x26d   :  { %3262 = vst [vmem:[#allocation2 + $0x2f0] sm:$0xff] %v5333_v6  ;;  %5342 = vpow2.f32 %v3662_v3  ;;  %v2300_v61 = vadd.f32 %v2299_v8, %v1232_v4  ;;  %v4623_v9 = vpop.f32.mrb[203].mxu0 }
 0x26e   :  { %5344 = vrcp.f32 %v2890_v7  ;;  %v1236_v10 = vpop.f32.mrb[204].mxu1 }
 0x26f   :  { %v5335_v11 = vpop.eup %5334  ;;  %v3663_v13 = vmul.f32 -1.442695, %v2300_v61  ;;  %v1237_v14 = vadd.f32 %v7123_v53, %v1236_v10  ;;  %v4249_v15 = vpop.f32.mrb[205].mxu1 }
 0x270   :  { %v5337_v16 = vpop.eup %5336  ;;  %v2891_v17 = vadd.f32 1.0, %v5335_v11  ;;  %v2304_v18 = vpop.f32.mrb[204].mxu0 }
 0x271   :  { %3263 = vst [vmem:[#allocation2 + $0x2f8] sm:$0xff] %v5337_v16  ;;  %5346 = vpow2.f32 %v3663_v13  ;;  %v2305_v19 = vadd.f32 %v2304_v18, %v1237_v14  ;;  %v4626_v20 = vpop.f32.mrb[205].mxu0 }
 0x272   :  { %5348 = vrcp.f32 %v2891_v17  ;;  %v1241_v21 = vpop.f32.mrb[206].mxu1 }
 0x273   :  { %v5339_v22 = vpop.eup %5338  ;;  %v3664_v23 = vmul.f32 -1.442695, %v2305_v19  ;;  %v1242_v24 = vadd.f32 %v7123_v53, %v1241_v21  ;;  %v4252_v25 = vpop.f32.mrb[207].mxu1 }
 0x274   :  { %v5341_v2 = vpop.eup %5340  ;;  %v2892_v26 = vadd.f32 1.0, %v5339_v22  ;;  %v2309_v27 = vpop.f32.mrb[206].mxu0 }
 0x275   :  { %3264 = vst [vmem:[#allocation2 + $0x300] sm:$0xff] %v5341_v2  ;;  %5350 = vpow2.f32 %v3664_v23  ;;  %v2310_v28 = vadd.f32 %v2309_v27, %v1242_v24  ;;  %v4629_v29 = vpop.f32.mrb[207].mxu0 }
 0x276   :  { %5352 = vrcp.f32 %v2892_v26  ;;  %v1246_v30 = vpop.f32.mrb[208].mxu1 }
 0x277   :  { %v5343_v31 = vpop.eup %5342  ;;  %v3665_v32 = vmul.f32 -1.442695, %v2310_v28  ;;  %v1247_v33 = vadd.f32 %v7123_v53, %v1246_v30  ;;  %v4255_v34 = vpop.f32.mrb[209].mxu1 }
 0x278   :  { %v5345_v35 = vpop.eup %5344  ;;  %v2893_v36 = vadd.f32 1.0, %v5343_v31  ;;  %v2314_v37 = vpop.f32.mrb[208].mxu0 }
 0x279   :  { %3265 = vst [vmem:[#allocation2 + $0x308] sm:$0xff] %v5345_v35  ;;  %5354 = vpow2.f32 %v3665_v32  ;;  %v2315_v38 = vadd.f32 %v2314_v37, %v1247_v33  ;;  %v4632_v39 = vpop.f32.mrb[209].mxu0 }
 0x27a   :  { %5356 = vrcp.f32 %v2893_v36  ;;  %v1251_v40 = vpop.f32.mrb[210].mxu1 }
 0x27b   :  { %v5347_v41 = vpop.eup %5346  ;;  %v3666_v42 = vmul.f32 -1.442695, %v2315_v38  ;;  %v1252_v43 = vadd.f32 %v7123_v53, %v1251_v40  ;;  %v4258_v44 = vpop.f32.mrb[211].mxu1 }
 0x27c   :  { %v5349_v45 = vpop.eup %5348  ;;  %v2894_v47 = vadd.f32 1.0, %v5347_v41  ;;  %v2319_v48 = vpop.f32.mrb[210].mxu0 }
 0x27d   :  { %3266 = vst [vmem:[#allocation2 + $0x310] sm:$0xff] %v5349_v45  ;;  %5358 = vpow2.f32 %v3666_v42  ;;  %v2320_v49 = vadd.f32 %v2319_v48, %v1252_v43  ;;  %v4635_v50 = vpop.f32.mrb[211].mxu0 }
 0x27e   :  { %5360 = vrcp.f32 %v2894_v47  ;;  %v1256_v51 = vpop.f32.mrb[212].mxu1 }
 0x27f   :  { %v5351_v52 = vpop.eup %5350  ;;  %v3667_v54 = vmul.f32 -1.442695, %v2320_v49  ;;  %v1257_v12 = vadd.f32 %v7123_v53, %v1256_v51  ;;  %v4261_v55 = vpop.f32.mrb[213].mxu1 }
 0x280   :  { %v5353_v56 = vpop.eup %5352  ;;  %v2895_v57 = vadd.f32 1.0, %v5351_v52  ;;  %v2324_v46 = vpop.f32.mrb[212].mxu0 }
 0x281   :  { %3267 = vst [vmem:[#allocation2 + $0x318] sm:$0xff] %v5353_v56  ;;  %5362 = vpow2.f32 %v3667_v54  ;;  %v2325_v58 = vadd.f32 %v2324_v46, %v1257_v12  ;;  %v4638_v59 = vpop.f32.mrb[213].mxu0 }
 0x282   :  { %5364 = vrcp.f32 %v2895_v57  ;;  %v1261_v60 = vpop.f32.mrb[214].mxu1 }
 0x283   :  { %v5355_v62 = vpop.eup %5354  ;;  %v3668_v63 = vmul.f32 -1.442695, %v2325_v58  ;;  %v1262_v0 = vadd.f32 %v7123_v53, %v1261_v60  ;;  %v4264_v1 = vpop.f32.mrb[215].mxu1 }
 0x284   :  { %v5357_v3 = vpop.eup %5356  ;;  %v2896_v4 = vadd.f32 1.0, %v5355_v62  ;;  %v2329_v5 = vpop.f32.mrb[214].mxu0 }
 0x285   :  { %3268 = vst [vmem:[#allocation2 + $0x320] sm:$0xff] %v5357_v3  ;;  %5366 = vpow2.f32 %v3668_v63  ;;  %v2330_v6 = vadd.f32 %v2329_v5, %v1262_v0  ;;  %v4641_v7 = vpop.f32.mrb[215].mxu0 }
 0x286   :  { %5368 = vrcp.f32 %v2896_v4  ;;  %v1266_v8 = vpop.f32.mrb[216].mxu1 }
 0x287   :  { %v5359_v61 = vpop.eup %5358  ;;  %v3669_v9 = vmul.f32 -1.442695, %v2330_v6  ;;  %v1267_v10 = vadd.f32 %v7123_v53, %v1266_v8  ;;  %v4267_v11 = vpop.f32.mrb[217].mxu1 }
 0x288   :  { %v5361_v13 = vpop.eup %5360  ;;  %v2897_v14 = vadd.f32 1.0, %v5359_v61  ;;  %v2334_v15 = vpop.f32.mrb[216].mxu0 }
 0x289   :  { %3269 = vst [vmem:[#allocation2 + $0x328] sm:$0xff] %v5361_v13  ;;  %5370 = vpow2.f32 %v3669_v9  ;;  %v2335_v16 = vadd.f32 %v2334_v15, %v1267_v10  ;;  %v4644_v17 = vpop.f32.mrb[217].mxu0 }
 0x28a   :  { %5372 = vrcp.f32 %v2897_v14  ;;  %v1271_v18 = vpop.f32.mrb[218].mxu1 }
 0x28b   :  { %v5363_v19 = vpop.eup %5362  ;;  %v3670_v20 = vmul.f32 -1.442695, %v2335_v16  ;;  %v1272_v21 = vadd.f32 %v7123_v53, %v1271_v18  ;;  %v4270_v22 = vpop.f32.mrb[219].mxu1 }
 0x28c   :  { %v5365_v23 = vpop.eup %5364  ;;  %v2898_v24 = vadd.f32 1.0, %v5363_v19  ;;  %v2339_v25 = vpop.f32.mrb[218].mxu0 }
 0x28d   :  { %3270 = vst [vmem:[#allocation2 + $0x330] sm:$0xff] %v5365_v23  ;;  %5374 = vpow2.f32 %v3670_v20  ;;  %v2340_v2 = vadd.f32 %v2339_v25, %v1272_v21  ;;  %v4647_v26 = vpop.f32.mrb[219].mxu0 }
 0x28e   :  { %5376 = vrcp.f32 %v2898_v24  ;;  %v1276_v27 = vpop.f32.mrb[220].mxu1 }
 0x28f   :  { %v5367_v28 = vpop.eup %5366  ;;  %v3671_v29 = vmul.f32 -1.442695, %v2340_v2  ;;  %v1277_v30 = vadd.f32 %v7123_v53, %v1276_v27  ;;  %v4273_v31 = vpop.f32.mrb[221].mxu1 }
 0x290   :  { %v5369_v32 = vpop.eup %5368  ;;  %v2899_v33 = vadd.f32 1.0, %v5367_v28  ;;  %v2344_v34 = vpop.f32.mrb[220].mxu0 }
 0x291   :  { %3271 = vst [vmem:[#allocation2 + $0x338] sm:$0xff] %v5369_v32  ;;  %5378 = vpow2.f32 %v3671_v29  ;;  %v2345_v35 = vadd.f32 %v2344_v34, %v1277_v30  ;;  %v4650_v36 = vpop.f32.mrb[221].mxu0 }
 0x292   :  { %5380 = vrcp.f32 %v2899_v33  ;;  %v1281_v37 = vpop.f32.mrb[222].mxu1 }
 0x293   :  { %v5371_v38 = vpop.eup %5370  ;;  %v3672_v39 = vmul.f32 -1.442695, %v2345_v35  ;;  %v1282_v40 = vadd.f32 %v7123_v53, %v1281_v37  ;;  %v4276_v41 = vpop.f32.mrb[223].mxu1 }
 0x294   :  { %v5373_v42 = vpop.eup %5372  ;;  %v2900_v43 = vadd.f32 1.0, %v5371_v38  ;;  %v2349_v44 = vpop.f32.mrb[222].mxu0 }
 0x295   :  { %3272 = vst [vmem:[#allocation2 + $0x340] sm:$0xff] %v5373_v42  ;;  %5382 = vpow2.f32 %v3672_v39  ;;  %v2350_v45 = vadd.f32 %v2349_v44, %v1282_v40  ;;  %v4653_v47 = vpop.f32.mrb[223].mxu0 }
 0x296   :  { %5384 = vrcp.f32 %v2900_v43  ;;  %v1286_v48 = vpop.f32.mrb[224].mxu1 }
 0x297   :  { %v5375_v49 = vpop.eup %5374  ;;  %v3673_v50 = vmul.f32 -1.442695, %v2350_v45  ;;  %v1287_v51 = vadd.f32 %v7123_v53, %v1286_v48  ;;  %v4279_v52 = vpop.f32.mrb[225].mxu1 }
 0x298   :  { %v5377_v54 = vpop.eup %5376  ;;  %v2901_v12 = vadd.f32 1.0, %v5375_v49  ;;  %v2354_v55 = vpop.f32.mrb[224].mxu0 }
 0x299   :  { %3273 = vst [vmem:[#allocation2 + $0x348] sm:$0xff] %v5377_v54  ;;  %5386 = vpow2.f32 %v3673_v50  ;;  %v2355_v56 = vadd.f32 %v2354_v55, %v1287_v51  ;;  %v4656_v57 = vpop.f32.mrb[225].mxu0 }
 0x29a   :  { %5388 = vrcp.f32 %v2901_v12  ;;  %v1291_v46 = vpop.f32.mrb[226].mxu1 }
 0x29b   :  { %v5379_v58 = vpop.eup %5378  ;;  %v3674_v59 = vmul.f32 -1.442695, %v2355_v56  ;;  %v1292_v60 = vadd.f32 %v7123_v53, %v1291_v46  ;;  %v4282_v62 = vpop.f32.mrb[227].mxu1 }
 0x29c   :  { %v5381_v63 = vpop.eup %5380  ;;  %v2902_v0 = vadd.f32 1.0, %v5379_v58  ;;  %v2359_v1 = vpop.f32.mrb[226].mxu0 }
 0x29d   :  { %3274 = vst [vmem:[#allocation2 + $0x350] sm:$0xff] %v5381_v63  ;;  %5390 = vpow2.f32 %v3674_v59  ;;  %v2360_v3 = vadd.f32 %v2359_v1, %v1292_v60  ;;  %v4659_v4 = vpop.f32.mrb[227].mxu0 }
 0x29e   :  { %5392 = vrcp.f32 %v2902_v0  ;;  %v1296_v5 = vpop.f32.mrb[228].mxu1 }
 0x29f   :  { %v5383_v6 = vpop.eup %5382  ;;  %v3675_v7 = vmul.f32 -1.442695, %v2360_v3  ;;  %v1297_v8 = vadd.f32 %v7123_v53, %v1296_v5  ;;  %v4285_v61 = vpop.f32.mrb[229].mxu1 }
 0x2a0   :  { %v5385_v9 = vpop.eup %5384  ;;  %v2903_v10 = vadd.f32 1.0, %v5383_v6  ;;  %v2364_v11 = vpop.f32.mrb[228].mxu0 }
 0x2a1   :  { %3275 = vst [vmem:[#allocation2 + $0x358] sm:$0xff] %v5385_v9  ;;  %5394 = vpow2.f32 %v3675_v7  ;;  %v2365_v13 = vadd.f32 %v2364_v11, %v1297_v8  ;;  %v4662_v14 = vpop.f32.mrb[229].mxu0 }
 0x2a2   :  { %5396 = vrcp.f32 %v2903_v10  ;;  %v1301_v15 = vpop.f32.mrb[230].mxu1 }
 0x2a3   :  { %v5387_v16 = vpop.eup %5386  ;;  %v3676_v17 = vmul.f32 -1.442695, %v2365_v13  ;;  %v1302_v18 = vadd.f32 %v7123_v53, %v1301_v15  ;;  %v4288_v19 = vpop.f32.mrb[231].mxu1 }
 0x2a4   :  { %v5389_v20 = vpop.eup %5388  ;;  %v2904_v21 = vadd.f32 1.0, %v5387_v16  ;;  %v2369_v22 = vpop.f32.mrb[230].mxu0 }
 0x2a5   :  { %3276 = vst [vmem:[#allocation2 + $0x360] sm:$0xff] %v5389_v20  ;;  %5398 = vpow2.f32 %v3676_v17  ;;  %v2370_v23 = vadd.f32 %v2369_v22, %v1302_v18  ;;  %v4665_v24 = vpop.f32.mrb[231].mxu0 }
 0x2a6   :  { %5400 = vrcp.f32 %v2904_v21  ;;  %v1306_v25 = vpop.f32.mrb[232].mxu1 }
 0x2a7   :  { %v5391_v2 = vpop.eup %5390  ;;  %v3677_v26 = vmul.f32 -1.442695, %v2370_v23  ;;  %v1307_v27 = vadd.f32 %v7123_v53, %v1306_v25  ;;  %v4291_v28 = vpop.f32.mrb[233].mxu1 }
 0x2a8   :  { %v5393_v29 = vpop.eup %5392  ;;  %v2905_v30 = vadd.f32 1.0, %v5391_v2  ;;  %v2374_v31 = vpop.f32.mrb[232].mxu0 }
 0x2a9   :  { %3277 = vst [vmem:[#allocation2 + $0x368] sm:$0xff] %v5393_v29  ;;  %5402 = vpow2.f32 %v3677_v26  ;;  %v2375_v32 = vadd.f32 %v2374_v31, %v1307_v27  ;;  %v4668_v33 = vpop.f32.mrb[233].mxu0 }
 0x2aa   :  { %5404 = vrcp.f32 %v2905_v30  ;;  %v1311_v34 = vpop.f32.mrb[234].mxu1 }
 0x2ab   :  { %v5395_v35 = vpop.eup %5394  ;;  %v3678_v36 = vmul.f32 -1.442695, %v2375_v32  ;;  %v1312_v37 = vadd.f32 %v7123_v53, %v1311_v34  ;;  %v4294_v38 = vpop.f32.mrb[235].mxu1 }
 0x2ac   :  { %v5397_v39 = vpop.eup %5396  ;;  %v2906_v40 = vadd.f32 1.0, %v5395_v35  ;;  %v2379_v41 = vpop.f32.mrb[234].mxu0 }
 0x2ad   :  { %3278 = vst [vmem:[#allocation2 + $0x370] sm:$0xff] %v5397_v39  ;;  %5406 = vpow2.f32 %v3678_v36  ;;  %v2380_v42 = vadd.f32 %v2379_v41, %v1312_v37  ;;  %v4671_v43 = vpop.f32.mrb[235].mxu0 }
 0x2ae   :  { %5408 = vrcp.f32 %v2906_v40  ;;  %v1316_v44 = vpop.f32.mrb[236].mxu1 }
 0x2af   :  { %v5399_v45 = vpop.eup %5398  ;;  %v3679_v47 = vmul.f32 -1.442695, %v2380_v42  ;;  %v1317_v48 = vadd.f32 %v7123_v53, %v1316_v44  ;;  %v4297_v49 = vpop.f32.mrb[237].mxu1 }
 0x2b0   :  { %v5401_v50 = vpop.eup %5400  ;;  %v2907_v51 = vadd.f32 1.0, %v5399_v45  ;;  %v2384_v52 = vpop.f32.mrb[236].mxu0 }
 0x2b1   :  { %3279 = vst [vmem:[#allocation2 + $0x378] sm:$0xff] %v5401_v50  ;;  %5410 = vpow2.f32 %v3679_v47  ;;  %v2385_v54 = vadd.f32 %v2384_v52, %v1317_v48  ;;  %v4674_v12 = vpop.f32.mrb[237].mxu0 }
 0x2b2   :  { %5412 = vrcp.f32 %v2907_v51  ;;  %v1321_v55 = vpop.f32.mrb[238].mxu1 }
 0x2b3   :  { %v5403_v56 = vpop.eup %5402  ;;  %v3680_v57 = vmul.f32 -1.442695, %v2385_v54  ;;  %v1322_v46 = vadd.f32 %v7123_v53, %v1321_v55  ;;  %v4300_v58 = vpop.f32.mrb[239].mxu1 }
 0x2b4   :  { %v5405_v59 = vpop.eup %5404  ;;  %v2908_v60 = vadd.f32 1.0, %v5403_v56  ;;  %v2389_v62 = vpop.f32.mrb[238].mxu0 }
 0x2b5   :  { %3280 = vst [vmem:[#allocation2 + $0x380] sm:$0xff] %v5405_v59  ;;  %5414 = vpow2.f32 %v3680_v57  ;;  %v2390_v63 = vadd.f32 %v2389_v62, %v1322_v46  ;;  %v4677_v0 = vpop.f32.mrb[239].mxu0 }
 0x2b6   :  { %5416 = vrcp.f32 %v2908_v60  ;;  %v1326_v1 = vpop.f32.mrb[240].mxu1 }
 0x2b7   :  { %v5407_v3 = vpop.eup %5406  ;;  %v3681_v4 = vmul.f32 -1.442695, %v2390_v63  ;;  %v1327_v5 = vadd.f32 %v7123_v53, %v1326_v1  ;;  %v4303_v6 = vpop.f32.mrb[241].mxu1 }
 0x2b8   :  { %v5409_v7 = vpop.eup %5408  ;;  %v2909_v8 = vadd.f32 1.0, %v5407_v3  ;;  %v2394_v61 = vpop.f32.mrb[240].mxu0 }
 0x2b9   :  { %3281 = vst [vmem:[#allocation2 + $0x388] sm:$0xff] %v5409_v7  ;;  %5418 = vpow2.f32 %v3681_v4  ;;  %v2395_v9 = vadd.f32 %v2394_v61, %v1327_v5  ;;  %v4680_v10 = vpop.f32.mrb[241].mxu0 }
 0x2ba   :  { %5420 = vrcp.f32 %v2909_v8  ;;  %v1331_v11 = vpop.f32.mrb[242].mxu1 }
 0x2bb   :  { %v5411_v13 = vpop.eup %5410  ;;  %v3682_v14 = vmul.f32 -1.442695, %v2395_v9  ;;  %v1332_v15 = vadd.f32 %v7123_v53, %v1331_v11  ;;  %v4306_v16 = vpop.f32.mrb[243].mxu1 }
 0x2bc   :  { %v5413_v17 = vpop.eup %5412  ;;  %v2910_v18 = vadd.f32 1.0, %v5411_v13  ;;  %v2399_v19 = vpop.f32.mrb[242].mxu0 }
 0x2bd   :  { %3282 = vst [vmem:[#allocation2 + $0x390] sm:$0xff] %v5413_v17  ;;  %5422 = vpow2.f32 %v3682_v14  ;;  %v2400_v20 = vadd.f32 %v2399_v19, %v1332_v15  ;;  %v4683_v21 = vpop.f32.mrb[243].mxu0 }
 0x2be   :  { %5424 = vrcp.f32 %v2910_v18  ;;  %v1336_v22 = vpop.f32.mrb[244].mxu1 }
 0x2bf   :  { %v5415_v23 = vpop.eup %5414  ;;  %v3683_v24 = vmul.f32 -1.442695, %v2400_v20  ;;  %v1337_v25 = vadd.f32 %v7123_v53, %v1336_v22  ;;  %v4309_v2 = vpop.f32.mrb[245].mxu1 }
 0x2c0   :  { %v5417_v26 = vpop.eup %5416  ;;  %v2911_v27 = vadd.f32 1.0, %v5415_v23  ;;  %v2404_v28 = vpop.f32.mrb[244].mxu0 }
 0x2c1   :  { %3283 = vst [vmem:[#allocation2 + $0x398] sm:$0xff] %v5417_v26  ;;  %5426 = vpow2.f32 %v3683_v24  ;;  %v2405_v29 = vadd.f32 %v2404_v28, %v1337_v25  ;;  %v4686_v30 = vpop.f32.mrb[245].mxu0 }
 0x2c2   :  { %5428 = vrcp.f32 %v2911_v27  ;;  %v1341_v31 = vpop.f32.mrb[246].mxu1 }
 0x2c3   :  { %v5419_v32 = vpop.eup %5418  ;;  %v3684_v33 = vmul.f32 -1.442695, %v2405_v29  ;;  %v1342_v34 = vadd.f32 %v7123_v53, %v1341_v31  ;;  %v4312_v35 = vpop.f32.mrb[247].mxu1 }
 0x2c4   :  { %v5421_v36 = vpop.eup %5420  ;;  %v2912_v37 = vadd.f32 1.0, %v5419_v32  ;;  %v2409_v38 = vpop.f32.mrb[246].mxu0 }
 0x2c5   :  { %3284 = vst [vmem:[#allocation2 + $0x3a0] sm:$0xff] %v5421_v36  ;;  %5430 = vpow2.f32 %v3684_v33  ;;  %v2410_v39 = vadd.f32 %v2409_v38, %v1342_v34  ;;  %v4689_v40 = vpop.f32.mrb[247].mxu0 }
 0x2c6   :  { %5432 = vrcp.f32 %v2912_v37  ;;  %v1346_v41 = vpop.f32.mrb[248].mxu1 }
 0x2c7   :  { %v5423_v42 = vpop.eup %5422  ;;  %v3685_v43 = vmul.f32 -1.442695, %v2410_v39  ;;  %v1347_v44 = vadd.f32 %v7123_v53, %v1346_v41  ;;  %v4315_v45 = vpop.f32.mrb[249].mxu1 }
 0x2c8   :  { %v5425_v47 = vpop.eup %5424  ;;  %v2913_v48 = vadd.f32 1.0, %v5423_v42  ;;  %v2414_v49 = vpop.f32.mrb[248].mxu0 }
 0x2c9   :  { %3285 = vst [vmem:[#allocation2 + $0x3a8] sm:$0xff] %v5425_v47  ;;  %5434 = vpow2.f32 %v3685_v43  ;;  %v2415_v50 = vadd.f32 %v2414_v49, %v1347_v44  ;;  %v4692_v51 = vpop.f32.mrb[249].mxu0 }
 0x2ca   :  { %5436 = vrcp.f32 %v2913_v48 }
 0x2cb   :  { %v5427_v52 = vpop.eup %5426  ;;  %v3686_v54 = vmul.f32 -1.442695, %v2415_v50 }
 0x2cc   :  { %v5429_v12 = vpop.eup %5428  ;;  %v2914_v55 = vadd.f32 1.0, %v5427_v52 }
 0x2cd   :  { %3286 = vst [vmem:[#allocation2 + $0x3b0] sm:$0xff] %v5429_v12  ;;  %5438 = vpow2.f32 %v3686_v54 }
 0x2ce   :  { %5440 = vrcp.f32 %v2914_v55 }
 0x2cf   :  { %v5431_v56 = vpop.eup %5430 }
 0x2d0   :  { %v5433_v57 = vpop.eup %5432  ;;  %v2915_v46 = vadd.f32 1.0, %v5431_v56 }
 0x2d1   :  { %3287 = vst [vmem:[#allocation2 + $0x3b8] sm:$0xff] %v5433_v57 }
 0x2d2   :  { %5442 = vrcp.f32 %v2915_v46 }
 0x2d3   :  { %v5435_v53 = vpop.eup %5434 }
 0x2d4   :  { %v5437_v58 = vpop.eup %5436  ;;  %v2916_v59 = vadd.f32 1.0, %v5435_v53 }
 0x2d5   :  { %3288 = vst [vmem:[#allocation2 + $0x3c0] sm:$0xff] %v5437_v58 }
 0x2d6   :  { %5444 = vrcp.f32 %v2916_v59 }
 0x2d7   :  { %v5439_v60 = vpop.eup %5438 }
 0x2d8   :  { %v5441_v62 = vpop.eup %5440  ;;  %v2917_v63 = vadd.f32 1.0, %v5439_v60 }
 0x2d9   :  { %3289 = vst [vmem:[#allocation2 + $0x3c8] sm:$0xff] %v5441_v62 }
 0x2da   :  { %5446 = vrcp.f32 %v2917_v63 }
 0x2dc   :  { %v5443_v0 = vpop.eup %5442 }
 0x2dd   :  { %3290 = vst [vmem:[#allocation2 + $0x3d0] sm:$0xff] %v5443_v0 }
 0x2e0   :  { %v5445_v1 = vpop.eup %5444 }
 0x2e1   :  { %3291 = vst [vmem:[#allocation2 + $0x3d8] sm:$0xff] %v5445_v1 }
 0x2e4   :  { %v5447_v3 = vpop.eup %5446 }
 0x2e5   :  { %3292 = vst [vmem:[#allocation2 + $0x3e0] sm:$0xff] %v5447_v3 }
 0x2e6   :  { %5462 = shalt.err (!%p5459_p4)
}
 0x2e7   :  { %s5463_s19 = scalar_lea.hbm %s7180_s5, 16000 }
 0x2e8   :  { %p5464_p5 = scmp.ne.s32.totalorder %s7180_s5, %s5463_s19  ;;  %p5467_p6 = scmp.lt.u32.totalorder %s5463_s19, %s7180_s5 }
 0x2ea   :  { %p5469_p7 = pnand %p5467_p6, %p5464_p5 }
 0x2ec   :  { %5472 = shalt.err (!%p5469_p7)
}
 0x2ed   :  { %s5478_s3 = smov 128   ;;  %s5479_s24 = smov 8  }
 0x2ee   :  { %3304 = dma.vmem_to_hbm [thread:$0]  %s3299_s15, 16000, %s7180_s5, [#allocation3], %s5478_s3, %s5478_s3, %s5479_s24  }
 0x2ef   :  { %5473 = dma.done.wait [#allocation3], 16000  }
 0x2f0   :  { %5474 = vsyncadd [#allocation3], 4294951296 }
 0x2f1   :  { %3308 = vsyncpa [#allocation3], 1 }

</bundles_post_ra>
